<compile_context>
chip_gen: v7x
topology: tpu7x:2x2x1
jax: 0.10.0
libtpu: 0.0.40
codegen_flags: <defaults>
</compile_context>

<pallas_src>
import functools

import numpy as np
import jax
import jax.numpy as jnp
from jax import lax
from jax.experimental import pallas as pl
from jax.experimental.pallas import tpu as pltpu

KH = KW = 4
STRIDE = 2
PAD = 1          # get_same_padding(kernel_size=4, stride=2) == 1
BN_EPS = 1e-5
LANE = 128       # pad C_out / K to the 128-lane vreg width


# ----------------------------------------------------------------------------
# Fused kernel
# ----------------------------------------------------------------------------
def _make_kernel(layer_ms):
    """layer_ms[l] = number of output rows (N*OH*OW) of layer l."""
    num_layers = len(layer_ms)
    n_in = 3 + 2 * (num_layers - 1)   # patches, w0, (sel_l, w_l)*, shifts

    def kernel(*refs):
        in_refs, out_refs = refs[:n_in], refs[n_in:]
        patches_ref, w0_ref = in_refs[0], in_refs[1]
        shifts_ref = in_refs[-1]

        def finish(acc, l):
            acc = acc + shifts_ref[pl.ds(l, 1), :]            # (M,128)+(1,128)
            return jnp.maximum(acc, 0.0) if l < num_layers - 1 else jnp.tanh(acc)

        # ---- Layer 0: lane-padded im2col patches (from wrapper) on the MXU.
        act = finish(
            jnp.dot(patches_ref[...], w0_ref[...],
                    preferred_element_type=jnp.float32), 0)
        out_refs[0][...] = act

        # ---- Layers 1..L-1: in-kernel im2col via selection matmul + 16 taps.
        for l in range(1, num_layers):
            s_ref = in_refs[2 * l]        # (16*M_l, M_{l-1}) 0/1 gather matrix
            w_ref = in_refs[2 * l + 1]    # (16, 128, 128) per-tap weights
            m = layer_ms[l]
            # Gather every stride-2 4x4 tap of the previous activation at once:
            # taps stacked along rows -> (16*M_l, 128).
            p = jnp.dot(s_ref[...], act, preferred_element_type=jnp.float32)
            acc = jnp.zeros((m, LANE), jnp.float32)
            for t in range(KH * KW):                          # static unroll
                acc = acc + jnp.dot(p[t * m:(t + 1) * m, :], w_ref[t],
                                    preferred_element_type=jnp.float32)
            act = finish(acc, l)
            out_refs[l][...] = act

    return kernel


# ----------------------------------------------------------------------------
# Host-side operand builders (constants / boundary glue only)
# ----------------------------------------------------------------------------
def _conv_out(size):
    return (size + 2 * PAD - KH) // STRIDE + 1


def _im2col(x):
    # x: (N, C, H, W) -> patches (N*OH*OW, C*KH*KW); feature order (C, KH, KW)
    # matches PyTorch's weight.reshape(Cout, C*KH*KW) flattening.
    n, c, h, w = x.shape
    patches = lax.conv_general_dilated_patches(
        x, filter_shape=(KH, KW), window_strides=(STRIDE, STRIDE),
        padding=((PAD, PAD), (PAD, PAD)))
    _, k, oh, ow = patches.shape                 # (N, C*KH*KW, OH, OW)
    patches = jnp.transpose(patches, (0, 2, 3, 1)).reshape(n * oh * ow, k)
    return patches, oh, ow


def _flat_weight(weight, scale):
    """(Cout,Cin,4,4) -> lane-padded (K_pad,128) matmul weight, scale folded."""
    cout, cin = weight.shape[:2]
    assert cout <= LANE
    k = cin * KH * KW
    wm = (weight * scale[:, None, None, None]).reshape(cout, k).T
    return jnp.pad(wm.astype(jnp.float32), ((0, (-k) % LANE), (0, LANE - cout)))


def _tap_weights(weight, scale):
    """(Cout,Cin,4,4) -> (16,128,128) per-tap weights, scale folded."""
    cout, cin = weight.shape[:2]
    assert cout <= LANE and cin <= LANE
    wt = weight * scale[:, None, None, None]
    wt = jnp.transpose(wt, (2, 3, 1, 0)).reshape(KH * KW, cin, cout)
    return jnp.pad(wt.astype(jnp.float32),
                   ((0, 0), (0, LANE - cin), (0, LANE - cout)))


def _make_selection(n, h_in, w_in, oh, ow):
    """0/1 matrix (16*N*OH*OW, N*H_in*W_in): row t*M+m picks the input pixel
    feeding tap t of output pixel m (all-zero row == conv zero-padding)."""
    m_out = n * oh * ow
    sel = np.zeros((KH * KW, m_out, n * h_in * w_in), np.float32)
    for kh in range(KH):
        for kw in range(KW):
            t = kh * KW + kw
            for b in range(n):
                for y in range(oh):
                    ih = STRIDE * y + kh - PAD
                    if not 0 <= ih < h_in:
                        continue
                    for x in range(ow):
                        iw = STRIDE * x + kw - PAD
                        if not 0 <= iw < w_in:
                            continue
                        sel[t, b * oh * ow + y * ow + x,
                            b * h_in * w_in + ih * w_in + iw] = 1.0
    return jnp.asarray(sel.reshape(KH * KW * m_out, n * h_in * w_in))


def _unpack(out, n, oh, ow, c):
    """(M,128) lane-padded channel-last -> NCHW with padding sliced off."""
    return jnp.transpose(out[:, :c].reshape(n, oh, ow, c), (0, 3, 1, 2))


# ----------------------------------------------------------------------------
# Parameters (synthetic, deterministic, mirroring IdEncoder.__init__ shapes)
# ----------------------------------------------------------------------------
def init_id_encoder_params(key, in_channels, chs):
    chs_full = [in_channels] + list(chs) + [1]
    params = []
    for i in range(len(chs_full) - 1):
        cin, cout = chs_full[i], chs_full[i + 1]
        key, kw_, kb_, kg_, kbe_, km_, kv_ = jax.random.split(key, 7)
        w = 0.1 * jax.random.normal(kw_, (cout, cin, KH, KW), jnp.float32)
        b = 0.1 * jax.random.normal(kb_, (cout,), jnp.float32)
        is_last = (i == len(chs_full) - 2)
        if not is_last:
            # Conv2dBlock(use_norm=True, act=ReLU): fold BatchNorm2d (eval).
            gamma = 1.0 + 0.1 * jax.random.normal(kg_, (cout,), jnp.float32)
            beta = 0.1 * jax.random.normal(kbe_, (cout,), jnp.float32)
            running_mean = 0.1 * jax.random.normal(km_, (cout,), jnp.float32)
            running_var = 1.0 + jax.random.uniform(kv_, (cout,), jnp.float32)
            inv_std = gamma / jnp.sqrt(running_var + BN_EPS)
            scale = inv_std
            shift = beta + (b - running_mean) * inv_std
            act = "relu"
        else:
            # Final Conv2dBlock(use_norm=False, act=Tanh)
            scale = jnp.ones((cout,), jnp.float32)
            shift = b
            act = "tanh"
        params.append((w, b, scale, shift, act))
    return params


# ----------------------------------------------------------------------------
# Forward (matches IdEncoder.forward: returns (encoded, intermediates))
# ----------------------------------------------------------------------------
def id_encoder_forward(images, params):
    n, _, h, w = images.shape
    num_layers = len(params)
    couts = [p[0].shape[0] for p in params]

    sizes = [(h, w)]
    for _ in range(num_layers):
        sizes.append((_conv_out(sizes[-1][0]), _conv_out(sizes[-1][1])))
    ms = [n * oh * ow for (oh, ow) in sizes[1:]]

    # Input-boundary im2col only; everything after stays channel-last in VMEM.
    patches, _, _ = _im2col(images)
    k = patches.shape[1]
    patches = jnp.pad(patches.astype(jnp.float32), ((0, 0), (0, (-k) % LANE)))

    operands = [patches, _flat_weight(params[0][0], params[0][2])]
    for l in range(1, num_layers):
        (ih, iw), (oh, ow) = sizes[l], sizes[l + 1]
        operands.append(_make_selection(n, ih, iw, oh, ow))
        operands.append(_tap_weights(params[l][0], params[l][2]))

    shifts = np.zeros((8 * ((num_layers + 7) // 8), LANE), np.float32)
    for i, p in enumerate(params):
        sh = np.asarray(p[3])
        shifts[i, :sh.shape[0]] = sh
    operands.append(jnp.asarray(shifts))

    vmem = pl.BlockSpec(memory_space=pltpu.MemorySpace.VMEM)
    outs = pl.pallas_call(
        _make_kernel(tuple(ms)),
        out_shape=tuple(jax.ShapeDtypeStruct((m, LANE), jnp.float32) for m in ms),
        in_specs=[vmem] * len(operands),
        out_specs=tuple(vmem for _ in ms),
        # TODO(synk): at realistic wav2mov sizes add an M-row grid (marked
        # "parallel" for v7x megacore), bf16 MXU inputs, and a VMEM budget via
        # pltpu.CompilerParams; at these toy shapes everything (<3 MiB) fits
        # VMEM in one shot so a grid would only add per-step overhead.
    )(*operands)

    acts = [_unpack(o, n, oh, ow, c)
            for o, (oh, ow), c in zip(outs, sizes[1:], couts)]
    return acts[-1], acts[:-1]


# ----------------------------------------------------------------------------
# Pure-JAX reference (conv + folded affine + act) for the correctness check
# ----------------------------------------------------------------------------
def _reference_block(x, weight, bias, scale, shift, act):
    y = lax.conv_general_dilated(
        x, weight, window_strides=(STRIDE, STRIDE),
        padding=((PAD, PAD), (PAD, PAD)),
        dimension_numbers=("NCHW", "OIHW", "NCHW"))
    y = y * scale.reshape(1, -1, 1, 1) + shift.reshape(1, -1, 1, 1)
    return jnp.maximum(y, 0.0) if act == "relu" else jnp.tanh(y)


if __name__ == "__main__":
    key = jax.random.PRNGKey(0)
    key, kimg = jax.random.split(key)

    # hparams: in_channels=3, chs=[4, 8]  => channel ladder [3, 4, 8, 1]
    in_channels, chs = 3, [4, 8]
    N, H, W = 2, 16, 16
    images = jax.random.normal(kimg, (N, in_channels, H, W), jnp.float32)

    params = init_id_encoder_params(key, in_channels, chs)

    encoded, intermediates = id_encoder_forward(images, params)
    encoded = jax.block_until_ready(encoded)
    intermediates = [jax.block_until_ready(t) for t in intermediates]

    # Shape checks: 16 -> 8 -> 4 -> 2 spatial; channels 4, 8, then 1.
    assert intermediates[0].shape == (N, 4, 8, 8)
    assert intermediates[1].shape == (N, 8, 4, 4)
    assert encoded.shape == (N, 1, 2, 2)

    # Numerical check against a pure-JAX conv reference.
    x_ref = images
    refs = []
    for (w, b, scale, shift, act) in params:
        x_ref = _reference_block(x_ref, w, b, scale, shift, act)
        refs.append(x_ref)
    for got, ref in zip(intermediates + [encoded], refs):
        assert jnp.allclose(got, ref, atol=1e-4, rtol=1e-4), "mismatch vs reference"

    print("KERNEL_OK")
</pallas_src>

<mosaic_0001>
module attributes {stable_mosaic.version = 11 : i64} {
  func.func @kernel(%arg0: memref<128x128xf32, #tpu.memory_space<vmem>>, %arg1: memref<128x128xf32, #tpu.memory_space<vmem>>, %arg2: memref<512x128xf32, #tpu.memory_space<vmem>>, %arg3: memref<16x128x128xf32, #tpu.memory_space<vmem>>, %arg4: memref<128x32xf32, #tpu.memory_space<vmem>>, %arg5: memref<16x128x128xf32, #tpu.memory_space<vmem>>, %arg6: memref<8x128xf32, #tpu.memory_space<vmem>>, %arg7: memref<128x128xf32, #tpu.memory_space<vmem>>, %arg8: memref<32x128xf32, #tpu.memory_space<vmem>>, %arg9: memref<8x128xf32, #tpu.memory_space<vmem>>) attributes {dimension_semantics = [], scalar_prefetch = 0 : i64, scratch_operands = 0 : i64, tpu.core_type = #tpu.core_type<tc>} {
    %c0 = arith.constant 0 : index
    %c0_0 = arith.constant 0 : index
    %0 = vector.load %arg0[%c0, %c0_0] : memref<128x128xf32, #tpu.memory_space<vmem>>, vector<128x128xf32>
    %c0_1 = arith.constant 0 : index
    %c0_2 = arith.constant 0 : index
    %1 = vector.load %arg1[%c0_1, %c0_2] : memref<128x128xf32, #tpu.memory_space<vmem>>, vector<128x128xf32>
    %cst = arith.constant dense<0.000000e+00> : vector<128x128xf32>
    %2 = tpu.matmul %0, %1, %cst {dimension_numbers = #tpu.dot_dimension_numbers<[1], [0], [0], [1], [0, 0, 1, 1], [], []>} : vector<128x128xf32>, vector<128x128xf32>, vector<128x128xf32> -> vector<128x128xf32>
    %c0_3 = arith.constant 0 : index
    %c0_4 = arith.constant 0 : index
    %3 = vector.load %arg6[%c0_3, %c0_4] : memref<8x128xf32, #tpu.memory_space<vmem>>, vector<1x128xf32>
    %4 = vector.broadcast %3 : vector<1x128xf32> to vector<128x128xf32>
    %5 = arith.addf %2, %4 : vector<128x128xf32>
    %cst_5 = arith.constant 0.000000e+00 : f32
    %6 = vector.broadcast %cst_5 : f32 to vector<128x128xf32>
    %7 = arith.maximumf %5, %6 : vector<128x128xf32>
    %c0_6 = arith.constant 0 : index
    %c0_7 = arith.constant 0 : index
    %8 = vector.load %arg7[%c0_6, %c0_7] : memref<128x128xf32, #tpu.memory_space<vmem>>, vector<128x128xf32>
    tpu.vector_store %arg7[%c0_6, %c0_7], %7 {strides = array<i32>} : memref<128x128xf32, #tpu.memory_space<vmem>>, vector<128x128xf32>,
    %c0_8 = arith.constant 0 : index
    %c0_9 = arith.constant 0 : index
    %9 = vector.load %arg2[%c0_8, %c0_9] : memref<512x128xf32, #tpu.memory_space<vmem>>, vector<512x128xf32>
    %cst_10 = arith.constant dense<0.000000e+00> : vector<512x128xf32>
    %10 = tpu.matmul %9, %7, %cst_10 {dimension_numbers = #tpu.dot_dimension_numbers<[1], [0], [0], [1], [0, 0, 1, 1], [], []>} : vector<512x128xf32>, vector<128x128xf32>, vector<512x128xf32> -> vector<512x128xf32>
    %cst_11 = arith.constant 0.000000e+00 : f32
    %11 = vector.broadcast %cst_11 : f32 to vector<32x128xf32>
    %12 = vector.extract_strided_slice %10 {offsets = [0, 0], sizes = [32, 128], strides = [1, 1]} : vector<512x128xf32> to vector<32x128xf32>
    %c0_12 = arith.constant 0 : index
    %c0_13 = arith.constant 0 : index
    %c0_14 = arith.constant 0 : index
    %13 = vector.load %arg3[%c0_12, %c0_13, %c0_14] : memref<16x128x128xf32, #tpu.memory_space<vmem>>, vector<1x128x128xf32>
    %14 = vector.shape_cast %13 : vector<1x128x128xf32> to vector<128x128xf32>
    %cst_15 = arith.constant dense<0.000000e+00> : vector<32x128xf32>
    %15 = tpu.matmul %12, %14, %cst_15 {dimension_numbers = #tpu.dot_dimension_numbers<[1], [0], [0], [1], [0, 0, 1, 1], [], []>} : vector<32x128xf32>, vector<128x128xf32>, vector<32x128xf32> -> vector<32x128xf32>
    %16 = arith.addf %11, %15 : vector<32x128xf32>
    %17 = vector.extract_strided_slice %10 {offsets = [32, 0], sizes = [32, 128], strides = [1, 1]} : vector<512x128xf32> to vector<32x128xf32>
    %c1 = arith.constant 1 : index
    %c0_16 = arith.constant 0 : index
    %c0_17 = arith.constant 0 : index
    %18 = vector.load %arg3[%c1, %c0_16, %c0_17] : memref<16x128x128xf32, #tpu.memory_space<vmem>>, vector<1x128x128xf32>
    %19 = vector.shape_cast %18 : vector<1x128x128xf32> to vector<128x128xf32>
    %cst_18 = arith.constant dense<0.000000e+00> : vector<32x128xf32>
    %20 = tpu.matmul %17, %19, %cst_18 {dimension_numbers = #tpu.dot_dimension_numbers<[1], [0], [0], [1], [0, 0, 1, 1], [], []>} : vector<32x128xf32>, vector<128x128xf32>, vector<32x128xf32> -> vector<32x128xf32>
    %21 = arith.addf %16, %20 : vector<32x128xf32>
    %22 = vector.extract_strided_slice %10 {offsets = [64, 0], sizes = [32, 128], strides = [1, 1]} : vector<512x128xf32> to vector<32x128xf32>
    %c2 = arith.constant 2 : index
    %c0_19 = arith.constant 0 : index
    %c0_20 = arith.constant 0 : index
    %23 = vector.load %arg3[%c2, %c0_19, %c0_20] : memref<16x128x128xf32, #tpu.memory_space<vmem>>, vector<1x128x128xf32>
    %24 = vector.shape_cast %23 : vector<1x128x128xf32> to vector<128x128xf32>
    %cst_21 = arith.constant dense<0.000000e+00> : vector<32x128xf32>
    %25 = tpu.matmul %22, %24, %cst_21 {dimension_numbers = #tpu.dot_dimension_numbers<[1], [0], [0], [1], [0, 0, 1, 1], [], []>} : vector<32x128xf32>, vector<128x128xf32>, vector<32x128xf32> -> vector<32x128xf32>
    %26 = arith.addf %21, %25 : vector<32x128xf32>
    %27 = vector.extract_strided_slice %10 {offsets = [96, 0], sizes = [32, 128], strides = [1, 1]} : vector<512x128xf32> to vector<32x128xf32>
    %c3 = arith.constant 3 : index
    %c0_22 = arith.constant 0 : index
    %c0_23 = arith.constant 0 : index
    %28 = vector.load %arg3[%c3, %c0_22, %c0_23] : memref<16x128x128xf32, #tpu.memory_space<vmem>>, vector<1x128x128xf32>
    %29 = vector.shape_cast %28 : vector<1x128x128xf32> to vector<128x128xf32>
    %cst_24 = arith.constant dense<0.000000e+00> : vector<32x128xf32>
    %30 = tpu.matmul %27, %29, %cst_24 {dimension_numbers = #tpu.dot_dimension_numbers<[1], [0], [0], [1], [0, 0, 1, 1], [], []>} : vector<32x128xf32>, vector<128x128xf32>, vector<32x128xf32> -> vector<32x128xf32>
    %31 = arith.addf %26, %30 : vector<32x128xf32>
    %32 = vector.extract_strided_slice %10 {offsets = [128, 0], sizes = [32, 128], strides = [1, 1]} : vector<512x128xf32> to vector<32x128xf32>
    %c4 = arith.constant 4 : index
    %c0_25 = arith.constant 0 : index
    %c0_26 = arith.constant 0 : index
    %33 = vector.load %arg3[%c4, %c0_25, %c0_26] : memref<16x128x128xf32, #tpu.memory_space<vmem>>, vector<1x128x128xf32>
    %34 = vector.shape_cast %33 : vector<1x128x128xf32> to vector<128x128xf32>
    %cst_27 = arith.constant dense<0.000000e+00> : vector<32x128xf32>
    %35 = tpu.matmul %32, %34, %cst_27 {dimension_numbers = #tpu.dot_dimension_numbers<[1], [0], [0], [1], [0, 0, 1, 1], [], []>} : vector<32x128xf32>, vector<128x128xf32>, vector<32x128xf32> -> vector<32x128xf32>
    %36 = arith.addf %31, %35 : vector<32x128xf32>
    %37 = vector.extract_strided_slice %10 {offsets = [160, 0], sizes = [32, 128], strides = [1, 1]} : vector<512x128xf32> to vector<32x128xf32>
    %c5 = arith.constant 5 : index
    %c0_28 = arith.constant 0 : index
    %c0_29 = arith.constant 0 : index
    %38 = vector.load %arg3[%c5, %c0_28, %c0_29] : memref<16x128x128xf32, #tpu.memory_space<vmem>>, vector<1x128x128xf32>
    %39 = vector.shape_cast %38 : vector<1x128x128xf32> to vector<128x128xf32>
    %cst_30 = arith.constant dense<0.000000e+00> : vector<32x128xf32>
    %40 = tpu.matmul %37, %39, %cst_30 {dimension_numbers = #tpu.dot_dimension_numbers<[1], [0], [0], [1], [0, 0, 1, 1], [], []>} : vector<32x128xf32>, vector<128x128xf32>, vector<32x128xf32> -> vector<32x128xf32>
    %41 = arith.addf %36, %40 : vector<32x128xf32>
    %42 = vector.extract_strided_slice %10 {offsets = [192, 0], sizes = [32, 128], strides = [1, 1]} : vector<512x128xf32> to vector<32x128xf32>
    %c6 = arith.constant 6 : index
    %c0_31 = arith.constant 0 : index
    %c0_32 = arith.constant 0 : index
    %43 = vector.load %arg3[%c6, %c0_31, %c0_32] : memref<16x128x128xf32, #tpu.memory_space<vmem>>, vector<1x128x128xf32>
    %44 = vector.shape_cast %43 : vector<1x128x128xf32> to vector<128x128xf32>
    %cst_33 = arith.constant dense<0.000000e+00> : vector<32x128xf32>
    %45 = tpu.matmul %42, %44, %cst_33 {dimension_numbers = #tpu.dot_dimension_numbers<[1], [0], [0], [1], [0, 0, 1, 1], [], []>} : vector<32x128xf32>, vector<128x128xf32>, vector<32x128xf32> -> vector<32x128xf32>
    %46 = arith.addf %41, %45 : vector<32x128xf32>
    %47 = vector.extract_strided_slice %10 {offsets = [224, 0], sizes = [32, 128], strides = [1, 1]} : vector<512x128xf32> to vector<32x128xf32>
    %c7 = arith.constant 7 : index
    %c0_34 = arith.constant 0 : index
    %c0_35 = arith.constant 0 : index
    %48 = vector.load %arg3[%c7, %c0_34, %c0_35] : memref<16x128x128xf32, #tpu.memory_space<vmem>>, vector<1x128x128xf32>
    %49 = vector.shape_cast %48 : vector<1x128x128xf32> to vector<128x128xf32>
    %cst_36 = arith.constant dense<0.000000e+00> : vector<32x128xf32>
    %50 = tpu.matmul %47, %49, %cst_36 {dimension_numbers = #tpu.dot_dimension_numbers<[1], [0], [0], [1], [0, 0, 1, 1], [], []>} : vector<32x128xf32>, vector<128x128xf32>, vector<32x128xf32> -> vector<32x128xf32>
    %51 = arith.addf %46, %50 : vector<32x128xf32>
    %52 = vector.extract_strided_slice %10 {offsets = [256, 0], sizes = [32, 128], strides = [1, 1]} : vector<512x128xf32> to vector<32x128xf32>
    %c8 = arith.constant 8 : index
    %c0_37 = arith.constant 0 : index
    %c0_38 = arith.constant 0 : index
    %53 = vector.load %arg3[%c8, %c0_37, %c0_38] : memref<16x128x128xf32, #tpu.memory_space<vmem>>, vector<1x128x128xf32>
    %54 = vector.shape_cast %53 : vector<1x128x128xf32> to vector<128x128xf32>
    %cst_39 = arith.constant dense<0.000000e+00> : vector<32x128xf32>
    %55 = tpu.matmul %52, %54, %cst_39 {dimension_numbers = #tpu.dot_dimension_numbers<[1], [0], [0], [1], [0, 0, 1, 1], [], []>} : vector<32x128xf32>, vector<128x128xf32>, vector<32x128xf32> -> vector<32x128xf32>
    %56 = arith.addf %51, %55 : vector<32x128xf32>
    %57 = vector.extract_strided_slice %10 {offsets = [288, 0], sizes = [32, 128], strides = [1, 1]} : vector<512x128xf32> to vector<32x128xf32>
    %c9 = arith.constant 9 : index
    %c0_40 = arith.constant 0 : index
    %c0_41 = arith.constant 0 : index
    %58 = vector.load %arg3[%c9, %c0_40, %c0_41] : memref<16x128x128xf32, #tpu.memory_space<vmem>>, vector<1x128x128xf32>
    %59 = vector.shape_cast %58 : vector<1x128x128xf32> to vector<128x128xf32>
    %cst_42 = arith.constant dense<0.000000e+00> : vector<32x128xf32>
    %60 = tpu.matmul %57, %59, %cst_42 {dimension_numbers = #tpu.dot_dimension_numbers<[1], [0], [0], [1], [0, 0, 1, 1], [], []>} : vector<32x128xf32>, vector<128x128xf32>, vector<32x128xf32> -> vector<32x128xf32>
    %61 = arith.addf %56, %60 : vector<32x128xf32>
    %62 = vector.extract_strided_slice %10 {offsets = [320, 0], sizes = [32, 128], strides = [1, 1]} : vector<512x128xf32> to vector<32x128xf32>
    %c10 = arith.constant 10 : index
    %c0_43 = arith.constant 0 : index
    %c0_44 = arith.constant 0 : index
    %63 = vector.load %arg3[%c10, %c0_43, %c0_44] : memref<16x128x128xf32, #tpu.memory_space<vmem>>, vector<1x128x128xf32>
    %64 = vector.shape_cast %63 : vector<1x128x128xf32> to vector<128x128xf32>
    %cst_45 = arith.constant dense<0.000000e+00> : vector<32x128xf32>
    %65 = tpu.matmul %62, %64, %cst_45 {dimension_numbers = #tpu.dot_dimension_numbers<[1], [0], [0], [1], [0, 0, 1, 1], [], []>} : vector<32x128xf32>, vector<128x128xf32>, vector<32x128xf32> -> vector<32x128xf32>
    %66 = arith.addf %61, %65 : vector<32x128xf32>
    %67 = vector.extract_strided_slice %10 {offsets = [352, 0], sizes = [32, 128], strides = [1, 1]} : vector<512x128xf32> to vector<32x128xf32>
    %c11 = arith.constant 11 : index
    %c0_46 = arith.constant 0 : index
    %c0_47 = arith.constant 0 : index
    %68 = vector.load %arg3[%c11, %c0_46, %c0_47] : memref<16x128x128xf32, #tpu.memory_space<vmem>>, vector<1x128x128xf32>
    %69 = vector.shape_cast %68 : vector<1x128x128xf32> to vector<128x128xf32>
    %cst_48 = arith.constant dense<0.000000e+00> : vector<32x128xf32>
    %70 = tpu.matmul %67, %69, %cst_48 {dimension_numbers = #tpu.dot_dimension_numbers<[1], [0], [0], [1], [0, 0, 1, 1], [], []>} : vector<32x128xf32>, vector<128x128xf32>, vector<32x128xf32> -> vector<32x128xf32>
    %71 = arith.addf %66, %70 : vector<32x128xf32>
    %72 = vector.extract_strided_slice %10 {offsets = [384, 0], sizes = [32, 128], strides = [1, 1]} : vector<512x128xf32> to vector<32x128xf32>
    %c12 = arith.constant 12 : index
    %c0_49 = arith.constant 0 : index
    %c0_50 = arith.constant 0 : index
    %73 = vector.load %arg3[%c12, %c0_49, %c0_50] : memref<16x128x128xf32, #tpu.memory_space<vmem>>, vector<1x128x128xf32>
    %74 = vector.shape_cast %73 : vector<1x128x128xf32> to vector<128x128xf32>
    %cst_51 = arith.constant dense<0.000000e+00> : vector<32x128xf32>
    %75 = tpu.matmul %72, %74, %cst_51 {dimension_numbers = #tpu.dot_dimension_numbers<[1], [0], [0], [1], [0, 0, 1, 1], [], []>} : vector<32x128xf32>, vector<128x128xf32>, vector<32x128xf32> -> vector<32x128xf32>
    %76 = arith.addf %71, %75 : vector<32x128xf32>
    %77 = vector.extract_strided_slice %10 {offsets = [416, 0], sizes = [32, 128], strides = [1, 1]} : vector<512x128xf32> to vector<32x128xf32>
    %c13 = arith.constant 13 : index
    %c0_52 = arith.constant 0 : index
    %c0_53 = arith.constant 0 : index
    %78 = vector.load %arg3[%c13, %c0_52, %c0_53] : memref<16x128x128xf32, #tpu.memory_space<vmem>>, vector<1x128x128xf32>
    %79 = vector.shape_cast %78 : vector<1x128x128xf32> to vector<128x128xf32>
    %cst_54 = arith.constant dense<0.000000e+00> : vector<32x128xf32>
    %80 = tpu.matmul %77, %79, %cst_54 {dimension_numbers = #tpu.dot_dimension_numbers<[1], [0], [0], [1], [0, 0, 1, 1], [], []>} : vector<32x128xf32>, vector<128x128xf32>, vector<32x128xf32> -> vector<32x128xf32>
    %81 = arith.addf %76, %80 : vector<32x128xf32>
    %82 = vector.extract_strided_slice %10 {offsets = [448, 0], sizes = [32, 128], strides = [1, 1]} : vector<512x128xf32> to vector<32x128xf32>
    %c14 = arith.constant 14 : index
    %c0_55 = arith.constant 0 : index
    %c0_56 = arith.constant 0 : index
    %83 = vector.load %arg3[%c14, %c0_55, %c0_56] : memref<16x128x128xf32, #tpu.memory_space<vmem>>, vector<1x128x128xf32>
    %84 = vector.shape_cast %83 : vector<1x128x128xf32> to vector<128x128xf32>
    %cst_57 = arith.constant dense<0.000000e+00> : vector<32x128xf32>
    %85 = tpu.matmul %82, %84, %cst_57 {dimension_numbers = #tpu.dot_dimension_numbers<[1], [0], [0], [1], [0, 0, 1, 1], [], []>} : vector<32x128xf32>, vector<128x128xf32>, vector<32x128xf32> -> vector<32x128xf32>
    %86 = arith.addf %81, %85 : vector<32x128xf32>
    %87 = vector.extract_strided_slice %10 {offsets = [480, 0], sizes = [32, 128], strides = [1, 1]} : vector<512x128xf32> to vector<32x128xf32>
    %c15 = arith.constant 15 : index
    %c0_58 = arith.constant 0 : index
    %c0_59 = arith.constant 0 : index
    %88 = vector.load %arg3[%c15, %c0_58, %c0_59] : memref<16x128x128xf32, #tpu.memory_space<vmem>>, vector<1x128x128xf32>
    %89 = vector.shape_cast %88 : vector<1x128x128xf32> to vector<128x128xf32>
    %cst_60 = arith.constant dense<0.000000e+00> : vector<32x128xf32>
    %90 = tpu.matmul %87, %89, %cst_60 {dimension_numbers = #tpu.dot_dimension_numbers<[1], [0], [0], [1], [0, 0, 1, 1], [], []>} : vector<32x128xf32>, vector<128x128xf32>, vector<32x128xf32> -> vector<32x128xf32>
    %91 = arith.addf %86, %90 : vector<32x128xf32>
    %c1_61 = arith.constant 1 : index
    %c0_62 = arith.constant 0 : index
    %92 = vector.load %arg6[%c1_61, %c0_62] : memref<8x128xf32, #tpu.memory_space<vmem>>, vector<1x128xf32>
    %93 = vector.broadcast %92 : vector<1x128xf32> to vector<32x128xf32>
    %94 = arith.addf %91, %93 : vector<32x128xf32>
    %cst_63 = arith.constant 0.000000e+00 : f32
    %95 = vector.broadcast %cst_63 : f32 to vector<32x128xf32>
    %96 = arith.maximumf %94, %95 : vector<32x128xf32>
    %c0_64 = arith.constant 0 : index
    %c0_65 = arith.constant 0 : index
    %97 = vector.load %arg8[%c0_64, %c0_65] : memref<32x128xf32, #tpu.memory_space<vmem>>, vector<32x128xf32>
    tpu.vector_store %arg8[%c0_64, %c0_65], %96 {strides = array<i32>} : memref<32x128xf32, #tpu.memory_space<vmem>>, vector<32x128xf32>,
    %c0_66 = arith.constant 0 : index
    %c0_67 = arith.constant 0 : index
    %98 = vector.load %arg4[%c0_66, %c0_67] : memref<128x32xf32, #tpu.memory_space<vmem>>, vector<128x32xf32>
    %cst_68 = arith.constant dense<0.000000e+00> : vector<128x128xf32>
    %99 = tpu.matmul %98, %96, %cst_68 {dimension_numbers = #tpu.dot_dimension_numbers<[1], [0], [0], [1], [0, 0, 1, 1], [], []>} : vector<128x32xf32>, vector<32x128xf32>, vector<128x128xf32> -> vector<128x128xf32>
    %cst_69 = arith.constant 0.000000e+00 : f32
    %100 = vector.broadcast %cst_69 : f32 to vector<8x128xf32>
    %101 = vector.extract_strided_slice %99 {offsets = [0, 0], sizes = [8, 128], strides = [1, 1]} : vector<128x128xf32> to vector<8x128xf32>
    %c0_70 = arith.constant 0 : index
    %c0_71 = arith.constant 0 : index
    %c0_72 = arith.constant 0 : index
    %102 = vector.load %arg5[%c0_70, %c0_71, %c0_72] : memref<16x128x128xf32, #tpu.memory_space<vmem>>, vector<1x128x128xf32>
    %103 = vector.shape_cast %102 : vector<1x128x128xf32> to vector<128x128xf32>
    %cst_73 = arith.constant dense<0.000000e+00> : vector<8x128xf32>
    %104 = tpu.matmul %101, %103, %cst_73 {dimension_numbers = #tpu.dot_dimension_numbers<[1], [0], [0], [1], [0, 0, 1, 1], [], []>} : vector<8x128xf32>, vector<128x128xf32>, vector<8x128xf32> -> vector<8x128xf32>
    %105 = arith.addf %100, %104 : vector<8x128xf32>
    %106 = vector.extract_strided_slice %99 {offsets = [8, 0], sizes = [8, 128], strides = [1, 1]} : vector<128x128xf32> to vector<8x128xf32>
    %c1_74 = arith.constant 1 : index
    %c0_75 = arith.constant 0 : index
    %c0_76 = arith.constant 0 : index
    %107 = vector.load %arg5[%c1_74, %c0_75, %c0_76] : memref<16x128x128xf32, #tpu.memory_space<vmem>>, vector<1x128x128xf32>
    %108 = vector.shape_cast %107 : vector<1x128x128xf32> to vector<128x128xf32>
    %cst_77 = arith.constant dense<0.000000e+00> : vector<8x128xf32>
    %109 = tpu.matmul %106, %108, %cst_77 {dimension_numbers = #tpu.dot_dimension_numbers<[1], [0], [0], [1], [0, 0, 1, 1], [], []>} : vector<8x128xf32>, vector<128x128xf32>, vector<8x128xf32> -> vector<8x128xf32>
    %110 = arith.addf %105, %109 : vector<8x128xf32>
    %111 = vector.extract_strided_slice %99 {offsets = [16, 0], sizes = [8, 128], strides = [1, 1]} : vector<128x128xf32> to vector<8x128xf32>
    %c2_78 = arith.constant 2 : index
    %c0_79 = arith.constant 0 : index
    %c0_80 = arith.constant 0 : index
    %112 = vector.load %arg5[%c2_78, %c0_79, %c0_80] : memref<16x128x128xf32, #tpu.memory_space<vmem>>, vector<1x128x128xf32>
    %113 = vector.shape_cast %112 : vector<1x128x128xf32> to vector<128x128xf32>
    %cst_81 = arith.constant dense<0.000000e+00> : vector<8x128xf32>
    %114 = tpu.matmul %111, %113, %cst_81 {dimension_numbers = #tpu.dot_dimension_numbers<[1], [0], [0], [1], [0, 0, 1, 1], [], []>} : vector<8x128xf32>, vector<128x128xf32>, vector<8x128xf32> -> vector<8x128xf32>
    %115 = arith.addf %110, %114 : vector<8x128xf32>
    %116 = vector.extract_strided_slice %99 {offsets = [24, 0], sizes = [8, 128], strides = [1, 1]} : vector<128x128xf32> to vector<8x128xf32>
    %c3_82 = arith.constant 3 : index
    %c0_83 = arith.constant 0 : index
    %c0_84 = arith.constant 0 : index
    %117 = vector.load %arg5[%c3_82, %c0_83, %c0_84] : memref<16x128x128xf32, #tpu.memory_space<vmem>>, vector<1x128x128xf32>
    %118 = vector.shape_cast %117 : vector<1x128x128xf32> to vector<128x128xf32>
    %cst_85 = arith.constant dense<0.000000e+00> : vector<8x128xf32>
    %119 = tpu.matmul %116, %118, %cst_85 {dimension_numbers = #tpu.dot_dimension_numbers<[1], [0], [0], [1], [0, 0, 1, 1], [], []>} : vector<8x128xf32>, vector<128x128xf32>, vector<8x128xf32> -> vector<8x128xf32>
    %120 = arith.addf %115, %119 : vector<8x128xf32>
    %121 = vector.extract_strided_slice %99 {offsets = [32, 0], sizes = [8, 128], strides = [1, 1]} : vector<128x128xf32> to vector<8x128xf32>
    %c4_86 = arith.constant 4 : index
    %c0_87 = arith.constant 0 : index
    %c0_88 = arith.constant 0 : index
    %122 = vector.load %arg5[%c4_86, %c0_87, %c0_88] : memref<16x128x128xf32, #tpu.memory_space<vmem>>, vector<1x128x128xf32>
    %123 = vector.shape_cast %122 : vector<1x128x128xf32> to vector<128x128xf32>
    %cst_89 = arith.constant dense<0.000000e+00> : vector<8x128xf32>
    %124 = tpu.matmul %121, %123, %cst_89 {dimension_numbers = #tpu.dot_dimension_numbers<[1], [0], [0], [1], [0, 0, 1, 1], [], []>} : vector<8x128xf32>, vector<128x128xf32>, vector<8x128xf32> -> vector<8x128xf32>
    %125 = arith.addf %120, %124 : vector<8x128xf32>
    %126 = vector.extract_strided_slice %99 {offsets = [40, 0], sizes = [8, 128], strides = [1, 1]} : vector<128x128xf32> to vector<8x128xf32>
    %c5_90 = arith.constant 5 : index
    %c0_91 = arith.constant 0 : index
    %c0_92 = arith.constant 0 : index
    %127 = vector.load %arg5[%c5_90, %c0_91, %c0_92] : memref<16x128x128xf32, #tpu.memory_space<vmem>>, vector<1x128x128xf32>
    %128 = vector.shape_cast %127 : vector<1x128x128xf32> to vector<128x128xf32>
    %cst_93 = arith.constant dense<0.000000e+00> : vector<8x128xf32>
    %129 = tpu.matmul %126, %128, %cst_93 {dimension_numbers = #tpu.dot_dimension_numbers<[1], [0], [0], [1], [0, 0, 1, 1], [], []>} : vector<8x128xf32>, vector<128x128xf32>, vector<8x128xf32> -> vector<8x128xf32>
    %130 = arith.addf %125, %129 : vector<8x128xf32>
    %131 = vector.extract_strided_slice %99 {offsets = [48, 0], sizes = [8, 128], strides = [1, 1]} : vector<128x128xf32> to vector<8x128xf32>
    %c6_94 = arith.constant 6 : index
    %c0_95 = arith.constant 0 : index
    %c0_96 = arith.constant 0 : index
    %132 = vector.load %arg5[%c6_94, %c0_95, %c0_96] : memref<16x128x128xf32, #tpu.memory_space<vmem>>, vector<1x128x128xf32>
    %133 = vector.shape_cast %132 : vector<1x128x128xf32> to vector<128x128xf32>
    %cst_97 = arith.constant dense<0.000000e+00> : vector<8x128xf32>
    %134 = tpu.matmul %131, %133, %cst_97 {dimension_numbers = #tpu.dot_dimension_numbers<[1], [0], [0], [1], [0, 0, 1, 1], [], []>} : vector<8x128xf32>, vector<128x128xf32>, vector<8x128xf32> -> vector<8x128xf32>
    %135 = arith.addf %130, %134 : vector<8x128xf32>
    %136 = vector.extract_strided_slice %99 {offsets = [56, 0], sizes = [8, 128], strides = [1, 1]} : vector<128x128xf32> to vector<8x128xf32>
    %c7_98 = arith.constant 7 : index
    %c0_99 = arith.constant 0 : index
    %c0_100 = arith.constant 0 : index
    %137 = vector.load %arg5[%c7_98, %c0_99, %c0_100] : memref<16x128x128xf32, #tpu.memory_space<vmem>>, vector<1x128x128xf32>
    %138 = vector.shape_cast %137 : vector<1x128x128xf32> to vector<128x128xf32>
    %cst_101 = arith.constant dense<0.000000e+00> : vector<8x128xf32>
    %139 = tpu.matmul %136, %138, %cst_101 {dimension_numbers = #tpu.dot_dimension_numbers<[1], [0], [0], [1], [0, 0, 1, 1], [], []>} : vector<8x128xf32>, vector<128x128xf32>, vector<8x128xf32> -> vector<8x128xf32>
    %140 = arith.addf %135, %139 : vector<8x128xf32>
    %141 = vector.extract_strided_slice %99 {offsets = [64, 0], sizes = [8, 128], strides = [1, 1]} : vector<128x128xf32> to vector<8x128xf32>
    %c8_102 = arith.constant 8 : index
    %c0_103 = arith.constant 0 : index
    %c0_104 = arith.constant 0 : index
    %142 = vector.load %arg5[%c8_102, %c0_103, %c0_104] : memref<16x128x128xf32, #tpu.memory_space<vmem>>, vector<1x128x128xf32>
    %143 = vector.shape_cast %142 : vector<1x128x128xf32> to vector<128x128xf32>
    %cst_105 = arith.constant dense<0.000000e+00> : vector<8x128xf32>
    %144 = tpu.matmul %141, %143, %cst_105 {dimension_numbers = #tpu.dot_dimension_numbers<[1], [0], [0], [1], [0, 0, 1, 1], [], []>} : vector<8x128xf32>, vector<128x128xf32>, vector<8x128xf32> -> vector<8x128xf32>
    %145 = arith.addf %140, %144 : vector<8x128xf32>
    %146 = vector.extract_strided_slice %99 {offsets = [72, 0], sizes = [8, 128], strides = [1, 1]} : vector<128x128xf32> to vector<8x128xf32>
    %c9_106 = arith.constant 9 : index
    %c0_107 = arith.constant 0 : index
    %c0_108 = arith.constant 0 : index
    %147 = vector.load %arg5[%c9_106, %c0_107, %c0_108] : memref<16x128x128xf32, #tpu.memory_space<vmem>>, vector<1x128x128xf32>
    %148 = vector.shape_cast %147 : vector<1x128x128xf32> to vector<128x128xf32>
    %cst_109 = arith.constant dense<0.000000e+00> : vector<8x128xf32>
    %149 = tpu.matmul %146, %148, %cst_109 {dimension_numbers = #tpu.dot_dimension_numbers<[1], [0], [0], [1], [0, 0, 1, 1], [], []>} : vector<8x128xf32>, vector<128x128xf32>, vector<8x128xf32> -> vector<8x128xf32>
    %150 = arith.addf %145, %149 : vector<8x128xf32>
    %151 = vector.extract_strided_slice %99 {offsets = [80, 0], sizes = [8, 128], strides = [1, 1]} : vector<128x128xf32> to vector<8x128xf32>
    %c10_110 = arith.constant 10 : index
    %c0_111 = arith.constant 0 : index
    %c0_112 = arith.constant 0 : index
    %152 = vector.load %arg5[%c10_110, %c0_111, %c0_112] : memref<16x128x128xf32, #tpu.memory_space<vmem>>, vector<1x128x128xf32>
    %153 = vector.shape_cast %152 : vector<1x128x128xf32> to vector<128x128xf32>
    %cst_113 = arith.constant dense<0.000000e+00> : vector<8x128xf32>
    %154 = tpu.matmul %151, %153, %cst_113 {dimension_numbers = #tpu.dot_dimension_numbers<[1], [0], [0], [1], [0, 0, 1, 1], [], []>} : vector<8x128xf32>, vector<128x128xf32>, vector<8x128xf32> -> vector<8x128xf32>
    %155 = arith.addf %150, %154 : vector<8x128xf32>
    %156 = vector.extract_strided_slice %99 {offsets = [88, 0], sizes = [8, 128], strides = [1, 1]} : vector<128x128xf32> to vector<8x128xf32>
    %c11_114 = arith.constant 11 : index
    %c0_115 = arith.constant 0 : index
    %c0_116 = arith.constant 0 : index
    %157 = vector.load %arg5[%c11_114, %c0_115, %c0_116] : memref<16x128x128xf32, #tpu.memory_space<vmem>>, vector<1x128x128xf32>
    %158 = vector.shape_cast %157 : vector<1x128x128xf32> to vector<128x128xf32>
    %cst_117 = arith.constant dense<0.000000e+00> : vector<8x128xf32>
    %159 = tpu.matmul %156, %158, %cst_117 {dimension_numbers = #tpu.dot_dimension_numbers<[1], [0], [0], [1], [0, 0, 1, 1], [], []>} : vector<8x128xf32>, vector<128x128xf32>, vector<8x128xf32> -> vector<8x128xf32>
    %160 = arith.addf %155, %159 : vector<8x128xf32>
    %161 = vector.extract_strided_slice %99 {offsets = [96, 0], sizes = [8, 128], strides = [1, 1]} : vector<128x128xf32> to vector<8x128xf32>
    %c12_118 = arith.constant 12 : index
    %c0_119 = arith.constant 0 : index
    %c0_120 = arith.constant 0 : index
    %162 = vector.load %arg5[%c12_118, %c0_119, %c0_120] : memref<16x128x128xf32, #tpu.memory_space<vmem>>, vector<1x128x128xf32>
    %163 = vector.shape_cast %162 : vector<1x128x128xf32> to vector<128x128xf32>
    %cst_121 = arith.constant dense<0.000000e+00> : vector<8x128xf32>
    %164 = tpu.matmul %161, %163, %cst_121 {dimension_numbers = #tpu.dot_dimension_numbers<[1], [0], [0], [1], [0, 0, 1, 1], [], []>} : vector<8x128xf32>, vector<128x128xf32>, vector<8x128xf32> -> vector<8x128xf32>
    %165 = arith.addf %160, %164 : vector<8x128xf32>
    %166 = vector.extract_strided_slice %99 {offsets = [104, 0], sizes = [8, 128], strides = [1, 1]} : vector<128x128xf32> to vector<8x128xf32>
    %c13_122 = arith.constant 13 : index
    %c0_123 = arith.constant 0 : index
    %c0_124 = arith.constant 0 : index
    %167 = vector.load %arg5[%c13_122, %c0_123, %c0_124] : memref<16x128x128xf32, #tpu.memory_space<vmem>>, vector<1x128x128xf32>
    %168 = vector.shape_cast %167 : vector<1x128x128xf32> to vector<128x128xf32>
    %cst_125 = arith.constant dense<0.000000e+00> : vector<8x128xf32>
    %169 = tpu.matmul %166, %168, %cst_125 {dimension_numbers = #tpu.dot_dimension_numbers<[1], [0], [0], [1], [0, 0, 1, 1], [], []>} : vector<8x128xf32>, vector<128x128xf32>, vector<8x128xf32> -> vector<8x128xf32>
    %170 = arith.addf %165, %169 : vector<8x128xf32>
    %171 = vector.extract_strided_slice %99 {offsets = [112, 0], sizes = [8, 128], strides = [1, 1]} : vector<128x128xf32> to vector<8x128xf32>
    %c14_126 = arith.constant 14 : index
    %c0_127 = arith.constant 0 : index
    %c0_128 = arith.constant 0 : index
    %172 = vector.load %arg5[%c14_126, %c0_127, %c0_128] : memref<16x128x128xf32, #tpu.memory_space<vmem>>, vector<1x128x128xf32>
    %173 = vector.shape_cast %172 : vector<1x128x128xf32> to vector<128x128xf32>
    %cst_129 = arith.constant dense<0.000000e+00> : vector<8x128xf32>
    %174 = tpu.matmul %171, %173, %cst_129 {dimension_numbers = #tpu.dot_dimension_numbers<[1], [0], [0], [1], [0, 0, 1, 1], [], []>} : vector<8x128xf32>, vector<128x128xf32>, vector<8x128xf32> -> vector<8x128xf32>
    %175 = arith.addf %170, %174 : vector<8x128xf32>
    %176 = vector.extract_strided_slice %99 {offsets = [120, 0], sizes = [8, 128], strides = [1, 1]} : vector<128x128xf32> to vector<8x128xf32>
    %c15_130 = arith.constant 15 : index
    %c0_131 = arith.constant 0 : index
    %c0_132 = arith.constant 0 : index
    %177 = vector.load %arg5[%c15_130, %c0_131, %c0_132] : memref<16x128x128xf32, #tpu.memory_space<vmem>>, vector<1x128x128xf32>
    %178 = vector.shape_cast %177 : vector<1x128x128xf32> to vector<128x128xf32>
    %cst_133 = arith.constant dense<0.000000e+00> : vector<8x128xf32>
    %179 = tpu.matmul %176, %178, %cst_133 {dimension_numbers = #tpu.dot_dimension_numbers<[1], [0], [0], [1], [0, 0, 1, 1], [], []>} : vector<8x128xf32>, vector<128x128xf32>, vector<8x128xf32> -> vector<8x128xf32>
    %180 = arith.addf %175, %179 : vector<8x128xf32>
    %c2_134 = arith.constant 2 : index
    %c0_135 = arith.constant 0 : index
    %181 = vector.load %arg6[%c2_134, %c0_135] : memref<8x128xf32, #tpu.memory_space<vmem>>, vector<1x128xf32>
    %182 = vector.broadcast %181 : vector<1x128xf32> to vector<8x128xf32>
    %183 = arith.addf %180, %182 : vector<8x128xf32>
    %184 = math.tanh %183 : vector<8x128xf32>
    %c0_136 = arith.constant 0 : index
    %c0_137 = arith.constant 0 : index
    %185 = vector.load %arg9[%c0_136, %c0_137] : memref<8x128xf32, #tpu.memory_space<vmem>>, vector<8x128xf32>
    tpu.vector_store %arg9[%c0_136, %c0_137], %184 {strides = array<i32>} : memref<8x128xf32, #tpu.memory_space<vmem>>, vector<8x128xf32>,
    return
  }
}

</mosaic_0001>

<bundles_post_ra>
// kernel: tpu_custom_call.1
= control target key start
LH: loop header
LB: loop body
LE: loop exit
PB: predicated region body
PF: predicated region fallthrough
CT: control target
= control target key end

     0   :  { %15 = vsyncpa [#allocation3], 0  ;;  %s8153_s0 = inlined_call_operand.vmem [shape: f32[128,128], index: 0, kind: input, shape index: {}]   ;;  %s8154_s1 = inlined_call_operand.hbm [shape: f32[128,128], index: 1, kind: input, shape index: {}]   ;;  %s8155_s2 = inlined_call_operand.hbm [shape: f32[512,128], index: 2, kind: input, shape index: {}]   ;;  %s8156_s3 = inlined_call_operand.hbm [shape: f32[16,128,128], index: 3, kind: input, shape index: {}]   ;;  %s8157_s4 = inlined_call_operand.vmem [shape: f32[128,32], index: 4, kind: input, shape index: {}]   ;;  %s8158_s5 = inlined_call_operand.hbm [shape: f32[16,128,128], index: 5, kind: input, shape index: {}]   ;;  %s8159_s6 = inlined_call_operand.vmem [shape: f32[8,128], index: 6, kind: input, shape index: {}]   ;;  %s8160_s7 = inlined_call_operand.hbm [shape: f32[128,128], index: 7, kind: output, shape index: {0}]   ;;  %s8161_s8 = inlined_call_operand.hbm [shape: f32[32,128], index: 8, kind: output, shape index: {1}]   ;;  %s8162_s9 = inlined_call_operand.hbm [shape: f32[8,128], index: 9, kind: output, shape index: {2}]  }
   0x1   :  { %16 = vsyncpa [#allocation6], 0 }
   0x2   :  { %17 = vsyncpa [#allocation9], 0 }
   0x3   :  { %18 = vsyncpa [#allocation4], 0 }
   0x4   :  { %19 = vsyncpa [#allocation12], 0  ;;  %s7457_s30 = smov [#allocation5]   ;;  %s7458_s11 = smov [#allocation2]  }
   0x5   :  { %s39_s10 = sshll.u32 %s7457_s30, 4  ;;  %s27_s12 = sshll.u32 %s7458_s11, 4  ;;  %s40_s10 = int_to_ptr.vmem [resolvable:$true] %s39_s10  ;;  %s7519_s12 = int_to_ptr.vmem [resolvable:$true] %s27_s12 }
   0x6   :  { %s7293_s15 = scalar_lea.hbm %s8155_s2, 8192 }
   0x7   :  { %p7294_p0 = scmp.ne.s32.totalorder %s8155_s2, %s7293_s15  ;;  %p7297_p1 = scmp.lt.u32.totalorder %s7293_s15, %s8155_s2 }
   0x9   :  { %p7299_p2 = pnand %p7297_p1, %p7294_p0 }
   0xb   :  { %7302 = shalt.err (!%p7299_p2)
}
   0xc   :  { %s7303_s20 = scalar_lea.vmem %s40_s10, 8192  ;;  %p7308_p4 = scmp.lt.s32.totalorder %s40_s10, %s40_s10 }
   0xd   :  { %p7304_p3 = scmp.ne.s32.totalorder %s40_s10, %s7303_s20  ;;  %p7309_p5 = scmp.lt.s32.totalorder %s7303_s20, %s7303_s20 }
   0xf   :  { %p7310_p6 = por %p7309_p5, %p7308_p4 }
  0x11   :  { %p7311_p7 = pnand %p7310_p6, %p7304_p3 }
  0x13   :  { %7314 = shalt.err (!%p7311_p7)
}
  0x14   :  { %s7459_s21 = smov 128   ;;  %s7460_s22 = smov 8  }
  0x15   :  { %45 = dma.hbm_to_vmem [thread:$0]  %s8155_s2, 8192, %s40_s10, [#allocation6], %s7459_s21, %s7459_s21, %s7460_s22  }
  0x16   :  { %s7315_s27 = scalar_lea.hbm %s8154_s1, 2048 }
  0x17   :  { %p7316_p8 = scmp.ne.s32.totalorder %s8154_s1, %s7315_s27  ;;  %p7319_p9 = scmp.lt.u32.totalorder %s7315_s27, %s8154_s1 }
  0x19   :  { %p7321_p10 = pnand %p7319_p9, %p7316_p8 }
  0x1b   :  { %7324 = shalt.err (!%p7321_p10)
}
  0x1c   :  { %s7325_s13 = scalar_lea.vmem %s7519_s12, 2048  ;;  %p7330_p12 = scmp.lt.s32.totalorder %s7519_s12, %s7519_s12 }
  0x1d   :  { %p7326_p11 = scmp.ne.s32.totalorder %s7519_s12, %s7325_s13  ;;  %p7331_p13 = scmp.lt.s32.totalorder %s7325_s13, %s7325_s13 }
  0x1f   :  { %p7332_p0 = por %p7331_p13, %p7330_p12 }
  0x21   :  { %p7333_p1 = pnand %p7332_p0, %p7326_p11 }
  0x23   :  { %7336 = shalt.err (!%p7333_p1)
}
  0x24   :  { %33 = dma.hbm_to_vmem [thread:$0]  %s8154_s1, 2048, %s7519_s12, [#allocation3], %s7459_s21, %s7459_s21, %s7460_s22  }
  0x25   :  { %s7461_s14 = smov [#allocation7]   ;;  %s7462_s16 = smov [#allocation8]  }
  0x26   :  { %s51_s15 = sshll.u32 %s7461_s14, 4  ;;  %s65_s17 = sshll.u32 %s7462_s16, 4  ;;  %s52_s15 = int_to_ptr.vmem [resolvable:$true] %s51_s15  ;;  %s7556_s17 = int_to_ptr.vmem [resolvable:$true] %s65_s17 }
  0x27   :  { %s7337_s20 = scalar_lea.hbm %s8156_s3, 32768 }
  0x28   :  { %p7338_p2 = scmp.ne.s32.totalorder %s8156_s3, %s7337_s20  ;;  %p7341_p3 = scmp.lt.u32.totalorder %s7337_s20, %s8156_s3 }
  0x2a   :  { %p7343_p4 = pnand %p7341_p3, %p7338_p2 }
  0x2c   :  { %7346 = shalt.err (!%p7343_p4)
}
  0x2d   :  { %s7347_s1 = scalar_lea.vmem %s52_s15, 32768  ;;  %p7352_p6 = scmp.lt.s32.totalorder %s52_s15, %s52_s15 }
  0x2e   :  { %p7348_p5 = scmp.ne.s32.totalorder %s52_s15, %s7347_s1  ;;  %p7353_p7 = scmp.lt.s32.totalorder %s7347_s1, %s7347_s1 }
  0x30   :  { %p7354_p8 = por %p7353_p7, %p7352_p6 }
  0x32   :  { %p7355_p9 = pnand %p7354_p8, %p7348_p5 }
  0x34   :  { %7358 = shalt.err (!%p7355_p9)
}
  0x35   :  { %57 = dma.hbm_to_vmem [thread:$0]  %s8156_s3, 32768, %s52_s15, [#allocation6], %s7459_s21, %s7459_s21, %s7460_s22  }
  0x36   :  { %s7359_s30 = scalar_lea.hbm %s8158_s5, 32768 }
  0x37   :  { %p7360_p10 = scmp.ne.s32.totalorder %s8158_s5, %s7359_s30  ;;  %p7363_p11 = scmp.lt.u32.totalorder %s7359_s30, %s8158_s5 }
  0x39   :  { %p7365_p12 = pnand %p7363_p11, %p7360_p10 }
  0x3b   :  { %7368 = shalt.err (!%p7365_p12)
}
  0x3c   :  { %s7369_s14 = scalar_lea.vmem %s7556_s17, 32768  ;;  %p7374_p0 = scmp.lt.s32.totalorder %s7556_s17, %s7556_s17 }
  0x3d   :  { %p7370_p13 = scmp.ne.s32.totalorder %s7556_s17, %s7369_s14  ;;  %p7375_p1 = scmp.lt.s32.totalorder %s7369_s14, %s7369_s14 }
  0x3f   :  { %p7376_p2 = por %p7375_p1, %p7374_p0 }
  0x41   :  { %p7377_p3 = pnand %p7376_p2, %p7370_p13 }
  0x43   :  { %7380 = shalt.err (!%p7377_p3)
}
  0x44   :  { %71 = dma.hbm_to_vmem [thread:$0]  %s8158_s5, 32768, %s7556_s17, [#allocation9], %s7459_s21, %s7459_s21, %s7460_s22  }
  0x45   :  { %7447 = dma.done.wait [#allocation3], 2048  }
  0x46   :  { %7448 = vsyncadd [#allocation3], 4294965248 }
  0x47   :  { %7449 = dma.done.wait [#allocation6], 40960  }
  0x48   :  { %7450 = vsyncadd [#allocation6], 4294926336 }
  0x49   :  { %7451 = dma.done.wait [#allocation9], 32768  }
  0x4a   :  { %7452 = vsyncadd [#allocation9], 4294934528  ;;  %v102_v0 = vld [vmem:[#allocation2] sm:$0xff]  ;;  %v103_v1 = vld [vmem:[#allocation2 + $0x8] sm:$0xff]  ;;  %vm2469_vm0 = vcmask 261120   ;;  %vm7464_vm1 = vmmov 0  }
  0x4b   :  { %v104_v2 = vld [vmem:[#allocation2 + $0x10] sm:$0xff]  ;;  %v6251_v3 = vpack.c.bf16 %v103_v1, %v102_v0  ;;  %v105_v4 = vld [vmem:[#allocation2 + $0x18] sm:$0xff]  ;;  %v106_v6 = vld [vmem:[#allocation2 + $0x20] sm:$0xff]  ;;  %s7467_s3 = smov [#allocation10]  }
  0x4c   :  { %v6255_v5 = vpack.c.bf16 %v105_v4, %v104_v2  ;;  %v107_v7 = vld [vmem:[#allocation2 + $0x28] sm:$0xff]  ;;  %v86_v9 = vld [vmem:[%s8153_s0] sm:$0xff]  ;;  %v108_v10 = vld [vmem:[#allocation2 + $0x30] sm:$0xff]  ;;  %s4081_s15 = sshll.u32 %s7467_s3, 4  ;;  %s4082_s15 = int_to_ptr.vmem [resolvable:$true] %s4081_s15 }
  0x4d   :  { %6252 = vmatprep.subr.bf16.mxu0 %v6251_v3  ;;  %v6259_v8 = vpack.c.bf16 %v107_v7, %v106_v6  ;;  %v109_v11 = vld [vmem:[#allocation2 + $0x38] sm:$0xff]  ;;  %4899 = vmatprep.mubr.f32.mxu0 %v86_v9  ;;  %v110_v13 = vld [vmem:[#allocation2 + $0x40] sm:$0xff]  ;;  %v111_v14 = vld [vmem:[#allocation2 + $0x48] sm:$0xff] }
  0x4e   :  { %6254 = vmatpush3.bf16.msra.mxu0 %v6251_v3  ;;  %v6263_v12 = vpack.c.bf16 %v109_v11, %v108_v10  ;;  %v6267_v15 = vpack.c.bf16 %v111_v14, %v110_v13  ;;  %v112_v16 = vld [vmem:[#allocation2 + $0x50] sm:$0xff]  ;;  %v113_v17 = vld [vmem:[#allocation2 + $0x58] sm:$0xff]  ;;  %v114_v19 = vld [vmem:[#allocation2 + $0x60] sm:$0xff] }
  0x4f   :  { %6256 = vmatprep.subr.bf16.mxu0 %v6255_v5  ;;  %v6271_v18 = vpack.c.bf16 %v113_v17, %v112_v16  ;;  %v115_v20 = vld [vmem:[#allocation2 + $0x68] sm:$0xff]  ;;  %v116_v22 = vld [vmem:[#allocation2 + $0x70] sm:$0xff]  ;;  %v117_v23 = vld [vmem:[#allocation2 + $0x78] sm:$0xff] }
  0x50   :  { %v6275_v21 = vpack.c.bf16 %v115_v20, %v114_v19  ;;  %v6279_v24 = vpack.c.bf16 %v117_v23, %v116_v22  ;;  %v87_v25 = vld [vmem:[%s8153_s0 + $0x8] sm:$0xff]  ;;  %v88_v26 = vld [vmem:[%s8153_s0 + $0x10] sm:$0xff]  ;;  %v89_v27 = vld [vmem:[%s8153_s0 + $0x18] sm:$0xff] }
  0x51   :  { %v90_v28 = vld [vmem:[%s8153_s0 + $0x20] sm:$0xff]  ;;  %v91_v29 = vld [vmem:[%s8153_s0 + $0x28] sm:$0xff]  ;;  %v92_v30 = vld [vmem:[%s8153_s0 + $0x30] sm:$0xff] }
  0x52   :  { %6258 = vmatpush3.bf16.msra.mxu0 %v6255_v5  ;;  %v93_v31 = vld [vmem:[%s8153_s0 + $0x38] sm:$0xff]  ;;  %v94_v32 = vld [vmem:[%s8153_s0 + $0x40] sm:$0xff]  ;;  %v95_v33 = vld [vmem:[%s8153_s0 + $0x48] sm:$0xff] }
  0x53   :  { %6260 = vmatprep.subr.bf16.mxu0 %v6259_v8  ;;  %v96_v34 = vld [vmem:[%s8153_s0 + $0x50] sm:$0xff]  ;;  %v97_v35 = vld [vmem:[%s8153_s0 + $0x58] sm:$0xff]  ;;  %v98_v36 = vld [vmem:[%s8153_s0 + $0x60] sm:$0xff] }
  0x54   :  { %v99_v37 = vld [vmem:[%s8153_s0 + $0x68] sm:$0xff]  ;;  %v100_v38 = vld [vmem:[%s8153_s0 + $0x70] sm:$0xff]  ;;  %v101_v39 = vld [vmem:[%s8153_s0 + $0x78] sm:$0xff] }
  0x55   :  { %v300_v40 = vld [vmem:[#allocation5] sm:$0xff]  ;;  %v767_v42 = vld [vmem:[#allocation7 + $0x88] sm:$0xff]  ;;  %v768_v44 = vld [vmem:[#allocation7 + $0x90] sm:$0xff] }
  0x56   :  { %6262 = vmatpush3.bf16.msra.mxu0 %v6259_v8  ;;  %4955 = vmatprep.mubr.f32.mxu1 %v300_v40  ;;  %v766_v41 = vld [vmem:[#allocation7 + $0x80] sm:$0xff]  ;;  %v769_v45 = vld [vmem:[#allocation7 + $0x98] sm:$0xff]  ;;  %v771_v48 = vld [vmem:[#allocation7 + $0xa8] sm:$0xff] }
  0x57   :  { %6264 = vmatprep.subr.bf16.mxu0 %v6263_v12  ;;  %v6315_v43 = vpack.c.bf16 %v767_v42, %v766_v41  ;;  %v6319_v46 = vpack.c.bf16 %v769_v45, %v768_v44  ;;  %v770_v47 = vld [vmem:[#allocation7 + $0xa0] sm:$0xff]  ;;  %v772_v50 = vld [vmem:[#allocation7 + $0xb0] sm:$0xff]  ;;  %v773_v51 = vld [vmem:[#allocation7 + $0xb8] sm:$0xff] }
  0x58   :  { %v6323_v49 = vpack.c.bf16 %v771_v48, %v770_v47  ;;  %v6327_v52 = vpack.c.bf16 %v773_v51, %v772_v50  ;;  %v774_v53 = vld [vmem:[#allocation7 + $0xc0] sm:$0xff]  ;;  %v775_v54 = vld [vmem:[#allocation7 + $0xc8] sm:$0xff]  ;;  %v776_v56 = vld [vmem:[#allocation7 + $0xd0] sm:$0xff] }
  0x59   :  { %v6331_v55 = vpack.c.bf16 %v775_v54, %v774_v53  ;;  %v777_v57 = vld [vmem:[#allocation7 + $0xd8] sm:$0xff]  ;;  %v7644_v59 = vld [vmem:[%s8159_s6] ss:$0 sm:$0xff]  ;;  %v302_v53 = vld [vmem:[#allocation5 + $0x10] sm:$0xff] }
  0x5a   :  { %6266 = vmatpush3.bf16.msra.mxu0 %v6263_v12  ;;  %v6335_v58 = vpack.c.bf16 %v777_v57, %v776_v56  ;;  %v303_v54 = vld [vmem:[#allocation5 + $0x18] sm:$0xff]  ;;  %v305_v56 = vld [vmem:[#allocation5 + $0x28] sm:$0xff]  ;;  %v306_v57 = vld [vmem:[#allocation5 + $0x30] sm:$0xff] }
  0x5b   :  { %6268 = vmatprep.subr.bf16.mxu0 %v6267_v15 }
  0x5e   :  { %6270 = vmatpush3.bf16.msra.mxu0 %v6267_v15 }
  0x5f   :  { %6272 = vmatprep.subr.bf16.mxu0 %v6271_v18 }
  0x62   :  { %6274 = vmatpush3.bf16.msra.mxu0 %v6271_v18 }
  0x63   :  { %6276 = vmatprep.subr.bf16.mxu0 %v6275_v21 }
  0x66   :  { %6278 = vmatpush3.bf16.msra.mxu0 %v6275_v21 }
  0x67   :  { %6280 = vmatprep.subr.bf16.mxu0 %v6279_v24 }
  0x6a   :  { %6282 = vmatpush3.bf16.msra.mxu0 %v6279_v24 }
  0x6b   :  { %6316 = vmatprep.subr.bf16.mxu0 %v6315_v43 }
  0x6d   :  { %4900 = vmatmul.mubr.f32.vlgmr.msra.gmra.mrb[0].mxu0 %v87_v25 }
  0x6e   :  { %4902 = vmatprep.mubr.f32.mxu0 %v88_v26  ;;  %6318 = vmatpush3.bf16.msra.mxu0 %v6315_v43 }
  0x6f   :  { %6320 = vmatprep.subr.bf16.mxu0 %v6319_v46 }
  0x71   :  { %4903 = vmatmul.mubr.f32.gmra.mrb[2].mxu0 %v89_v27 }
  0x72   :  { %4905 = vmatprep.mubr.f32.mxu0 %v90_v28  ;;  %6322 = vmatpush3.bf16.msra.mxu0 %v6319_v46 }
  0x73   :  { %6324 = vmatprep.subr.bf16.mxu0 %v6323_v49 }
  0x75   :  { %4906 = vmatmul.mubr.f32.gmra.mrb[4].mxu0 %v91_v29 }
  0x76   :  { %4908 = vmatprep.mubr.f32.mxu0 %v92_v30  ;;  %6326 = vmatpush3.bf16.msra.mxu0 %v6323_v49 }
  0x77   :  { %6328 = vmatprep.subr.bf16.mxu0 %v6327_v52 }
  0x79   :  { %4909 = vmatmul.mubr.f32.gmra.mrb[6].mxu0 %v93_v31 }
  0x7a   :  { %4911 = vmatprep.mubr.f32.mxu0 %v94_v32  ;;  %6330 = vmatpush3.bf16.msra.mxu0 %v6327_v52  ;;  %v301_v52 = vld [vmem:[#allocation5 + $0x8] sm:$0xff] }
  0x7b   :  { %6332 = vmatprep.subr.bf16.mxu0 %v6331_v55 }
  0x7d   :  { %4912 = vmatmul.mubr.f32.gmra.mrb[8].mxu0 %v95_v33 }
  0x7e   :  { %4914 = vmatprep.mubr.f32.mxu0 %v96_v34  ;;  %6334 = vmatpush3.bf16.msra.mxu0 %v6331_v55  ;;  %v304_v55 = vld [vmem:[#allocation5 + $0x20] sm:$0xff] }
  0x7f   :  { %6336 = vmatprep.subr.bf16.mxu0 %v6335_v58 }
  0x81   :  { %4915 = vmatmul.mubr.f32.gmra.mrb[10].mxu0 %v97_v35 }
  0x82   :  { %4917 = vmatprep.mubr.f32.mxu0 %v98_v36  ;;  %6338 = vmatpush3.bf16.msra.mxu0 %v6335_v58  ;;  %v307_v58 = vld [vmem:[#allocation5 + $0x38] sm:$0xff] }
  0x85   :  { %4918 = vmatmul.mubr.f32.gmra.mrb[12].mxu0 %v99_v37 }
  0x86   :  { %4920 = vmatprep.mubr.f32.mxu0 %v100_v38 }
  0x89   :  { %4921 = vmatmul.mubr.f32.gmra.mrb[14].mxu0 %v101_v39 }
 0x140   :  { %v4901_v60 = vpop.f32.mrb[0].mxu0 }
 0x141   :  { %v195_v61 = vadd.f32 %v4901_v60, %v7644_v59  ;;  %v189_v62 = vpop.f32.mrb[1].mxu0  ;;  %v309_v60 = vld [vmem:[#allocation5 + $0x48] sm:$0xff] }
 0x142   :  { %v190_v63 = vadd.f32 %v7644_v59, %v189_v62  ;;  %v311_v62 = vld [vmem:[#allocation5 + $0x58] sm:$0xff] }
 0x143   :  { %v269_v0 = vmax.f32 %v195_v61, 0.0  ;;  %v310_v61 = vld [vmem:[#allocation5 + $0x50] sm:$0xff] }
 0x144   :  { %v268_v1 = vmax.f32 %v190_v63, 0.0  ;;  %v4904_v2 = vpop.f32.mrb[2].mxu0  ;;  %v312_v63 = vld [vmem:[#allocation5 + $0x60] sm:$0xff] }
 0x145   :  { %285 = vst [vmem:[#allocation10 + $0x8] sm:$0xff] %v269_v0  ;;  %v205_v3 = vadd.f32 %v4904_v2, %v7644_v59  ;;  %v199_v4 = vpop.f32.mrb[3].mxu0  ;;  %v315_v2 = vld [vmem:[#allocation5 + $0x78] sm:$0xff] }
 0x146   :  { %284 = vst [vmem:[#allocation10] sm:$0xff] %v268_v1  ;;  %v200_v5 = vadd.f32 %v7644_v59, %v199_v4  ;;  %v6283_v6 = vpack.c.bf16 %v269_v0, %v268_v1  ;;  %v313_v0 = vld [vmem:[#allocation5 + $0x68] sm:$0xff]  ;;  %v314_v1 = vld [vmem:[#allocation5 + $0x70] sm:$0xff] }
 0x147   :  { %v271_v7 = vmax.f32 %v205_v3, 0.0  ;;  %v316_v3 = vld [vmem:[#allocation5 + $0x80] sm:$0xff]  ;;  %v317_v4 = vld [vmem:[#allocation5 + $0x88] sm:$0xff] }
 0x148   :  { %v270_v8 = vmax.f32 %v200_v5, 0.0  ;;  %v4907_v9 = vpop.f32.mrb[4].mxu0  ;;  %6284 = vmatprep.subr.bf16.mxu1 %v6283_v6  ;;  %v318_v5 = vld [vmem:[#allocation5 + $0x90] sm:$0xff] }
 0x149   :  { %287 = vst [vmem:[#allocation10 + $0x18] sm:$0xff] %v271_v7  ;;  %v215_v10 = vadd.f32 %v4907_v9, %v7644_v59  ;;  %v209_v11 = vpop.f32.mrb[5].mxu0  ;;  %6286 = vmatpush3.bf16.msra.mxu1 %v6283_v6  ;;  %v319_v6 = vld [vmem:[#allocation5 + $0x98] sm:$0xff]  ;;  %v322_v9 = vld [vmem:[#allocation5 + $0xb0] sm:$0xff] }
 0x14a   :  { %286 = vst [vmem:[#allocation10 + $0x10] sm:$0xff] %v270_v8  ;;  %v6287_v12 = vpack.c.bf16 %v271_v7, %v270_v8  ;;  %v210_v13 = vadd.f32 %v7644_v59, %v209_v11  ;;  %v320_v7 = vld [vmem:[#allocation5 + $0xa0] sm:$0xff]  ;;  %v321_v8 = vld [vmem:[#allocation5 + $0xa8] sm:$0xff] }
 0x14b   :  { %v273_v14 = vmax.f32 %v215_v10, 0.0  ;;  %v323_v10 = vld [vmem:[#allocation5 + $0xb8] sm:$0xff]  ;;  %v324_v11 = vld [vmem:[#allocation5 + $0xc0] sm:$0xff] }
 0x14c   :  { %v272_v15 = vmax.f32 %v210_v13, 0.0  ;;  %v4910_v16 = vpop.f32.mrb[6].mxu0  ;;  %6288 = vmatprep.subr.bf16.mxu1 %v6287_v12  ;;  %v778_v13 = vld [vmem:[#allocation7 + $0xe0] sm:$0xff] }
 0x14d   :  { %289 = vst [vmem:[#allocation10 + $0x28] sm:$0xff] %v273_v14  ;;  %v225_v17 = vadd.f32 %v4910_v16, %v7644_v59  ;;  %v219_v18 = vpop.f32.mrb[7].mxu0  ;;  %6290 = vmatpush3.bf16.msra.mxu1 %v6287_v12  ;;  %v325_v12 = vld [vmem:[#allocation5 + $0xc8] sm:$0xff]  ;;  %v780_v16 = vld [vmem:[#allocation7 + $0xf0] sm:$0xff] }
 0x14e   :  { %288 = vst [vmem:[#allocation10 + $0x20] sm:$0xff] %v272_v15  ;;  %v6291_v19 = vpack.c.bf16 %v273_v14, %v272_v15  ;;  %v220_v20 = vadd.f32 %v7644_v59, %v219_v18  ;;  %v779_v14 = vld [vmem:[#allocation7 + $0xe8] sm:$0xff] }
 0x14f   :  { %v275_v21 = vmax.f32 %v225_v17, 0.0  ;;  %v6339_v15 = vpack.c.bf16 %v779_v14, %v778_v13  ;;  %v781_v17 = vld [vmem:[#allocation7 + $0xf8] sm:$0xff] }
 0x150   :  { %v274_v22 = vmax.f32 %v220_v20, 0.0  ;;  %v4913_v23 = vpop.f32.mrb[8].mxu0  ;;  %6292 = vmatprep.subr.bf16.mxu1 %v6291_v19  ;;  %v6343_v18 = vpack.c.bf16 %v781_v17, %v780_v16  ;;  %v750_v20 = vld [vmem:[#allocation7 + $0x8] sm:$0xff]  ;;  %v764_v13 = vld [vmem:[#allocation7 + $0x78] sm:$0xff]  ;;  %v953_v17 = vld [vmem:[#allocation7 + $0x100] sm:$0xff] }
 0x151   :  { %291 = vst [vmem:[#allocation10 + $0x38] sm:$0xff] %v275_v21  ;;  %v235_v24 = vadd.f32 %v4913_v23, %v7644_v59  ;;  %v229_v25 = vpop.f32.mrb[9].mxu0  ;;  %6294 = vmatpush3.bf16.msra.mxu1 %v6291_v19  ;;  %6340 = vmatprep.subr.bf16.mxu0 %v6339_v15  ;;  %v749_v19 = vld [vmem:[#allocation7] sm:$0xff]  ;;  %v327_v23 = vld [vmem:[#allocation5 + $0xd8] sm:$0xff] }
 0x152   :  { %290 = vst [vmem:[#allocation10 + $0x30] sm:$0xff] %v274_v22  ;;  %v6295_v26 = vpack.c.bf16 %v275_v21, %v274_v22  ;;  %v230_v27 = vadd.f32 %v7644_v59, %v229_v25  ;;  %6342 = vmatpush3.bf16.msra.mxu0 %v6339_v15  ;;  %v6347_v21 = vpack.c.bf16 %v750_v20, %v749_v19  ;;  %v326_v22 = vld [vmem:[#allocation5 + $0xd0] sm:$0xff]  ;;  %v329_v25 = vld [vmem:[#allocation5 + $0xe8] sm:$0xff] }
 0x153   :  { %v277_v28 = vmax.f32 %v235_v24, 0.0  ;;  %6344 = vmatprep.subr.bf16.mxu0 %v6343_v18  ;;  %v328_v24 = vld [vmem:[#allocation5 + $0xe0] sm:$0xff] }
 0x154   :  { %v276_v29 = vmax.f32 %v230_v27, 0.0  ;;  %v4916_v30 = vpop.f32.mrb[10].mxu0  ;;  %6296 = vmatprep.subr.bf16.mxu1 %v6295_v26  ;;  %v331_v27 = vld [vmem:[#allocation5 + $0xf8] sm:$0xff] }
 0x155   :  { %293 = vst [vmem:[#allocation10 + $0x48] sm:$0xff] %v277_v28  ;;  %v245_v31 = vadd.f32 %v4916_v30, %v7644_v59  ;;  %v239_v32 = vpop.f32.mrb[11].mxu0  ;;  %6298 = vmatpush3.bf16.msra.mxu1 %v6295_v26  ;;  %v330_v26 = vld [vmem:[#allocation5 + $0xf0] sm:$0xff] }
 0x156   :  { %292 = vst [vmem:[#allocation10 + $0x40] sm:$0xff] %v276_v29  ;;  %v6299_v33 = vpack.c.bf16 %v277_v28, %v276_v29  ;;  %v240_v34 = vadd.f32 %v7644_v59, %v239_v32  ;;  %6346 = vmatpush3.bf16.msra.mxu0 %v6343_v18  ;;  %v332_v28 = vld [vmem:[#allocation5 + $0x100] sm:$0xff]  ;;  %v333_v29 = vld [vmem:[#allocation5 + $0x108] sm:$0xff]  ;;  %v334_v30 = vld [vmem:[#allocation5 + $0x110] sm:$0xff] }
 0x157   :  { %v279_v35 = vmax.f32 %v245_v31, 0.0  ;;  %6348 = vmatprep.subr.bf16.mxu0 %v6347_v21  ;;  %v335_v31 = vld [vmem:[#allocation5 + $0x118] sm:$0xff]  ;;  %v336_v32 = vld [vmem:[#allocation5 + $0x120] sm:$0xff]  ;;  %v954_v18 = vld [vmem:[#allocation7 + $0x108] sm:$0xff] }
 0x158   :  { %v278_v36 = vmax.f32 %v240_v34, 0.0  ;;  %v4919_v37 = vpop.f32.mrb[12].mxu0  ;;  %6300 = vmatprep.subr.bf16.mxu1 %v6299_v33  ;;  %v338_v34 = vld [vmem:[#allocation5 + $0x130] sm:$0xff]  ;;  %v6379_v20 = vpack.c.bf16 %v954_v18, %v953_v17  ;;  %v1072_v18 = vld [vmem:[#allocation7 + $0x1e8] sm:$0xff] }
 0x159   :  { %295 = vst [vmem:[#allocation10 + $0x58] sm:$0xff] %v279_v35  ;;  %v255_v38 = vadd.f32 %v4919_v37, %v7644_v59  ;;  %v249_v39 = vpop.f32.mrb[13].mxu0  ;;  %6302 = vmatpush3.bf16.msra.mxu1 %v6299_v33  ;;  %v337_v33 = vld [vmem:[#allocation5 + $0x128] sm:$0xff] }
 0x15a   :  { %294 = vst [vmem:[#allocation10 + $0x50] sm:$0xff] %v278_v36  ;;  %v6303_v40 = vpack.c.bf16 %v279_v35, %v278_v36  ;;  %v250_v41 = vadd.f32 %v7644_v59, %v249_v39  ;;  %v339_v35 = vld [vmem:[#allocation5 + $0x138] sm:$0xff]  ;;  %v340_v36 = vld [vmem:[#allocation5 + $0x140] sm:$0xff]  ;;  %v341_v37 = vld [vmem:[#allocation5 + $0x148] sm:$0xff] }
 0x15b   :  { %v281_v42 = vmax.f32 %v255_v38, 0.0 }
 0x15c   :  { %v280_v43 = vmax.f32 %v250_v41, 0.0  ;;  %v4922_v44 = vpop.f32.mrb[14].mxu0  ;;  %6304 = vmatprep.subr.bf16.mxu1 %v6303_v40 }
 0x15d   :  { %297 = vst [vmem:[#allocation10 + $0x68] sm:$0xff] %v281_v42  ;;  %v265_v45 = vadd.f32 %v4922_v44, %v7644_v59  ;;  %v259_v46 = vpop.f32.mrb[15].mxu0  ;;  %6306 = vmatpush3.bf16.msra.mxu1 %v6303_v40 }
 0x15e   :  { %296 = vst [vmem:[#allocation10 + $0x60] sm:$0xff] %v280_v43  ;;  %v6307_v47 = vpack.c.bf16 %v281_v42, %v280_v43  ;;  %v260_v48 = vadd.f32 %v7644_v59, %v259_v46  ;;  %v308_v59 = vld [vmem:[#allocation5 + $0x40] sm:$0xff]  ;;  %v751_v42 = vld [vmem:[#allocation7 + $0x10] sm:$0xff]  ;;  %v752_v43 = vld [vmem:[#allocation7 + $0x18] sm:$0xff] }
 0x15f   :  { %v283_v49 = vmax.f32 %v265_v45, 0.0  ;;  %v6351_v46 = vpack.c.bf16 %v752_v43, %v751_v42  ;;  %v964_v42 = vld [vmem:[#allocation7 + $0x158] sm:$0xff] }
 0x160   :  { %v282_v50 = vmax.f32 %v260_v48, 0.0  ;;  %6308 = vmatprep.subr.bf16.mxu1 %v6307_v47  ;;  %v754_v48 = vld [vmem:[#allocation7 + $0x28] sm:$0xff] }
 0x161   :  { %299 = vst [vmem:[#allocation10 + $0x78] sm:$0xff] %v283_v49  ;;  %6310 = vmatpush3.bf16.msra.mxu1 %v6307_v47  ;;  %v753_v47 = vld [vmem:[#allocation7 + $0x20] sm:$0xff] }
 0x162   :  { %298 = vst [vmem:[#allocation10 + $0x70] sm:$0xff] %v282_v50  ;;  %v6311_v51 = vpack.c.bf16 %v283_v49, %v282_v50  ;;  %v342_v50 = vld [vmem:[#allocation5 + $0x150] sm:$0xff] }
 0x164   :  { %6312 = vmatprep.subr.bf16.mxu1 %v6311_v51 }
 0x165   :  { %6314 = vmatpush3.bf16.msra.mxu1 %v6311_v51 }
 0x168   :  { %4956 = vmatmul.mubr.f32.vlgmr.msra.gmra.mrb[0].mxu1 %v301_v52  ;;  %v6355_v52 = vpack.c.bf16 %v754_v48, %v753_v47  ;;  %v968_v47 = vld [vmem:[#allocation7 + $0x178] sm:$0xff] }
 0x169   :  { %4958 = vmatprep.mubr.f32.mxu1 %v302_v53  ;;  %v343_v53 = vld [vmem:[#allocation5 + $0x158] sm:$0xff] }
 0x16c   :  { %4959 = vmatmul.mubr.f32.gmra.mrb[2].mxu1 %v303_v54  ;;  %v755_v54 = vld [vmem:[#allocation7 + $0x30] sm:$0xff] }
 0x16d   :  { %4961 = vmatprep.mubr.f32.mxu1 %v304_v55  ;;  %v756_v55 = vld [vmem:[#allocation7 + $0x38] sm:$0xff] }
 0x170   :  { %4962 = vmatmul.mubr.f32.gmra.mrb[4].mxu1 %v305_v56 }
 0x171   :  { %4964 = vmatprep.mubr.f32.mxu1 %v306_v57  ;;  %v6359_v57 = vpack.c.bf16 %v756_v55, %v755_v54  ;;  %v1061_v55 = vld [vmem:[#allocation7 + $0x190] sm:$0xff] }
 0x174   :  { %4965 = vmatmul.mubr.f32.gmra.mrb[6].mxu1 %v307_v58 }
 0x175   :  { %4967 = vmatprep.mubr.f32.mxu1 %v308_v59  ;;  %v344_v59 = vld [vmem:[#allocation5 + $0x160] sm:$0xff] }
 0x178   :  { %4968 = vmatmul.mubr.f32.gmra.mrb[8].mxu1 %v309_v60  ;;  %v757_v60 = vld [vmem:[#allocation7 + $0x40] sm:$0xff] }
 0x179   :  { %4970 = vmatprep.mubr.f32.mxu1 %v310_v61  ;;  %v758_v61 = vld [vmem:[#allocation7 + $0x48] sm:$0xff] }
 0x17c   :  { %4971 = vmatmul.mubr.f32.gmra.mrb[10].mxu1 %v311_v62 }
 0x17d   :  { %4973 = vmatprep.mubr.f32.mxu1 %v312_v63  ;;  %v345_v63 = vld [vmem:[#allocation5 + $0x168] sm:$0xff] }
 0x180   :  { %4974 = vmatmul.mubr.f32.gmra.mrb[12].mxu1 %v313_v0  ;;  %v6363_v0 = vpack.c.bf16 %v758_v61, %v757_v60  ;;  %v1063_v60 = vld [vmem:[#allocation7 + $0x1a0] sm:$0xff]  ;;  %v1064_v61 = vld [vmem:[#allocation7 + $0x1a8] sm:$0xff] }
 0x181   :  { %4976 = vmatprep.mubr.f32.mxu1 %v314_v1 }
 0x184   :  { %4977 = vmatmul.mubr.f32.gmra.mrb[14].mxu1 %v315_v2  ;;  %v759_v2 = vld [vmem:[#allocation7 + $0x50] sm:$0xff] }
 0x185   :  { %4979 = vmatprep.mubr.f32.mxu1 %v316_v3  ;;  %v760_v3 = vld [vmem:[#allocation7 + $0x58] sm:$0xff] }
 0x188   :  { %4980 = vmatmul.mubr.f32.gmra.mrb[16].mxu1 %v317_v4 }
 0x189   :  { %4982 = vmatprep.mubr.f32.mxu1 %v318_v5  ;;  %v6367_v5 = vpack.c.bf16 %v760_v3, %v759_v2  ;;  %v351_v2 = vld [vmem:[#allocation5 + $0x198] sm:$0xff]  ;;  %v1065_v3 = vld [vmem:[#allocation7 + $0x1b0] sm:$0xff] }
 0x18c   :  { %4983 = vmatmul.mubr.f32.gmra.mrb[18].mxu1 %v319_v6 }
 0x18d   :  { %4985 = vmatprep.mubr.f32.mxu1 %v320_v7  ;;  %v761_v7 = vld [vmem:[#allocation7 + $0x60] sm:$0xff] }
 0x190   :  { %4986 = vmatmul.mubr.f32.gmra.mrb[20].mxu1 %v321_v8  ;;  %v762_v8 = vld [vmem:[#allocation7 + $0x68] sm:$0xff] }
 0x191   :  { %4988 = vmatprep.mubr.f32.mxu1 %v322_v9 }
 0x194   :  { %4989 = vmatmul.mubr.f32.gmra.mrb[22].mxu1 %v323_v10  ;;  %v6371_v10 = vpack.c.bf16 %v762_v8, %v761_v7  ;;  %v352_v8 = vld [vmem:[#allocation5 + $0x1a0] sm:$0xff] }
 0x195   :  { %4991 = vmatprep.mubr.f32.mxu1 %v324_v11 }
 0x198   :  { %4992 = vmatmul.mubr.f32.gmra.mrb[24].mxu1 %v325_v12  ;;  %v763_v12 = vld [vmem:[#allocation7 + $0x70] sm:$0xff] }
 0x199   :  { %4994 = vmatprep.mubr.f32.mxu1 %v326_v22  ;;  %v6375_v15 = vpack.c.bf16 %v764_v13, %v763_v12  ;;  %v955_v22 = vld [vmem:[#allocation7 + $0x110] sm:$0xff] }
 0x19a   :  { %v1069_v13 = vld [vmem:[#allocation7 + $0x1d0] sm:$0xff] }
 0x19c   :  { %4995 = vmatmul.mubr.f32.gmra.mrb[26].mxu1 %v327_v23  ;;  %v956_v23 = vld [vmem:[#allocation7 + $0x118] sm:$0xff] }
 0x19d   :  { %4997 = vmatprep.mubr.f32.mxu1 %v328_v24 }
 0x1a0   :  { %4998 = vmatmul.mubr.f32.gmra.mrb[28].mxu1 %v329_v25  ;;  %v6383_v25 = vpack.c.bf16 %v956_v23, %v955_v22  ;;  %v1074_v22 = vld [vmem:[#allocation7 + $0x1f8] sm:$0xff] }
 0x1a1   :  { %5000 = vmatprep.mubr.f32.mxu1 %v330_v26 }
 0x1a4   :  { %5001 = vmatmul.mubr.f32.gmra.mrb[30].mxu1 %v331_v27  ;;  %v957_v27 = vld [vmem:[#allocation7 + $0x120] sm:$0xff] }
 0x1a5   :  { %5003 = vmatprep.mubr.f32.mxu1 %v332_v28  ;;  %v958_v28 = vld [vmem:[#allocation7 + $0x128] sm:$0xff] }
 0x1a8   :  { %5004 = vmatmul.mubr.f32.gmra.mrb[32].mxu1 %v333_v29  ;;  %v346_v29 = vld [vmem:[#allocation5 + $0x170] sm:$0xff] }
 0x1a9   :  { %5006 = vmatprep.mubr.f32.mxu1 %v334_v30  ;;  %v6387_v30 = vpack.c.bf16 %v958_v28, %v957_v27  ;;  %v1166_v27 = vld [vmem:[#allocation7 + $0x208] sm:$0xff] }
 0x1ac   :  { %5007 = vmatmul.mubr.f32.gmra.mrb[34].mxu1 %v335_v31  ;;  %v347_v31 = vld [vmem:[#allocation5 + $0x178] sm:$0xff] }
 0x1ad   :  { %5009 = vmatprep.mubr.f32.mxu1 %v336_v32  ;;  %v959_v32 = vld [vmem:[#allocation7 + $0x130] sm:$0xff] }
 0x1b0   :  { %5010 = vmatmul.mubr.f32.gmra.mrb[36].mxu1 %v337_v33  ;;  %v960_v33 = vld [vmem:[#allocation7 + $0x138] sm:$0xff] }
 0x1b1   :  { %5012 = vmatprep.mubr.f32.mxu1 %v338_v34  ;;  %v6391_v34 = vpack.c.bf16 %v960_v33, %v959_v32  ;;  %v1168_v32 = vld [vmem:[#allocation7 + $0x218] sm:$0xff] }
 0x1b4   :  { %5013 = vmatmul.mubr.f32.gmra.mrb[38].mxu1 %v339_v35  ;;  %v348_v35 = vld [vmem:[#allocation5 + $0x180] sm:$0xff] }
 0x1b5   :  { %5015 = vmatprep.mubr.f32.mxu1 %v340_v36  ;;  %v961_v36 = vld [vmem:[#allocation7 + $0x140] sm:$0xff] }
 0x1b8   :  { %5016 = vmatmul.mubr.f32.gmra.mrb[40].mxu1 %v341_v37  ;;  %v962_v37 = vld [vmem:[#allocation7 + $0x148] sm:$0xff] }
 0x1b9   :  { %5018 = vmatprep.mubr.f32.mxu1 %v342_v50 }
 0x1bc   :  { %5019 = vmatmul.mubr.f32.gmra.mrb[42].mxu1 %v343_v53 }
 0x1bd   :  { %5021 = vmatprep.mubr.f32.mxu1 %v344_v59 }
 0x1c0   :  { %5022 = vmatmul.mubr.f32.gmra.mrb[44].mxu1 %v345_v63  ;;  %v350_v63 = vld [vmem:[#allocation5 + $0x190] sm:$0xff] }
 0x1c1   :  { %5024 = vmatprep.mubr.f32.mxu1 %v346_v29 }
 0x1c4   :  { %5025 = vmatmul.mubr.f32.gmra.mrb[46].mxu1 %v347_v31  ;;  %v1167_v31 = vld [vmem:[#allocation7 + $0x210] sm:$0xff] }
 0x1c5   :  { %5027 = vmatprep.mubr.f32.mxu1 %v348_v35 }
 0x23b   :  { %v7662_v38 = vpop.f32.mrb[0].mxu1 }
 0x23c   :  { %v430_v39 = vpop.f32.mrb[1].mxu1 }
 0x23f   :  { %v7664_v40 = vpop.f32.mrb[2].mxu1 }
 0x240   :  { %v7666_v41 = vpop.f32.mrb[3].mxu1 }
 0x243   :  { %v4963_v44 = vpop.f32.mrb[4].mxu1 }
 0x244   :  { %v450_v45 = vpop.f32.mrb[5].mxu1 }
 0x245   :  { %5083 = vmatprep.mubr.f32.mxu0 %v450_v45 }
 0x246   :  { %5084 = vmatmul.mubr.f32.vlgmr.msra.gmra.mrb[16].mxu0 %v4963_v44  ;;  %v965_v44 = vld [vmem:[#allocation7 + $0x160] sm:$0xff] }
 0x247   :  { %6350 = vmatpush3.bf16.msra.mxu0 %v6347_v21  ;;  %v4966_v49 = vpop.f32.mrb[6].mxu1 }
 0x248   :  { %v460_v51 = vpop.f32.mrb[7].mxu1  ;;  %6352 = vmatprep.subr.bf16.mxu0 %v6351_v46 }
 0x249   :  { %5086 = vmatprep.mubr.f32.mxu0 %v460_v51  ;;  %v1059_v51 = vld [vmem:[#allocation7 + $0x180] sm:$0xff] }
 0x24a   :  { %5087 = vmatmul.mubr.f32.gmra.mrb[18].mxu0 %v4966_v49 }
 0x24b   :  { %6354 = vmatpush3.bf16.msra.mxu0 %v6351_v46  ;;  %5121 = vmatprep.mubr.f32.mxu0 %v430_v39  ;;  %v7668_v56 = vpop.f32.mrb[8].mxu1  ;;  %v6395_v39 = vpack.c.bf16 %v962_v37, %v961_v36  ;;  %v967_v46 = vld [vmem:[#allocation7 + $0x170] sm:$0xff]  ;;  %v1169_v36 = vld [vmem:[#allocation7 + $0x220] sm:$0xff]  ;;  %v1170_v37 = vld [vmem:[#allocation7 + $0x228] sm:$0xff] }
 0x24c   :  { %6356 = vmatprep.subr.bf16.mxu0 %v6355_v52  ;;  %v470_v58 = vpop.f32.mrb[9].mxu1  ;;  %v6407_v49 = vpack.c.bf16 %v968_v47, %v967_v46  ;;  %v1175_v47 = vld [vmem:[#allocation7 + $0x250] sm:$0xff] }
 0x24f   :  { %6358 = vmatpush3.bf16.msra.mxu0 %v6355_v52  ;;  %v7670_v62 = vpop.f32.mrb[10].mxu1  ;;  %v1060_v52 = vld [vmem:[#allocation7 + $0x188] sm:$0xff] }
 0x250   :  { %6360 = vmatprep.subr.bf16.mxu0 %v6359_v57  ;;  %v7672_v1 = vpop.f32.mrb[11].mxu1  ;;  %v6411_v53 = vpack.c.bf16 %v1060_v52, %v1059_v51  ;;  %v1178_v52 = vld [vmem:[#allocation7 + $0x268] sm:$0xff] }
 0x253   :  { %6362 = vmatpush3.bf16.msra.mxu0 %v6359_v57  ;;  %v7674_v4 = vpop.f32.mrb[12].mxu1  ;;  %v1062_v57 = vld [vmem:[#allocation7 + $0x198] sm:$0xff] }
 0x254   :  { %6364 = vmatprep.subr.bf16.mxu0 %v6363_v0  ;;  %v7676_v6 = vpop.f32.mrb[13].mxu1  ;;  %v6415_v59 = vpack.c.bf16 %v1062_v57, %v1061_v55  ;;  %v1180_v55 = vld [vmem:[#allocation7 + $0x278] sm:$0xff] }
 0x257   :  { %6366 = vmatpush3.bf16.msra.mxu0 %v6363_v0  ;;  %v7678_v9 = vpop.f32.mrb[14].mxu1  ;;  %v6419_v0 = vpack.c.bf16 %v1064_v61, %v1063_v60  ;;  %v1272_v60 = vld [vmem:[#allocation7 + $0x288] sm:$0xff] }
 0x258   :  { %6368 = vmatprep.subr.bf16.mxu0 %v6367_v5  ;;  %v7680_v11 = vpop.f32.mrb[15].mxu1 }
 0x25b   :  { %6370 = vmatpush3.bf16.msra.mxu0 %v6367_v5  ;;  %v7682_v14 = vpop.f32.mrb[16].mxu1  ;;  %v1066_v5 = vld [vmem:[#allocation7 + $0x1b8] sm:$0xff] }
 0x25c   :  { %6372 = vmatprep.subr.bf16.mxu0 %v6371_v10  ;;  %v7684_v16 = vpop.f32.mrb[17].mxu1  ;;  %v6423_v7 = vpack.c.bf16 %v1066_v5, %v1065_v3  ;;  %v1274_v3 = vld [vmem:[#allocation7 + $0x298] sm:$0xff] }
 0x25f   :  { %6374 = vmatpush3.bf16.msra.mxu0 %v6371_v10  ;;  %v7686_v19 = vpop.f32.mrb[18].mxu1  ;;  %v1068_v10 = vld [vmem:[#allocation7 + $0x1c8] sm:$0xff] }
 0x260   :  { %6376 = vmatprep.subr.bf16.mxu0 %v6375_v15  ;;  %v7688_v21 = vpop.f32.mrb[19].mxu1 }
 0x263   :  { %6378 = vmatpush3.bf16.msra.mxu0 %v6375_v15  ;;  %v7690_v24 = vpop.f32.mrb[20].mxu1  ;;  %v1070_v15 = vld [vmem:[#allocation7 + $0x1d8] sm:$0xff] }
 0x264   :  { %6380 = vmatprep.subr.bf16.mxu0 %v6379_v20  ;;  %v7692_v26 = vpop.f32.mrb[21].mxu1  ;;  %v6431_v17 = vpack.c.bf16 %v1070_v15, %v1069_v13  ;;  %v1277_v15 = vld [vmem:[#allocation7 + $0x2b0] sm:$0xff] }
 0x266   :  { %5122 = vmatmul.mubr.f32.vlgmr.msra.gmra.mrb[16].mxu0 %v7662_v38  ;;  %v349_v38 = vld [vmem:[#allocation5 + $0x188] sm:$0xff] }
 0x267   :  { %5124 = vmatprep.mubr.f32.mxu0 %v7666_v41  ;;  %6382 = vmatpush3.bf16.msra.mxu0 %v6379_v20  ;;  %v963_v41 = vld [vmem:[#allocation7 + $0x150] sm:$0xff]  ;;  %v7697_v48 = vpop.f32.mrb[22].mxu1 }
 0x268   :  { %6384 = vmatprep.subr.bf16.mxu0 %v6383_v25  ;;  %5028 = vmatmul.mubr.f32.gmra.mrb[48].mxu1 %v349_v38  ;;  %v6399_v43 = vpack.c.bf16 %v964_v42, %v963_v41  ;;  %v7699_v50 = vpop.f32.mrb[23].mxu1  ;;  %v1073_v20 = vld [vmem:[#allocation7 + $0x1f0] sm:$0xff]  ;;  %v355_v41 = vld [vmem:[#allocation5 + $0x1b8] sm:$0xff] }
 0x269   :  { %5030 = vmatprep.mubr.f32.mxu1 %v350_v63  ;;  %v6439_v23 = vpack.c.bf16 %v1074_v22, %v1073_v20  ;;  %v354_v38 = vld [vmem:[#allocation5 + $0x1b0] sm:$0xff] }
 0x26a   :  { %5125 = vmatmul.mubr.f32.gmra.mrb[18].mxu0 %v7664_v40  ;;  %v966_v40 = vld [vmem:[#allocation7 + $0x168] sm:$0xff]  ;;  %v1171_v42 = vld [vmem:[#allocation7 + $0x230] sm:$0xff] }
 0x26b   :  { %6386 = vmatpush3.bf16.msra.mxu0 %v6383_v25  ;;  %5159 = vmatprep.mubr.f32.mxu0 %v470_v58  ;;  %v6403_v45 = vpack.c.bf16 %v966_v40, %v965_v44  ;;  %v7701_v54 = vpop.f32.mrb[24].mxu1  ;;  %v1165_v25 = vld [vmem:[#allocation7 + $0x200] sm:$0xff]  ;;  %v362_v22 = vld [vmem:[#allocation5 + $0x1f0] sm:$0xff] }
 0x26c   :  { %6388 = vmatprep.subr.bf16.mxu0 %v6387_v30  ;;  %v7703_v58 = vpop.f32.mrb[25].mxu1  ;;  %5031 = vmatmul.mubr.f32.gmra.mrb[50].mxu1 %v351_v2  ;;  %v356_v40 = vld [vmem:[#allocation5 + $0x1c0] sm:$0xff]  ;;  %v1273_v2 = vld [vmem:[#allocation7 + $0x290] sm:$0xff] }
 0x26d   :  { %5033 = vmatprep.mubr.f32.mxu1 %v352_v8 }
 0x26f   :  { %6390 = vmatpush3.bf16.msra.mxu0 %v6387_v30  ;;  %v7709_v28 = vpop.f32.mrb[26].mxu1  ;;  %v6443_v30 = vpack.c.bf16 %v1166_v27, %v1165_v25  ;;  %v1282_v25 = vld [vmem:[#allocation7 + $0x2d8] sm:$0xff] }
 0x270   :  { %6392 = vmatprep.subr.bf16.mxu0 %v6391_v34  ;;  %v7711_v29 = vpop.f32.mrb[27].mxu1  ;;  %v363_v27 = vld [vmem:[#allocation5 + $0x1f8] sm:$0xff] }
 0x273   :  { %6394 = vmatpush3.bf16.msra.mxu0 %v6391_v34  ;;  %v7713_v33 = vpop.f32.mrb[28].mxu1  ;;  %v6447_v34 = vpack.c.bf16 %v1168_v32, %v1167_v31  ;;  %v1285_v32 = vld [vmem:[#allocation7 + $0x2f0] sm:$0xff] }
 0x274   :  { %6396 = vmatprep.subr.bf16.mxu0 %v6395_v39  ;;  %v7715_v35 = vpop.f32.mrb[29].mxu1 }
 0x277   :  { %6398 = vmatpush3.bf16.msra.mxu0 %v6395_v39  ;;  %v6451_v39 = vpack.c.bf16 %v1170_v37, %v1169_v36  ;;  %v7721_v61 = vpop.f32.mrb[30].mxu1 }
 0x278   :  { %6400 = vmatprep.subr.bf16.mxu0 %v6399_v43  ;;  %v7723_v63 = vpop.f32.mrb[31].mxu1 }
 0x27b   :  { %6402 = vmatpush3.bf16.msra.mxu0 %v6399_v43  ;;  %v1172_v43 = vld [vmem:[#allocation7 + $0x238] sm:$0xff]  ;;  %v7725_v5 = vpop.f32.mrb[32].mxu1 }
 0x27c   :  { %6404 = vmatprep.subr.bf16.mxu0 %v6403_v45  ;;  %v6455_v44 = vpack.c.bf16 %v1172_v43, %v1171_v42  ;;  %v7727_v8 = vpop.f32.mrb[33].mxu1  ;;  %v1379_v43 = vld [vmem:[#allocation7 + $0x310] sm:$0xff] }
 0x27f   :  { %6406 = vmatpush3.bf16.msra.mxu0 %v6403_v45  ;;  %v1174_v45 = vld [vmem:[#allocation7 + $0x248] sm:$0xff]  ;;  %v7733_v37 = vpop.f32.mrb[34].mxu1 }
 0x280   :  { %6408 = vmatprep.subr.bf16.mxu0 %v6407_v49 }
 0x283   :  { %6410 = vmatpush3.bf16.msra.mxu0 %v6407_v49  ;;  %v1176_v49 = vld [vmem:[#allocation7 + $0x258] sm:$0xff] }
 0x284   :  { %6412 = vmatprep.subr.bf16.mxu0 %v6411_v53  ;;  %v6463_v51 = vpack.c.bf16 %v1176_v49, %v1175_v47  ;;  %v1383_v49 = vld [vmem:[#allocation7 + $0x330] sm:$0xff] }
 0x286   :  { %5160 = vmatmul.mubr.f32.vlgmr.msra.gmra.mrb[16].mxu0 %v7668_v56  ;;  %v1067_v56 = vld [vmem:[#allocation7 + $0x1c0] sm:$0xff] }
 0x287   :  { %6414 = vmatpush3.bf16.msra.mxu0 %v6411_v53  ;;  %5162 = vmatprep.mubr.f32.mxu0 %v7672_v1  ;;  %v353_v1 = vld [vmem:[#allocation5 + $0x1a8] sm:$0xff]  ;;  %v6427_v12 = vpack.c.bf16 %v1068_v10, %v1067_v56  ;;  %v1179_v53 = vld [vmem:[#allocation7 + $0x270] sm:$0xff]  ;;  %v1275_v56 = vld [vmem:[#allocation7 + $0x2a0] sm:$0xff] }
 0x288   :  { %6416 = vmatprep.subr.bf16.mxu0 %v6415_v59  ;;  %5034 = vmatmul.mubr.f32.gmra.mrb[52].mxu1 %v353_v1  ;;  %v6471_v57 = vpack.c.bf16 %v1180_v55, %v1179_v53  ;;  %v1276_v10 = vld [vmem:[#allocation7 + $0x2a8] sm:$0xff]  ;;  %v358_v1 = vld [vmem:[#allocation5 + $0x1d0] sm:$0xff]  ;;  %v1388_v55 = vld [vmem:[#allocation7 + $0x358] sm:$0xff] }
 0x289   :  { %5036 = vmatprep.mubr.f32.mxu1 %v354_v38  ;;  %v6483_v13 = vpack.c.bf16 %v1276_v10, %v1275_v56  ;;  %v1377_v38 = vld [vmem:[#allocation7 + $0x300] sm:$0xff] }
 0x28a   :  { %5163 = vmatmul.mubr.f32.gmra.mrb[18].mxu0 %v7670_v62  ;;  %v1071_v62 = vld [vmem:[#allocation7 + $0x1e0] sm:$0xff] }
 0x28b   :  { %6418 = vmatpush3.bf16.msra.mxu0 %v6415_v59  ;;  %5197 = vmatprep.mubr.f32.mxu0 %v7676_v6  ;;  %v6435_v6 = vpack.c.bf16 %v1072_v18, %v1071_v62  ;;  %v1271_v59 = vld [vmem:[#allocation7 + $0x280] sm:$0xff] }
 0x28c   :  { %6420 = vmatprep.subr.bf16.mxu0 %v6419_v0  ;;  %5037 = vmatmul.mubr.f32.gmra.mrb[54].mxu1 %v355_v41  ;;  %v360_v62 = vld [vmem:[#allocation5 + $0x1e0] sm:$0xff]  ;;  %v7735_v41 = vpop.f32.mrb[35].mxu1 }
 0x28d   :  { %5039 = vmatprep.mubr.f32.mxu1 %v356_v40  ;;  %v7737_v40 = vpop.f32.mrb[36].mxu1 }
 0x28f   :  { %6422 = vmatpush3.bf16.msra.mxu0 %v6419_v0  ;;  %v6475_v0 = vpack.c.bf16 %v1272_v60, %v1271_v59  ;;  %v1390_v59 = vld [vmem:[#allocation7 + $0x368] sm:$0xff]  ;;  %v1391_v60 = vld [vmem:[#allocation7 + $0x370] sm:$0xff] }
 0x290   :  { %6424 = vmatprep.subr.bf16.mxu0 %v6423_v7 }
 0x293   :  { %6426 = vmatpush3.bf16.msra.mxu0 %v6423_v7  ;;  %v6479_v7 = vpack.c.bf16 %v1274_v3, %v1273_v2  ;;  %v1483_v3 = vld [vmem:[#allocation7 + $0x380] sm:$0xff] }
 0x294   :  { %6428 = vmatprep.subr.bf16.mxu0 %v6427_v12 }
 0x297   :  { %6430 = vmatpush3.bf16.msra.mxu0 %v6427_v12  ;;  %v359_v12 = vld [vmem:[#allocation5 + $0x1d8] sm:$0xff] }
 0x298   :  { %6432 = vmatprep.subr.bf16.mxu0 %v6431_v17 }
 0x29b   :  { %6434 = vmatpush3.bf16.msra.mxu0 %v6431_v17  ;;  %v1278_v17 = vld [vmem:[#allocation7 + $0x2b8] sm:$0xff] }
 0x29c   :  { %6436 = vmatprep.subr.bf16.mxu0 %v6435_v6  ;;  %v6487_v18 = vpack.c.bf16 %v1278_v17, %v1277_v15 }
 0x29f   :  { %6438 = vmatpush3.bf16.msra.mxu0 %v6435_v6  ;;  %v1279_v6 = vld [vmem:[#allocation7 + $0x2c0] sm:$0xff] }
 0x2a0   :  { %6440 = vmatprep.subr.bf16.mxu0 %v6439_v23 }
 0x2a3   :  { %6442 = vmatpush3.bf16.msra.mxu0 %v6439_v23  ;;  %v1281_v23 = vld [vmem:[#allocation7 + $0x2d0] sm:$0xff] }
 0x2a4   :  { %6444 = vmatprep.subr.bf16.mxu0 %v6443_v30 }
 0x2a6   :  { %5198 = vmatmul.mubr.f32.vlgmr.msra.gmra.mrb[16].mxu0 %v7674_v4  ;;  %v1173_v4 = vld [vmem:[#allocation7 + $0x240] sm:$0xff] }
 0x2a7   :  { %6446 = vmatpush3.bf16.msra.mxu0 %v6443_v30  ;;  %5200 = vmatprep.mubr.f32.mxu0 %v7680_v11  ;;  %v357_v11 = vld [vmem:[#allocation5 + $0x1c8] sm:$0xff]  ;;  %v6459_v46 = vpack.c.bf16 %v1174_v45, %v1173_v4  ;;  %v7739_v45 = vpop.f32.mrb[37].mxu1 }
 0x2a8   :  { %6448 = vmatprep.subr.bf16.mxu0 %v6447_v34  ;;  %5040 = vmatmul.mubr.f32.gmra.mrb[56].mxu1 %v357_v11  ;;  %v1284_v30 = vld [vmem:[#allocation7 + $0x2e8] sm:$0xff]  ;;  %v1381_v11 = vld [vmem:[#allocation7 + $0x320] sm:$0xff]  ;;  %v7745_v2 = vpop.f32.mrb[38].mxu1 }
 0x2a9   :  { %5042 = vmatprep.mubr.f32.mxu1 %v358_v1  ;;  %v7747_v56 = vpop.f32.mrb[39].mxu1  ;;  %v1485_v1 = vld [vmem:[#allocation7 + $0x390] sm:$0xff] }
 0x2aa   :  { %5201 = vmatmul.mubr.f32.gmra.mrb[18].mxu0 %v7678_v9  ;;  %v1177_v9 = vld [vmem:[#allocation7 + $0x260] sm:$0xff] }
 0x2ab   :  { %6450 = vmatpush3.bf16.msra.mxu0 %v6447_v34  ;;  %5235 = vmatprep.mubr.f32.mxu0 %v7684_v16  ;;  %v6467_v16 = vpack.c.bf16 %v1178_v52, %v1177_v9  ;;  %v1286_v34 = vld [vmem:[#allocation7 + $0x2f8] sm:$0xff]  ;;  %v1385_v52 = vld [vmem:[#allocation7 + $0x340] sm:$0xff] }
 0x2ac   :  { %6452 = vmatprep.subr.bf16.mxu0 %v6451_v39  ;;  %5043 = vmatmul.mubr.f32.gmra.mrb[58].mxu1 %v359_v12  ;;  %v6503_v36 = vpack.c.bf16 %v1286_v34, %v1285_v32  ;;  %v1486_v12 = vld [vmem:[#allocation7 + $0x398] sm:$0xff]  ;;  %v1589_v34 = vld [vmem:[#allocation7 + $0x400] sm:$0xff] }
 0x2ad   :  { %5045 = vmatprep.mubr.f32.mxu1 %v360_v62  ;;  %v6543_v15 = vpack.c.bf16 %v1486_v12, %v1485_v1  ;;  %v1487_v62 = vld [vmem:[#allocation7 + $0x3a0] sm:$0xff]  ;;  %v1698_v1 = vld [vmem:[#allocation7 + $0x498] sm:$0xff] }
 0x2af   :  { %6454 = vmatpush3.bf16.msra.mxu0 %v6451_v39  ;;  %v1378_v39 = vld [vmem:[#allocation7 + $0x308] sm:$0xff] }
 0x2b0   :  { %6456 = vmatprep.subr.bf16.mxu0 %v6455_v44  ;;  %v6507_v42 = vpack.c.bf16 %v1378_v39, %v1377_v38 }
 0x2b3   :  { %6458 = vmatpush3.bf16.msra.mxu0 %v6455_v44  ;;  %v1380_v44 = vld [vmem:[#allocation7 + $0x318] sm:$0xff] }
 0x2b4   :  { %6460 = vmatprep.subr.bf16.mxu0 %v6459_v46  ;;  %v6511_v4 = vpack.c.bf16 %v1380_v44, %v1379_v43  ;;  %v1592_v43 = vld [vmem:[#allocation7 + $0x418] sm:$0xff] }
 0x2b7   :  { %6462 = vmatpush3.bf16.msra.mxu0 %v6459_v46  ;;  %v1382_v46 = vld [vmem:[#allocation7 + $0x328] sm:$0xff] }
 0x2b8   :  { %6464 = vmatprep.subr.bf16.mxu0 %v6463_v51  ;;  %v6515_v47 = vpack.c.bf16 %v1382_v46, %v1381_v11  ;;  %v1593_v46 = vld [vmem:[#allocation7 + $0x420] sm:$0xff] }
 0x2bb   :  { %6466 = vmatpush3.bf16.msra.mxu0 %v6463_v51  ;;  %v1384_v51 = vld [vmem:[#allocation7 + $0x338] sm:$0xff] }
 0x2bc   :  { %6468 = vmatprep.subr.bf16.mxu0 %v6467_v16  ;;  %v6519_v9 = vpack.c.bf16 %v1384_v51, %v1383_v49  ;;  %v1595_v51 = vld [vmem:[#allocation7 + $0x430] sm:$0xff] }
 0x2bf   :  { %6470 = vmatpush3.bf16.msra.mxu0 %v6467_v16  ;;  %v1386_v16 = vld [vmem:[#allocation7 + $0x348] sm:$0xff] }
 0x2c0   :  { %6472 = vmatprep.subr.bf16.mxu0 %v6471_v57  ;;  %v6523_v53 = vpack.c.bf16 %v1386_v16, %v1385_v52  ;;  %v1597_v16 = vld [vmem:[#allocation7 + $0x440] sm:$0xff] }
 0x2c3   :  { %6474 = vmatpush3.bf16.msra.mxu0 %v6471_v57  ;;  %v1389_v57 = vld [vmem:[#allocation7 + $0x360] sm:$0xff] }
 0x2c4   :  { %6476 = vmatprep.subr.bf16.mxu0 %v6475_v0 }
 0x2c6   :  { %5236 = vmatmul.mubr.f32.vlgmr.msra.gmra.mrb[16].mxu0 %v7682_v14  ;;  %v361_v14 = vld [vmem:[#allocation5 + $0x1e8] sm:$0xff] }
 0x2c7   :  { %6478 = vmatpush3.bf16.msra.mxu0 %v6475_v0  ;;  %5238 = vmatprep.mubr.f32.mxu0 %v7688_v21  ;;  %v1280_v21 = vld [vmem:[#allocation7 + $0x2c8] sm:$0xff]  ;;  %v1392_v0 = vld [vmem:[#allocation7 + $0x378] sm:$0xff] }
 0x2c8   :  { %6480 = vmatprep.subr.bf16.mxu0 %v6479_v7  ;;  %5046 = vmatmul.mubr.f32.gmra.mrb[60].mxu1 %v361_v14  ;;  %v6491_v20 = vpack.c.bf16 %v1280_v21, %v1279_v6  ;;  %v1489_v6 = vld [vmem:[#allocation7 + $0x3b0] sm:$0xff]  ;;  %v1490_v21 = vld [vmem:[#allocation7 + $0x3b8] sm:$0xff] }
 0x2c9   :  { %5048 = vmatprep.mubr.f32.mxu1 %v362_v22  ;;  %v1491_v22 = vld [vmem:[#allocation7 + $0x3c0] sm:$0xff] }
 0x2ca   :  { %5239 = vmatmul.mubr.f32.gmra.mrb[18].mxu0 %v7686_v19  ;;  %v6495_v19 = vpack.c.bf16 %v1282_v25, %v1281_v23  ;;  %v1492_v23 = vld [vmem:[#allocation7 + $0x3c8] sm:$0xff] }
 0x2cb   :  { %6482 = vmatpush3.bf16.msra.mxu0 %v6479_v7  ;;  %5273 = vmatprep.mubr.f32.mxu0 %v7692_v26  ;;  %v1283_v26 = vld [vmem:[#allocation7 + $0x2e0] sm:$0xff]  ;;  %v1484_v7 = vld [vmem:[#allocation7 + $0x388] sm:$0xff]  ;;  %v6555_v25 = vpack.c.bf16 %v1492_v23, %v1491_v22 }
 0x2cc   :  { %6484 = vmatprep.subr.bf16.mxu0 %v6483_v13  ;;  %5049 = vmatmul.mubr.f32.gmra.mrb[62].mxu1 %v363_v27  ;;  %v6499_v31 = vpack.c.bf16 %v1284_v30, %v1283_v26  ;;  %v6539_v10 = vpack.c.bf16 %v1484_v7, %v1483_v3  ;;  %v1494_v27 = vld [vmem:[#allocation7 + $0x3d8] sm:$0xff]  ;;  %v1496_v26 = vld [vmem:[#allocation7 + $0x3e8] sm:$0xff]  ;;  %v1497_v30 = vld [vmem:[#allocation7 + $0x3f0] sm:$0xff] }
 0x2cd   :  { %v1703_v23 = vld [vmem:[#allocation7 + $0x4c0] sm:$0xff] }
 0x2cf   :  { %6486 = vmatpush3.bf16.msra.mxu0 %v6483_v13  ;;  %v7749_v13 = vpop.f32.mrb[40].mxu1 }
 0x2d0   :  { %6488 = vmatprep.subr.bf16.mxu0 %v6487_v18  ;;  %v7751_v17 = vpop.f32.mrb[41].mxu1 }
 0x2d1   :  { %v7757_v32 = vpop.f32.mrb[42].mxu1 }
 0x2d2   :  { %v7759_v38 = vpop.f32.mrb[43].mxu1 }
 0x2d3   :  { %6490 = vmatpush3.bf16.msra.mxu0 %v6487_v18  ;;  %v1488_v18 = vld [vmem:[#allocation7 + $0x3a8] sm:$0xff]  ;;  %v7761_v44 = vpop.f32.mrb[44].mxu1 }
 0x2d4   :  { %6492 = vmatprep.subr.bf16.mxu0 %v6491_v20  ;;  %v6547_v14 = vpack.c.bf16 %v1488_v18, %v1487_v62  ;;  %v7763_v11 = vpop.f32.mrb[45].mxu1  ;;  %v1699_v18 = vld [vmem:[#allocation7 + $0x4a0] sm:$0xff] }
 0x2d7   :  { %6494 = vmatpush3.bf16.msra.mxu0 %v6491_v20  ;;  %v6551_v20 = vpack.c.bf16 %v1490_v21, %v1489_v6  ;;  %v1701_v21 = vld [vmem:[#allocation7 + $0x4b0] sm:$0xff] }
 0x2d8   :  { %6496 = vmatprep.subr.bf16.mxu0 %v6495_v19 }
 0x2db   :  { %6498 = vmatpush3.bf16.msra.mxu0 %v6495_v19  ;;  %v1495_v19 = vld [vmem:[#allocation7 + $0x3e0] sm:$0xff] }
 0x2dc   :  { %6500 = vmatprep.subr.bf16.mxu0 %v6499_v31 }
 0x2df   :  { %6502 = vmatpush3.bf16.msra.mxu0 %v6499_v31  ;;  %v1498_v31 = vld [vmem:[#allocation7 + $0x3f8] sm:$0xff] }
 0x2e0   :  { %6504 = vmatprep.subr.bf16.mxu0 %v6503_v36 }
 0x2e3   :  { %6506 = vmatpush3.bf16.msra.mxu0 %v6503_v36  ;;  %v1590_v36 = vld [vmem:[#allocation7 + $0x408] sm:$0xff] }
 0x2e4   :  { %6508 = vmatprep.subr.bf16.mxu0 %v6507_v42  ;;  %v6571_v39 = vpack.c.bf16 %v1590_v36, %v1589_v34 }
 0x2e6   :  { %5274 = vmatmul.mubr.f32.vlgmr.msra.gmra.mrb[16].mxu0 %v7690_v24  ;;  %v1387_v24 = vld [vmem:[#allocation7 + $0x350] sm:$0xff] }
 0x2e7   :  { %6510 = vmatpush3.bf16.msra.mxu0 %v6507_v42  ;;  %5276 = vmatprep.mubr.f32.mxu0 %v7699_v50  ;;  %v6527_v50 = vpack.c.bf16 %v1388_v55, %v1387_v24  ;;  %v1591_v42 = vld [vmem:[#allocation7 + $0x410] sm:$0xff]  ;;  %v1600_v55 = vld [vmem:[#allocation7 + $0x458] sm:$0xff] }
 0x2e8   :  { %6512 = vmatprep.subr.bf16.mxu0 %v6511_v4 }
 0x2ea   :  { %5277 = vmatmul.mubr.f32.gmra.mrb[18].mxu0 %v7697_v48  ;;  %v6531_v48 = vpack.c.bf16 %v1390_v59, %v1389_v57  ;;  %v1602_v57 = vld [vmem:[#allocation7 + $0x468] sm:$0xff]  ;;  %v1603_v59 = vld [vmem:[#allocation7 + $0x470] sm:$0xff] }
 0x2eb   :  { %6514 = vmatpush3.bf16.msra.mxu0 %v6511_v4  ;;  %5311 = vmatprep.mubr.f32.mxu0 %v7703_v58  ;;  %v6535_v58 = vpack.c.bf16 %v1392_v0, %v1391_v60  ;;  %v6575_v4 = vpack.c.bf16 %v1592_v43, %v1591_v42  ;;  %v7769_v60 = vpop.f32.mrb[46].mxu1  ;;  %v1695_v0 = vld [vmem:[#allocation7 + $0x480] sm:$0xff]  ;;  %v1804_v42 = vld [vmem:[#allocation7 + $0x518] sm:$0xff] }
 0x2ec   :  { %6516 = vmatprep.subr.bf16.mxu0 %v6515_v47  ;;  %v7771_v3 = vpop.f32.mrb[47].mxu1 }
 0x2ef   :  { %6518 = vmatpush3.bf16.msra.mxu0 %v6515_v47  ;;  %v1594_v47 = vld [vmem:[#allocation7 + $0x428] sm:$0xff] }
 0x2f0   :  { %6520 = vmatprep.subr.bf16.mxu0 %v6519_v9  ;;  %v6579_v49 = vpack.c.bf16 %v1594_v47, %v1593_v46  ;;  %v1805_v47 = vld [vmem:[#allocation7 + $0x520] sm:$0xff] }
 0x2f3   :  { %6522 = vmatpush3.bf16.msra.mxu0 %v6519_v9  ;;  %v1596_v9 = vld [vmem:[#allocation7 + $0x438] sm:$0xff] }
 0x2f4   :  { %6524 = vmatprep.subr.bf16.mxu0 %v6523_v53  ;;  %v6583_v52 = vpack.c.bf16 %v1596_v9, %v1595_v51  ;;  %v1807_v9 = vld [vmem:[#allocation7 + $0x530] sm:$0xff] }
 0x2f7   :  { %6526 = vmatpush3.bf16.msra.mxu0 %v6523_v53  ;;  %v1598_v53 = vld [vmem:[#allocation7 + $0x448] sm:$0xff] }
 0x2f8   :  { %6528 = vmatprep.subr.bf16.mxu0 %v6527_v50  ;;  %v6587_v24 = vpack.c.bf16 %v1598_v53, %v1597_v16  ;;  %v1809_v53 = vld [vmem:[#allocation7 + $0x540] sm:$0xff] }
 0x2fb   :  { %6530 = vmatpush3.bf16.msra.mxu0 %v6527_v50  ;;  %v1601_v50 = vld [vmem:[#allocation7 + $0x460] sm:$0xff] }
 0x2fc   :  { %6532 = vmatprep.subr.bf16.mxu0 %v6531_v48 }
 0x2ff   :  { %6534 = vmatpush3.bf16.msra.mxu0 %v6531_v48  ;;  %v1604_v48 = vld [vmem:[#allocation7 + $0x478] sm:$0xff] }
 0x300   :  { %6536 = vmatprep.subr.bf16.mxu0 %v6535_v58 }
 0x303   :  { %6538 = vmatpush3.bf16.msra.mxu0 %v6535_v58  ;;  %v1696_v58 = vld [vmem:[#allocation7 + $0x488] sm:$0xff] }
 0x304   :  { %6540 = vmatprep.subr.bf16.mxu0 %v6539_v10  ;;  %v6603_v7 = vpack.c.bf16 %v1696_v58, %v1695_v0 }
 0x306   :  { %5312 = vmatmul.mubr.f32.vlgmr.msra.gmra.mrb[16].mxu0 %v7701_v54  ;;  %v1493_v54 = vld [vmem:[#allocation7 + $0x3d0] sm:$0xff] }
 0x307   :  { %6542 = vmatpush3.bf16.msra.mxu0 %v6539_v10  ;;  %5314 = vmatprep.mubr.f32.mxu0 %v7711_v29  ;;  %v6559_v29 = vpack.c.bf16 %v1494_v27, %v1493_v54  ;;  %v1697_v10 = vld [vmem:[#allocation7 + $0x490] sm:$0xff]  ;;  %v1706_v27 = vld [vmem:[#allocation7 + $0x4d8] sm:$0xff] }
 0x308   :  { %6544 = vmatprep.subr.bf16.mxu0 %v6543_v15 }
 0x30a   :  { %5315 = vmatmul.mubr.f32.gmra.mrb[18].mxu0 %v7709_v28  ;;  %v6563_v28 = vpack.c.bf16 %v1496_v26, %v1495_v19  ;;  %v1708_v19 = vld [vmem:[#allocation7 + $0x4e8] sm:$0xff]  ;;  %v1709_v26 = vld [vmem:[#allocation7 + $0x4f0] sm:$0xff] }
 0x30b   :  { %6546 = vmatpush3.bf16.msra.mxu0 %v6543_v15  ;;  %5349 = vmatprep.mubr.f32.mxu0 %v7715_v35  ;;  %v6567_v35 = vpack.c.bf16 %v1498_v31, %v1497_v30  ;;  %v6607_v15 = vpack.c.bf16 %v1698_v1, %v1697_v10  ;;  %v1801_v31 = vld [vmem:[#allocation7 + $0x500] sm:$0xff]  ;;  %v1910_v10 = vld [vmem:[#allocation7 + $0x598] sm:$0xff] }
 0x30c   :  { %6548 = vmatprep.subr.bf16.mxu0 %v6547_v14 }
 0x30f   :  { %6550 = vmatpush3.bf16.msra.mxu0 %v6547_v14  ;;  %v1700_v14 = vld [vmem:[#allocation7 + $0x4a8] sm:$0xff] }
 0x310   :  { %6552 = vmatprep.subr.bf16.mxu0 %v6551_v20  ;;  %v6611_v6 = vpack.c.bf16 %v1700_v14, %v1699_v18  ;;  %v1911_v14 = vld [vmem:[#allocation7 + $0x5a0] sm:$0xff] }
 0x313   :  { %6554 = vmatpush3.bf16.msra.mxu0 %v6551_v20  ;;  %v1702_v20 = vld [vmem:[#allocation7 + $0x4b8] sm:$0xff] }
 0x314   :  { %6556 = vmatprep.subr.bf16.mxu0 %v6555_v25  ;;  %v6615_v22 = vpack.c.bf16 %v1702_v20, %v1701_v21  ;;  %v1913_v20 = vld [vmem:[#allocation7 + $0x5b0] sm:$0xff] }
 0x317   :  { %6558 = vmatpush3.bf16.msra.mxu0 %v6555_v25  ;;  %v1704_v25 = vld [vmem:[#allocation7 + $0x4c8] sm:$0xff] }
 0x318   :  { %6560 = vmatprep.subr.bf16.mxu0 %v6559_v29  ;;  %v6619_v54 = vpack.c.bf16 %v1704_v25, %v1703_v23  ;;  %v1915_v25 = vld [vmem:[#allocation7 + $0x5c0] sm:$0xff] }
 0x31b   :  { %6562 = vmatpush3.bf16.msra.mxu0 %v6559_v29  ;;  %v1707_v29 = vld [vmem:[#allocation7 + $0x4e0] sm:$0xff] }
 0x31c   :  { %6564 = vmatprep.subr.bf16.mxu0 %v6563_v28 }
 0x31f   :  { %6566 = vmatpush3.bf16.msra.mxu0 %v6563_v28  ;;  %v1710_v28 = vld [vmem:[#allocation7 + $0x4f8] sm:$0xff] }
 0x320   :  { %6568 = vmatprep.subr.bf16.mxu0 %v6567_v35 }
 0x323   :  { %6570 = vmatpush3.bf16.msra.mxu0 %v6567_v35  ;;  %v1802_v35 = vld [vmem:[#allocation7 + $0x508] sm:$0xff] }
 0x324   :  { %6572 = vmatprep.subr.bf16.mxu0 %v6571_v39  ;;  %v6635_v36 = vpack.c.bf16 %v1802_v35, %v1801_v31 }
 0x326   :  { %5350 = vmatmul.mubr.f32.vlgmr.msra.gmra.mrb[16].mxu0 %v7713_v33  ;;  %v1599_v33 = vld [vmem:[#allocation7 + $0x450] sm:$0xff] }
 0x327   :  { %6574 = vmatpush3.bf16.msra.mxu0 %v6571_v39  ;;  %5352 = vmatprep.mubr.f32.mxu0 %v7723_v63  ;;  %v6591_v63 = vpack.c.bf16 %v1600_v55, %v1599_v33  ;;  %v1803_v39 = vld [vmem:[#allocation7 + $0x510] sm:$0xff]  ;;  %v1812_v55 = vld [vmem:[#allocation7 + $0x558] sm:$0xff] }
 0x328   :  { %6576 = vmatprep.subr.bf16.mxu0 %v6575_v4 }
 0x32a   :  { %5353 = vmatmul.mubr.f32.gmra.mrb[18].mxu0 %v7721_v61  ;;  %v6595_v61 = vpack.c.bf16 %v1602_v57, %v1601_v50  ;;  %v1814_v50 = vld [vmem:[#allocation7 + $0x568] sm:$0xff]  ;;  %v1815_v57 = vld [vmem:[#allocation7 + $0x570] sm:$0xff] }
 0x32b   :  { %6578 = vmatpush3.bf16.msra.mxu0 %v6575_v4  ;;  %5387 = vmatprep.mubr.f32.mxu0 %v7727_v8  ;;  %v6599_v8 = vpack.c.bf16 %v1604_v48, %v1603_v59  ;;  %v6639_v4 = vpack.c.bf16 %v1804_v42, %v1803_v39  ;;  %v1907_v48 = vld [vmem:[#allocation7 + $0x580] sm:$0xff]  ;;  %v2015_v39 = vld [vmem:[#allocation7 + $0x610] sm:$0xff]  ;;  %v2016_v42 = vld [vmem:[#allocation7 + $0x618] sm:$0xff] }
 0x32c   :  { %6580 = vmatprep.subr.bf16.mxu0 %v6579_v49 }
 0x32f   :  { %6582 = vmatpush3.bf16.msra.mxu0 %v6579_v49  ;;  %v1806_v49 = vld [vmem:[#allocation7 + $0x528] sm:$0xff] }
 0x330   :  { %6584 = vmatprep.subr.bf16.mxu0 %v6583_v52  ;;  %v6643_v51 = vpack.c.bf16 %v1806_v49, %v1805_v47  ;;  %v6703_v47 = vpack.c.bf16 %v2016_v42, %v2015_v39  ;;  %v2017_v49 = vld [vmem:[#allocation7 + $0x620] sm:$0xff]  ;;  %v2231_v42 = vld [vmem:[#allocation7 + $0x730] sm:$0xff] }
 0x333   :  { %6586 = vmatpush3.bf16.msra.mxu0 %v6583_v52  ;;  %v1808_v52 = vld [vmem:[#allocation7 + $0x538] sm:$0xff] }
 0x334   :  { %6588 = vmatprep.subr.bf16.mxu0 %v6587_v24  ;;  %v6647_v16 = vpack.c.bf16 %v1808_v52, %v1807_v9 }
 0x337   :  { %6590 = vmatpush3.bf16.msra.mxu0 %v6587_v24  ;;  %v1810_v24 = vld [vmem:[#allocation7 + $0x548] sm:$0xff] }
 0x338   :  { %6592 = vmatprep.subr.bf16.mxu0 %v6591_v63  ;;  %v6651_v33 = vpack.c.bf16 %v1810_v24, %v1809_v53  ;;  %v2019_v53 = vld [vmem:[#allocation7 + $0x630] sm:$0xff]  ;;  %v2020_v24 = vld [vmem:[#allocation7 + $0x638] sm:$0xff] }
 0x33b   :  { %6594 = vmatpush3.bf16.msra.mxu0 %v6591_v63  ;;  %v7773_v12 = vpop.f32.mrb[48].mxu1  ;;  %v1813_v63 = vld [vmem:[#allocation7 + $0x560] sm:$0xff] }
 0x33c   :  { %6596 = vmatprep.subr.bf16.mxu0 %v6595_v61  ;;  %v7775_v62 = vpop.f32.mrb[49].mxu1 }
 0x33f   :  { %6598 = vmatpush3.bf16.msra.mxu0 %v6595_v61  ;;  %v7781_v30 = vpop.f32.mrb[50].mxu1  ;;  %v1816_v61 = vld [vmem:[#allocation7 + $0x578] sm:$0xff] }
 0x340   :  { %6600 = vmatprep.subr.bf16.mxu0 %v6599_v8  ;;  %v7783_v34 = vpop.f32.mrb[51].mxu1 }
 0x343   :  { %6602 = vmatpush3.bf16.msra.mxu0 %v6599_v8  ;;  %v1908_v8 = vld [vmem:[#allocation7 + $0x588] sm:$0xff] }
 0x344   :  { %6604 = vmatprep.subr.bf16.mxu0 %v6603_v7  ;;  %v6667_v58 = vpack.c.bf16 %v1908_v8, %v1907_v48  ;;  %v2120_v48 = vld [vmem:[#allocation7 + $0x688] sm:$0xff] }
 0x346   :  { %5388 = vmatmul.mubr.f32.vlgmr.msra.gmra.mrb[16].mxu0 %v7725_v5  ;;  %v1705_v5 = vld [vmem:[#allocation7 + $0x4d0] sm:$0xff] }
 0x347   :  { %6606 = vmatpush3.bf16.msra.mxu0 %v6603_v7  ;;  %5390 = vmatprep.mubr.f32.mxu0 %v7735_v41  ;;  %v6623_v41 = vpack.c.bf16 %v1706_v27, %v1705_v5  ;;  %v1909_v7 = vld [vmem:[#allocation7 + $0x590] sm:$0xff]  ;;  %v1918_v27 = vld [vmem:[#allocation7 + $0x5d8] sm:$0xff] }
 0x348   :  { %6608 = vmatprep.subr.bf16.mxu0 %v6607_v15 }
 0x34a   :  { %5391 = vmatmul.mubr.f32.gmra.mrb[18].mxu0 %v7733_v37  ;;  %v6627_v37 = vpack.c.bf16 %v1708_v19, %v1707_v29  ;;  %v1920_v29 = vld [vmem:[#allocation7 + $0x5e8] sm:$0xff]  ;;  %v1921_v19 = vld [vmem:[#allocation7 + $0x5f0] sm:$0xff] }
 0x34b   :  { %6610 = vmatpush3.bf16.msra.mxu0 %v6607_v15  ;;  %5425 = vmatprep.mubr.f32.mxu0 %v7739_v45  ;;  %v6631_v45 = vpack.c.bf16 %v1710_v28, %v1709_v26  ;;  %v6671_v15 = vpack.c.bf16 %v1910_v10, %v1909_v7  ;;  %v2013_v28 = vld [vmem:[#allocation7 + $0x600] sm:$0xff]  ;;  %v2122_v7 = vld [vmem:[#allocation7 + $0x698] sm:$0xff] }
 0x34c   :  { %6612 = vmatprep.subr.bf16.mxu0 %v6611_v6 }
 0x34f   :  { %6614 = vmatpush3.bf16.msra.mxu0 %v6611_v6  ;;  %v1912_v6 = vld [vmem:[#allocation7 + $0x5a8] sm:$0xff] }
 0x350   :  { %6616 = vmatprep.subr.bf16.mxu0 %v6615_v22  ;;  %v6675_v21 = vpack.c.bf16 %v1912_v6, %v1911_v14  ;;  %v2124_v14 = vld [vmem:[#allocation7 + $0x6a8] sm:$0xff] }
 0x353   :  { %6618 = vmatpush3.bf16.msra.mxu0 %v6615_v22  ;;  %v1914_v22 = vld [vmem:[#allocation7 + $0x5b8] sm:$0xff] }
 0x354   :  { %6620 = vmatprep.subr.bf16.mxu0 %v6619_v54  ;;  %v6679_v23 = vpack.c.bf16 %v1914_v22, %v1913_v20  ;;  %v2126_v20 = vld [vmem:[#allocation7 + $0x6b8] sm:$0xff] }
 0x357   :  { %6622 = vmatpush3.bf16.msra.mxu0 %v6619_v54  ;;  %v1916_v54 = vld [vmem:[#allocation7 + $0x5c8] sm:$0xff] }
 0x358   :  { %6624 = vmatprep.subr.bf16.mxu0 %v6623_v41  ;;  %v6683_v5 = vpack.c.bf16 %v1916_v54, %v1915_v25  ;;  %v2128_v25 = vld [vmem:[#allocation7 + $0x6c8] sm:$0xff] }
 0x35b   :  { %6626 = vmatpush3.bf16.msra.mxu0 %v6623_v41  ;;  %v7785_v43 = vpop.f32.mrb[52].mxu1  ;;  %v1919_v41 = vld [vmem:[#allocation7 + $0x5e0] sm:$0xff] }
 0x35c   :  { %6628 = vmatprep.subr.bf16.mxu0 %v6627_v37  ;;  %v7787_v46 = vpop.f32.mrb[53].mxu1 }
 0x35f   :  { %6630 = vmatpush3.bf16.msra.mxu0 %v6627_v37  ;;  %v7793_v59 = vpop.f32.mrb[54].mxu1  ;;  %v1922_v37 = vld [vmem:[#allocation7 + $0x5f8] sm:$0xff] }
 0x360   :  { %6632 = vmatprep.subr.bf16.mxu0 %v6631_v45  ;;  %v7795_v0 = vpop.f32.mrb[55].mxu1 }
 0x363   :  { %6634 = vmatpush3.bf16.msra.mxu0 %v6631_v45  ;;  %v2014_v45 = vld [vmem:[#allocation7 + $0x608] sm:$0xff] }
 0x364   :  { %6636 = vmatprep.subr.bf16.mxu0 %v6635_v36  ;;  %v6699_v35 = vpack.c.bf16 %v2014_v45, %v2013_v28  ;;  %v2229_v45 = vld [vmem:[#allocation7 + $0x720] sm:$0xff] }
 0x366   :  { %5426 = vmatmul.mubr.f32.vlgmr.msra.gmra.mrb[16].mxu0 %v7737_v40  ;;  %v1811_v40 = vld [vmem:[#allocation7 + $0x550] sm:$0xff] }
 0x367   :  { %6638 = vmatpush3.bf16.msra.mxu0 %v6635_v36  ;;  %5428 = vmatprep.mubr.f32.mxu0 %v7747_v56  ;;  %v6655_v56 = vpack.c.bf16 %v1812_v55, %v1811_v40  ;;  %v2021_v40 = vld [vmem:[#allocation7 + $0x640] sm:$0xff] }
 0x368   :  { %6640 = vmatprep.subr.bf16.mxu0 %v6639_v4 }
 0x36a   :  { %5429 = vmatmul.mubr.f32.gmra.mrb[18].mxu0 %v7745_v2  ;;  %v6659_v2 = vpack.c.bf16 %v1814_v50, %v1813_v63  ;;  %v2025_v50 = vld [vmem:[#allocation7 + $0x660] sm:$0xff] }
 0x36b   :  { %6642 = vmatpush3.bf16.msra.mxu0 %v6639_v4  ;;  %5463 = vmatprep.mubr.f32.mxu0 %v7751_v17  ;;  %v6663_v17 = vpack.c.bf16 %v1816_v61, %v1815_v57  ;;  %v2027_v57 = vld [vmem:[#allocation7 + $0x670] sm:$0xff]  ;;  %v2028_v61 = vld [vmem:[#allocation7 + $0x678] sm:$0xff] }
 0x36c   :  { %6644 = vmatprep.subr.bf16.mxu0 %v6643_v51 }
 0x36f   :  { %6646 = vmatpush3.bf16.msra.mxu0 %v6643_v51  ;;  %v2018_v51 = vld [vmem:[#allocation7 + $0x628] sm:$0xff] }
 0x370   :  { %6648 = vmatprep.subr.bf16.mxu0 %v6647_v16 }
 0x373   :  { %6650 = vmatpush3.bf16.msra.mxu0 %v6647_v16  ;;  %v6707_v16 = vpack.c.bf16 %v2018_v51, %v2017_v49  ;;  %v2233_v51 = vld [vmem:[#allocation7 + $0x740] sm:$0xff] }
 0x374   :  { %6652 = vmatprep.subr.bf16.mxu0 %v6651_v33 }
 0x377   :  { %6654 = vmatpush3.bf16.msra.mxu0 %v6651_v33  ;;  %v6711_v33 = vpack.c.bf16 %v2020_v24, %v2019_v53  ;;  %v2236_v24 = vld [vmem:[#allocation7 + $0x758] sm:$0xff] }
 0x378   :  { %6656 = vmatprep.subr.bf16.mxu0 %v6655_v56 }
 0x37b   :  { %6658 = vmatpush3.bf16.msra.mxu0 %v6655_v56  ;;  %v7797_v1 = vpop.f32.mrb[56].mxu1  ;;  %v2023_v56 = vld [vmem:[#allocation7 + $0x650] sm:$0xff] }
 0x37c   :  { %6660 = vmatprep.subr.bf16.mxu0 %v6659_v2  ;;  %v7799_v18 = vpop.f32.mrb[57].mxu1 }
 0x37f   :  { %6662 = vmatpush3.bf16.msra.mxu0 %v6659_v2  ;;  %v7805_v26 = vpop.f32.mrb[58].mxu1  ;;  %v2026_v2 = vld [vmem:[#allocation7 + $0x668] sm:$0xff] }
 0x380   :  { %6664 = vmatprep.subr.bf16.mxu0 %v6663_v17  ;;  %v7807_v31 = vpop.f32.mrb[59].mxu1 }
 0x383   :  { %6666 = vmatpush3.bf16.msra.mxu0 %v6663_v17  ;;  %v2119_v17 = vld [vmem:[#allocation7 + $0x680] sm:$0xff] }
 0x384   :  { %6668 = vmatprep.subr.bf16.mxu0 %v6667_v58  ;;  %v6731_v8 = vpack.c.bf16 %v2120_v48, %v2119_v17  ;;  %v2337_v17 = vld [vmem:[#allocation7 + $0x7b0] sm:$0xff]  ;;  %v2338_v48 = vld [vmem:[#allocation7 + $0x7b8] sm:$0xff] }
 0x386   :  { %5464 = vmatmul.mubr.f32.vlgmr.msra.gmra.mrb[16].mxu0 %v7749_v13  ;;  %v1917_v13 = vld [vmem:[#allocation7 + $0x5d0] sm:$0xff] }
 0x387   :  { %6670 = vmatpush3.bf16.msra.mxu0 %v6667_v58  ;;  %5466 = vmatprep.mubr.f32.mxu0 %v7759_v38  ;;  %v6687_v38 = vpack.c.bf16 %v1918_v27, %v1917_v13  ;;  %v2121_v58 = vld [vmem:[#allocation7 + $0x690] sm:$0xff]  ;;  %v2131_v13 = vld [vmem:[#allocation7 + $0x6e0] sm:$0xff]  ;;  %v2132_v27 = vld [vmem:[#allocation7 + $0x6e8] sm:$0xff] }
 0x388   :  { %6672 = vmatprep.subr.bf16.mxu0 %v6671_v15  ;;  %v6735_v10 = vpack.c.bf16 %v2122_v7, %v2121_v58  ;;  %v2339_v58 = vld [vmem:[#allocation7 + $0x7c0] sm:$0xff]  ;;  %v2340_v7 = vld [vmem:[#allocation7 + $0x7c8] sm:$0xff] }
 0x38a   :  { %5467 = vmatmul.mubr.f32.gmra.mrb[18].mxu0 %v7757_v32  ;;  %v6691_v32 = vpack.c.bf16 %v1920_v29, %v1919_v41  ;;  %v2134_v41 = vld [vmem:[#allocation7 + $0x6f8] sm:$0xff]  ;;  %v2225_v29 = vld [vmem:[#allocation7 + $0x700] sm:$0xff] }
 0x38b   :  { %6674 = vmatpush3.bf16.msra.mxu0 %v6671_v15  ;;  %5501 = vmatprep.mubr.f32.mxu0 %v7763_v11  ;;  %v6695_v11 = vpack.c.bf16 %v1922_v37, %v1921_v19  ;;  %v2123_v15 = vld [vmem:[#allocation7 + $0x6a0] sm:$0xff]  ;;  %v2227_v37 = vld [vmem:[#allocation7 + $0x710] sm:$0xff] }
 0x38c   :  { %6676 = vmatprep.subr.bf16.mxu0 %v6675_v21  ;;  %v6739_v6 = vpack.c.bf16 %v2124_v14, %v2123_v15  ;;  %v2342_v15 = vld [vmem:[#allocation7 + $0x7d8] sm:$0xff]  ;;  %v2343_v14 = vld [vmem:[#allocation7 + $0x7e0] sm:$0xff] }
 0x38f   :  { %6678 = vmatpush3.bf16.msra.mxu0 %v6675_v21  ;;  %v2125_v21 = vld [vmem:[#allocation7 + $0x6b0] sm:$0xff] }
 0x390   :  { %6680 = vmatprep.subr.bf16.mxu0 %v6679_v23  ;;  %v6743_v22 = vpack.c.bf16 %v2126_v20, %v2125_v21  ;;  %v2345_v21 = vld [vmem:[#allocation7 + $0x7f0] sm:$0xff]  ;;  %v2346_v20 = vld [vmem:[#allocation7 + $0x7f8] sm:$0xff] }
 0x393   :  { %6682 = vmatpush3.bf16.msra.mxu0 %v6679_v23  ;;  %v2127_v23 = vld [vmem:[#allocation7 + $0x6c0] sm:$0xff] }
 0x394   :  { %6684 = vmatprep.subr.bf16.mxu0 %v6683_v5  ;;  %v6747_v54 = vpack.c.bf16 %v2128_v25, %v2127_v23  ;;  %v7463_v23 = vmov 0.0|0.0   ;;  %v4125_v25 = vld [vmem:[%s8159_s6 + $0x1] ss:$0 sm:$0xff] }
 0x397   :  { %6686 = vmatpush3.bf16.msra.mxu0 %v6683_v5  ;;  %v2130_v5 = vld [vmem:[#allocation7 + $0x6d8] sm:$0xff] }
 0x398   :  { %6688 = vmatprep.subr.bf16.mxu0 %v6687_v38 }
 0x39b   :  { %6690 = vmatpush3.bf16.msra.mxu0 %v6687_v38  ;;  %v7809_v36 = vpop.f32.mrb[60].mxu1  ;;  %v2133_v38 = vld [vmem:[#allocation7 + $0x6f0] sm:$0xff] }
 0x39c   :  { %6692 = vmatprep.subr.bf16.mxu0 %v6691_v32  ;;  %v7811_v4 = vpop.f32.mrb[61].mxu1 }
 0x39f   :  { %6694 = vmatpush3.bf16.msra.mxu0 %v6691_v32  ;;  %v7814_v9 = vpop.f32.mrb[62].mxu1  ;;  %v2226_v32 = vld [vmem:[#allocation7 + $0x708] sm:$0xff] }
 0x3a0   :  { %6696 = vmatprep.subr.bf16.mxu0 %v6695_v11  ;;  %v7817_v52 = vpop.f32.mrb[63].mxu1  ;;  %v6763_v19 = vpack.c.bf16 %v2226_v32, %v2225_v29  ;;  %v2680_v32 = vld [vmem:[#allocation8 + $0x80] sm:$0xff] }
 0x3a3   :  { %6698 = vmatpush3.bf16.msra.mxu0 %v6695_v11  ;;  %v2228_v11 = vld [vmem:[#allocation7 + $0x718] sm:$0xff] }
 0x3a4   :  { %6700 = vmatprep.subr.bf16.mxu0 %v6699_v35  ;;  %v6767_v28 = vpack.c.bf16 %v2228_v11, %v2227_v37  ;;  %v2454_v37 = vld [vmem:[%s8157_s4 + $0x8] sm:$0xff] }
 0x3a6   :  { %5502 = vmatmul.mubr.f32.vlgmr.msra.gmra.mrb[16].mxu0 %v7761_v44  ;;  %v2022_v44 = vld [vmem:[#allocation7 + $0x648] sm:$0xff] }
 0x3a7   :  { %6702 = vmatpush3.bf16.msra.mxu0 %v6699_v35  ;;  %5504 = vmatprep.mubr.f32.mxu0 %v7771_v3  ;;  %v6715_v55 = vpack.c.bf16 %v2022_v44, %v2021_v40  ;;  %v2024_v3 = vld [vmem:[#allocation7 + $0x658] sm:$0xff]  ;;  %v2230_v35 = vld [vmem:[#allocation7 + $0x728] sm:$0xff]  ;;  %v2239_v44 = vld [vmem:[#allocation7 + $0x770] sm:$0xff] }
 0x3a8   :  { %6704 = vmatprep.subr.bf16.mxu0 %v6703_v47  ;;  %v6719_v63 = vpack.c.bf16 %v2024_v3, %v2023_v56  ;;  %v6771_v39 = vpack.c.bf16 %v2230_v35, %v2229_v45  ;;  %v2238_v40 = vld [vmem:[#allocation7 + $0x768] sm:$0xff]  ;;  %v2331_v56 = vld [vmem:[#allocation7 + $0x780] sm:$0xff]  ;;  %v2682_v45 = vld [vmem:[#allocation8 + $0x90] sm:$0xff] }
 0x3a9   :  { %v2332_v3 = vld [vmem:[#allocation7 + $0x788] sm:$0xff]  ;;  %v2683_v35 = vld [vmem:[#allocation8 + $0x98] sm:$0xff] }
 0x3aa   :  { %5505 = vmatmul.mubr.f32.gmra.mrb[18].mxu0 %v7769_v60  ;;  %v6723_v60 = vpack.c.bf16 %v2026_v2, %v2025_v50  ;;  %v2333_v50 = vld [vmem:[#allocation7 + $0x790] sm:$0xff]  ;;  %v2334_v2 = vld [vmem:[#allocation7 + $0x798] sm:$0xff] }
 0x3ab   :  { %6706 = vmatpush3.bf16.msra.mxu0 %v6703_v47  ;;  %5539 = vmatprep.mubr.f32.mxu0 %v7775_v62  ;;  %v6727_v62 = vpack.c.bf16 %v2028_v61, %v2027_v57  ;;  %v2232_v47 = vld [vmem:[#allocation7 + $0x738] sm:$0xff]  ;;  %v2335_v57 = vld [vmem:[#allocation7 + $0x7a0] sm:$0xff]  ;;  %v2336_v61 = vld [vmem:[#allocation7 + $0x7a8] sm:$0xff] }
 0x3ac   :  { %6708 = vmatprep.subr.bf16.mxu0 %v6707_v16  ;;  %v6775_v49 = vpack.c.bf16 %v2232_v47, %v2231_v42  ;;  %v6839_v42 = vpack.c.bf16 %v2683_v35, %v2682_v45  ;;  %v2457_v47 = vld [vmem:[%s8157_s4 + $0x20] sm:$0xff]  ;;  %v2676_v45 = vld [vmem:[#allocation8 + $0x68] sm:$0xff]  ;;  %v3719_v35 = vld [vmem:[#allocation8 + $0x610] sm:$0xff] }
 0x3af   :  { %6710 = vmatpush3.bf16.msra.mxu0 %v6707_v16  ;;  %v2234_v16 = vld [vmem:[#allocation7 + $0x748] sm:$0xff] }
 0x3b0   :  { %6712 = vmatprep.subr.bf16.mxu0 %v6711_v33  ;;  %v6779_v53 = vpack.c.bf16 %v2234_v16, %v2233_v51  ;;  %v2685_v51 = vld [vmem:[#allocation8 + $0xa8] sm:$0xff] }
 0x3b1   :  { %v2458_v16 = vld [vmem:[%s8157_s4 + $0x28] sm:$0xff] }
 0x3b3   :  { %6714 = vmatpush3.bf16.msra.mxu0 %v6711_v33  ;;  %v2237_v33 = vld [vmem:[#allocation7 + $0x760] sm:$0xff] }
 0x3b4   :  { %6716 = vmatprep.subr.bf16.mxu0 %v6715_v55 }
 0x3b7   :  { %6718 = vmatpush3.bf16.msra.mxu0 %v6715_v55  ;;  %v2240_v55 = vld [vmem:[#allocation7 + $0x778] sm:$0xff] }
 0x3b8   :  { %6720 = vmatprep.subr.bf16.mxu0 %v6719_v63 }
 0x3bb   :  { %6722 = vmatpush3.bf16.msra.mxu0 %v6719_v63  ;;  %v6795_v63 = vpack.c.bf16 %v2332_v3, %v2331_v56  ;;  %v2463_v3 = vld [vmem:[%s8157_s4 + $0x50] sm:$0xff] }
 0x3bc   :  { %6724 = vmatprep.subr.bf16.mxu0 %v6723_v60 }
 0x3bf   :  { %6726 = vmatpush3.bf16.msra.mxu0 %v6723_v60  ;;  %v6799_v60 = vpack.c.bf16 %v2334_v2, %v2333_v50  ;;  %v2691_v50 = vld [vmem:[#allocation8 + $0xd8] sm:$0xff] }
 0x3c0   :  { %6728 = vmatprep.subr.bf16.mxu0 %v6727_v62  ;;  %v2464_v2 = vld [vmem:[%s8157_s4 + $0x58] sm:$0xff] }
 0x3c3   :  { %6730 = vmatpush3.bf16.msra.mxu0 %v6727_v62  ;;  %v6803_v62 = vpack.c.bf16 %v2336_v61, %v2335_v57  ;;  %v2465_v57 = vld [vmem:[%s8157_s4 + $0x60] sm:$0xff] }
 0x3c4   :  { %6732 = vmatprep.subr.bf16.mxu0 %v6731_v8  ;;  %v2692_v61 = vld [vmem:[#allocation8 + $0xe0] sm:$0xff] }
 0x3c6   :  { %5540 = vmatmul.mubr.f32.vlgmr.msra.gmra.mrb[16].mxu0 %v7773_v12  ;;  %v2129_v12 = vld [vmem:[#allocation7 + $0x6d0] sm:$0xff] }
 0x3c7   :  { %6734 = vmatpush3.bf16.msra.mxu0 %v6731_v8  ;;  %5542 = vmatprep.mubr.f32.mxu0 %v7783_v34  ;;  %v6751_v34 = vpack.c.bf16 %v2130_v5, %v2129_v12  ;;  %v6807_v8 = vpack.c.bf16 %v2338_v48, %v2337_v17  ;;  %v2466_v17 = vld [vmem:[%s8157_s4 + $0x68] sm:$0xff] }
 0x3c8   :  { %6736 = vmatprep.subr.bf16.mxu0 %v6735_v10 }
 0x3ca   :  { %5543 = vmatmul.mubr.f32.gmra.mrb[18].mxu0 %v7781_v30  ;;  %v6755_v30 = vpack.c.bf16 %v2132_v27, %v2131_v13 }
 0x3cb   :  { %6738 = vmatpush3.bf16.msra.mxu0 %v6735_v10  ;;  %5577 = vmatprep.mubr.f32.mxu0 %v7787_v46  ;;  %v6759_v46 = vpack.c.bf16 %v2134_v41, %v2133_v38  ;;  %v6811_v10 = vpack.c.bf16 %v2340_v7, %v2339_v58  ;;  %v2694_v58 = vld [vmem:[#allocation8 + $0xf0] sm:$0xff]  ;;  %v2695_v7 = vld [vmem:[#allocation8 + $0xf8] sm:$0xff] }
 0x3cc   :  { %6740 = vmatprep.subr.bf16.mxu0 %v6739_v6 }
 0x3cf   :  { %6742 = vmatpush3.bf16.msra.mxu0 %v6739_v6  ;;  %v2344_v6 = vld [vmem:[#allocation7 + $0x7e8] sm:$0xff] }
 0x3d0   :  { %6744 = vmatprep.subr.bf16.mxu0 %v6743_v22 }
 0x3d3   :  { %6746 = vmatpush3.bf16.msra.mxu0 %v6743_v22  ;;  %v2453_v22 = vld [vmem:[%s8157_s4] sm:$0xff] }
 0x3d4   :  { %6748 = vmatprep.subr.bf16.mxu0 %v6747_v54  ;;  %5667 = vmatprep.mubr.msk.f32.mxu1 %vm2469_vm0, %v2453_v22 }
 0x3d7   :  { %6750 = vmatpush3.bf16.msra.mxu0 %v6747_v54 }
 0x3d8   :  { %6752 = vmatprep.subr.bf16.mxu0 %v6751_v34 }
 0x3db   :  { %6754 = vmatpush3.bf16.msra.mxu0 %v6751_v34 }
 0x3dc   :  { %6756 = vmatprep.subr.bf16.mxu0 %v6755_v30 }
 0x3df   :  { %6758 = vmatpush3.bf16.msra.mxu0 %v6755_v30 }
 0x3e0   :  { %6760 = vmatprep.subr.bf16.mxu0 %v6759_v46 }
 0x3e3   :  { %6762 = vmatpush3.bf16.msra.mxu0 %v6759_v46 }
 0x3e4   :  { %6764 = vmatprep.subr.bf16.mxu0 %v6763_v19 }
 0x3e6   :  { %5578 = vmatmul.mubr.f32.vlgmr.msra.gmra.mrb[16].mxu0 %v7785_v43  ;;  %v2235_v43 = vld [vmem:[#allocation7 + $0x750] sm:$0xff] }
 0x3e7   :  { %6766 = vmatpush3.bf16.msra.mxu0 %v6763_v19  ;;  %5580 = vmatprep.mubr.f32.mxu0 %v7795_v0  ;;  %v6783_v0 = vpack.c.bf16 %v2236_v24, %v2235_v43  ;;  %v2681_v19 = vld [vmem:[#allocation8 + $0x88] sm:$0xff]  ;;  %v2459_v43 = vld [vmem:[%s8157_s4 + $0x30] sm:$0xff] }
 0x3e8   :  { %6768 = vmatprep.subr.bf16.mxu0 %v6767_v28  ;;  %v6836_v11 = vpack.c.bf16 %v2681_v19, %v2680_v32  ;;  %v2686_v24 = vld [vmem:[#allocation8 + $0xb0] sm:$0xff]  ;;  %v3717_v32 = vld [vmem:[#allocation8 + $0x600] sm:$0xff]  ;;  %v3718_v19 = vld [vmem:[#allocation8 + $0x608] sm:$0xff] }
 0x3ea   :  { %5581 = vmatmul.mubr.f32.gmra.mrb[18].mxu0 %v7793_v59  ;;  %v6787_v59 = vpack.c.bf16 %v2238_v40, %v2237_v33  ;;  %v2460_v33 = vld [vmem:[%s8157_s4 + $0x38] sm:$0xff] }
 0x3eb   :  { %6770 = vmatpush3.bf16.msra.mxu0 %v6767_v28  ;;  %5615 = vmatprep.mubr.f32.mxu0 %v7799_v18  ;;  %v6791_v18 = vpack.c.bf16 %v2240_v55, %v2239_v44  ;;  %v2455_v28 = vld [vmem:[%s8157_s4 + $0x10] sm:$0xff]  ;;  %v2688_v44 = vld [vmem:[#allocation8 + $0xc0] sm:$0xff]  ;;  %v2689_v55 = vld [vmem:[#allocation8 + $0xc8] sm:$0xff] }
 0x3ec   :  { %6772 = vmatprep.subr.bf16.mxu0 %v6771_v39  ;;  %v6848_v56 = vpack.c.bf16 %v2689_v55, %v2688_v44 }
 0x3ef   :  { %6774 = vmatpush3.bf16.msra.mxu0 %v6771_v39  ;;  %v2456_v39 = vld [vmem:[%s8157_s4 + $0x18] sm:$0xff] }
 0x3f0   :  { %6776 = vmatprep.subr.bf16.mxu0 %v6775_v49 }
 0x3f3   :  { %6778 = vmatpush3.bf16.msra.mxu0 %v6775_v49  ;;  %v2684_v49 = vld [vmem:[#allocation8 + $0xa0] sm:$0xff] }
 0x3f4   :  { %6780 = vmatprep.subr.bf16.mxu0 %v6779_v53 }
 0x3f7   :  { %6782 = vmatpush3.bf16.msra.mxu0 %v6779_v53  ;;  %v6842_v53 = vpack.c.bf16 %v2685_v51, %v2684_v49  ;;  %v2677_v49 = vld [vmem:[#allocation8 + $0x70] sm:$0xff]  ;;  %v2678_v51 = vld [vmem:[#allocation8 + $0x78] sm:$0xff] }
 0x3f8   :  { %6784 = vmatprep.subr.bf16.mxu0 %v6783_v0 }
 0x3fb   :  { %6786 = vmatpush3.bf16.msra.mxu0 %v6783_v0  ;;  %v2687_v0 = vld [vmem:[#allocation8 + $0xb8] sm:$0xff] }
 0x3fc   :  { %6788 = vmatprep.subr.bf16.mxu0 %v6787_v59  ;;  %v6845_v40 = vpack.c.bf16 %v2687_v0, %v2686_v24  ;;  %v6881_v24 = vpack.c.bf16 %v2678_v51, %v2677_v49  ;;  %v2837_v0 = vld [vmem:[#allocation8 + $0x100] sm:$0xff]  ;;  %v3898_v51 = vld [vmem:[#allocation8 + $0x728] sm:$0xff] }
 0x3fd   :  { %v3897_v49 = vld [vmem:[#allocation8 + $0x720] sm:$0xff] }
 0x3ff   :  { %6790 = vmatpush3.bf16.msra.mxu0 %v6787_v59  ;;  %v2461_v59 = vld [vmem:[%s8157_s4 + $0x40] sm:$0xff] }
 0x400   :  { %6792 = vmatprep.subr.bf16.mxu0 %v6791_v18 }
 0x403   :  { %6794 = vmatpush3.bf16.msra.mxu0 %v6791_v18  ;;  %v2462_v18 = vld [vmem:[%s8157_s4 + $0x48] sm:$0xff] }
 0x404   :  { %6796 = vmatprep.subr.bf16.mxu0 %v6795_v63 }
 0x406   :  { %5616 = vmatmul.mubr.f32.vlgmr.msra.gmra.mrb[16].mxu0 %v7797_v1  ;;  %v2341_v1 = vld [vmem:[#allocation7 + $0x7d0] sm:$0xff] }
 0x407   :  { %6798 = vmatpush3.bf16.msra.mxu0 %v6795_v63  ;;  %5618 = vmatprep.mubr.f32.mxu0 %v7807_v31  ;;  %v6815_v31 = vpack.c.bf16 %v2342_v15, %v2341_v1  ;;  %v2690_v63 = vld [vmem:[#allocation8 + $0xd0] sm:$0xff]  ;;  %v6857_v1 = vpack.c.bf16 %v2695_v7, %v2694_v58  ;;  %v7465_v15 = vmov 0.0   ;;  %v2844_v58 = vld [vmem:[#allocation8 + $0x138] sm:$0xff]  ;;  %v3729_v7 = vld [vmem:[#allocation8 + $0x660] sm:$0xff] }
 0x408   :  { %6800 = vmatprep.subr.bf16.mxu0 %v6799_v60 }
 0x40a   :  { %5619 = vmatmul.mubr.f32.gmra.mrb[18].mxu0 %v7805_v26  ;;  %v6819_v26 = vpack.c.bf16 %v2344_v6, %v2343_v14  ;;  %v2664_v14 = vld [vmem:[#allocation8 + $0x8] sm:$0xff] }
 0x40b   :  { %6802 = vmatpush3.bf16.msra.mxu0 %v6799_v60  ;;  %5653 = vmatprep.mubr.f32.mxu0 %v7811_v4  ;;  %v6823_v4 = vpack.c.bf16 %v2346_v20, %v2345_v21  ;;  %v6851_v60 = vpack.c.bf16 %v2691_v50, %v2690_v63  ;;  %v2666_v21 = vld [vmem:[#allocation8 + $0x18] sm:$0xff]  ;;  %v3726_v63 = vld [vmem:[#allocation8 + $0x648] sm:$0xff] }
 0x40c   :  { %6804 = vmatprep.subr.bf16.mxu0 %v6803_v62 }
 0x40f   :  { %6806 = vmatpush3.bf16.msra.mxu0 %v6803_v62  ;;  %v2693_v62 = vld [vmem:[#allocation8 + $0xe8] sm:$0xff] }
 0x410   :  { %6808 = vmatprep.subr.bf16.mxu0 %v6807_v8  ;;  %v6854_v48 = vpack.c.bf16 %v2693_v62, %v2692_v61  ;;  %v3727_v61 = vld [vmem:[#allocation8 + $0x650] sm:$0xff]  ;;  %v3728_v62 = vld [vmem:[#allocation8 + $0x658] sm:$0xff] }
 0x413   :  { %6810 = vmatpush3.bf16.msra.mxu0 %v6807_v8  ;;  %v2467_v8 = vld [vmem:[%s8157_s4 + $0x70] sm:$0xff] }
 0x414   :  { %6812 = vmatprep.subr.bf16.mxu0 %v6811_v10 }
 0x417   :  { %6814 = vmatpush3.bf16.msra.mxu0 %v6811_v10  ;;  %v2468_v10 = vld [vmem:[%s8157_s4 + $0x78] sm:$0xff]  ;;  %s7466_s4 = smov [#allocation11]  }
 0x418   :  { %6816 = vmatprep.subr.bf16.mxu0 %v6815_v31  ;;  %s4093_s14 = sshll.u32 %s7466_s4, 4  ;;  %s4094_s14 = int_to_ptr.vmem [resolvable:$true] %s4093_s14 }
 0x419   :  { %s7381_s16 = scalar_lea.vmem %s4094_s14, 512  ;;  %p7386_p5 = scmp.lt.s32.totalorder %s4094_s14, %s4094_s14 }
 0x41a   :  { %p7382_p4 = scmp.ne.s32.totalorder %s4094_s14, %s7381_s16  ;;  %p7387_p6 = scmp.lt.s32.totalorder %s7381_s16, %s7381_s16 }
 0x41b   :  { %6818 = vmatpush3.bf16.msra.mxu0 %v6815_v31  ;;  %v2663_v31 = vld [vmem:[#allocation8] sm:$0xff] }
 0x41c   :  { %6820 = vmatprep.subr.bf16.mxu0 %v6819_v26  ;;  %v6860_v6 = vpack.c.bf16 %v2664_v14, %v2663_v31  ;;  %p7388_p7 = por %p7387_p6, %p7386_p5 }
 0x41e   :  { %p7389_p8 = pnand %p7388_p7, %p7382_p4 }
 0x41f   :  { %6822 = vmatpush3.bf16.msra.mxu0 %v6819_v26  ;;  %v2665_v26 = vld [vmem:[#allocation8 + $0x10] sm:$0xff] }
 0x420   :  { %6824 = vmatprep.subr.bf16.mxu0 %v6823_v4  ;;  %v6863_v22 = vpack.c.bf16 %v2666_v21, %v2665_v26  ;;  %v2846_v26 = vld [vmem:[#allocation8 + $0x148] sm:$0xff] }
 0x423   :  { %6826 = vmatpush3.bf16.msra.mxu0 %v6823_v4 }
 0x424   :  { %7123 = vmatprep.subr.bf16.mxu0 %v7463_v23 }
 0x426   :  { %5654 = vmatmul.mubr.f32.vlgmr.msra.gmra.mrb[16].mxu0 %v7809_v36 }
 0x427   :  { %5656 = vmatprep.mubr.f32.mxu0 %v7817_v52 }
 0x42a   :  { %5657 = vmatmul.mubr.f32.gmra.mrb[18].mxu0 %v7814_v9 }
 0x42b   :  { %6143 = vmatprep.mubr.msk.f32.mxu0 %vm7464_vm1, %v7465_v15 }
 0x4f9   :  { %v5655_v54 = vpop.f32.mrb[16].mxu0 }
 0x4fa   :  { %v2442_v36 = vadd.f32 %v5655_v54, %v4125_v25  ;;  %v2413_v12 = vpop.f32.mrb[17].mxu0  ;;  %v2668_v54 = vld [vmem:[#allocation8 + $0x28] sm:$0xff] }
 0x4fb   :  { %v2441_v52 = vadd.f32 %v4125_v25, %v2413_v12 }
 0x4fc   :  { %v2446_v5 = vmax.f32 %v2442_v36, 0.0 }
 0x4fd   :  { %v2445_v9 = vmax.f32 %v2441_v52, 0.0  ;;  %v5658_v34 = vpop.f32.mrb[18].mxu0 }
 0x4fe   :  { %2450 = vst [vmem:[#allocation11 + $0x8] sm:$0xff] %v2446_v5  ;;  %v2444_v13 = vadd.f32 %v5658_v34, %v4125_v25  ;;  %v2423_v27 = vpop.f32.mrb[19].mxu0 }
 0x4ff   :  { %2449 = vst [vmem:[#allocation11] sm:$0xff] %v2445_v9  ;;  %v6827_v30 = vpack.c.bf16 %v2446_v5, %v2445_v9  ;;  %v2443_v38 = vadd.f32 %v4125_v25, %v2423_v27  ;;  %v2667_v25 = vld [vmem:[#allocation8 + $0x20] sm:$0xff]  ;;  %v2669_v5 = vld [vmem:[#allocation8 + $0x30] sm:$0xff]  ;;  %v2670_v9 = vld [vmem:[#allocation8 + $0x38] sm:$0xff] }
 0x500   :  { %v2448_v41 = vmax.f32 %v2444_v13, 0.0  ;;  %v6866_v52 = vpack.c.bf16 %v2668_v54, %v2667_v25  ;;  %v6869_v27 = vpack.c.bf16 %v2670_v9, %v2669_v5  ;;  %v2847_v9 = vld [vmem:[#allocation8 + $0x150] sm:$0xff] }
 0x501   :  { %v2447_v46 = vmax.f32 %v2443_v38, 0.0  ;;  %6828 = vmatprep.subr.bf16.mxu1 %v6827_v30  ;;  %v2672_v38 = vld [vmem:[#allocation8 + $0x48] sm:$0xff] }
 0x502   :  { %2452 = vst [vmem:[#allocation11 + $0x18] sm:$0xff] %v2448_v41  ;;  %6830 = vmatpush3.bf16.msra.mxu1 %v6827_v30  ;;  %v2671_v30 = vld [vmem:[#allocation8 + $0x40] sm:$0xff] }
 0x503   :  { %2451 = vst [vmem:[#allocation11 + $0x10] sm:$0xff] %v2447_v46  ;;  %v6831_v29 = vpack.c.bf16 %v2448_v41, %v2447_v46  ;;  %v6872_v41 = vpack.c.bf16 %v2672_v38, %v2671_v30  ;;  %v2673_v46 = vld [vmem:[#allocation8 + $0x50] sm:$0xff]  ;;  %v3893_v38 = vld [vmem:[#allocation8 + $0x700] sm:$0xff] }
 0x505   :  { %6832 = vmatprep.subr.bf16.mxu1 %v6831_v29 }
 0x506   :  { %6834 = vmatpush3.bf16.msra.mxu1 %v6831_v29  ;;  %v2674_v29 = vld [vmem:[#allocation8 + $0x58] sm:$0xff] }
 0x507   :  { %6835 = vmatprep.subr.bf16.mxu1 %v7463_v23 }
 0x509   :  { %5668 = vmatmul.mubr.msk.f32.vlgmr.msra.gmra.mrb[64].mxu1 %vm2469_vm0, %v2454_v37  ;;  %v7124_v37 = vpack.c.bf16 %v3718_v19, %v3717_v32 }
 0x50a   :  { %5670 = vmatprep.mubr.msk.f32.mxu1 %vm2469_vm0, %v2455_v28  ;;  %6837 = vmatpush3.bf16.msra.mxu1 %v6836_v11  ;;  %v6875_v11 = vpack.c.bf16 %v2674_v29, %v2673_v46  ;;  %v2675_v28 = vld [vmem:[#allocation8 + $0x60] sm:$0xff]  ;;  %v3894_v46 = vld [vmem:[#allocation8 + $0x708] sm:$0xff] }
 0x50b   :  { %6838 = vmatprep.subr.bf16.mxu1 %v7463_v23  ;;  %7125 = vmatpush3.bf16.msra.mxu0 %v7124_v37  ;;  %v7172_v32 = vpack.c.bf16 %v3894_v46, %v3893_v38  ;;  %v2849_v37 = vld [vmem:[#allocation8 + $0x160] sm:$0xff]  ;;  %v2938_v46 = vld [vmem:[#allocation8 + $0x1e8] sm:$0xff] }
 0x50c   :  { %7126 = vmatprep.subr.bf16.mxu0 %v7463_v23  ;;  %v2937_v38 = vld [vmem:[#allocation8 + $0x1e0] sm:$0xff] }
 0x50d   :  { %5671 = vmatmul.mubr.msk.f32.gmra.mrb[66].mxu1 %vm2469_vm0, %v2456_v39  ;;  %v3720_v39 = vld [vmem:[#allocation8 + $0x618] sm:$0xff] }
 0x50e   :  { %5673 = vmatprep.mubr.msk.f32.mxu1 %vm2469_vm0, %v2457_v47  ;;  %6840 = vmatpush3.bf16.msra.mxu1 %v6839_v42  ;;  %v7127_v42 = vpack.c.bf16 %v3720_v39, %v3719_v35  ;;  %v6878_v47 = vpack.c.bf16 %v2676_v45, %v2675_v28  ;;  %v3895_v28 = vld [vmem:[#allocation8 + $0x710] sm:$0xff]  ;;  %v3896_v45 = vld [vmem:[#allocation8 + $0x718] sm:$0xff] }
 0x50f   :  { %6841 = vmatprep.subr.bf16.mxu1 %v7463_v23  ;;  %v7175_v35 = vpack.c.bf16 %v3896_v45, %v3895_v28  ;;  %v3014_v28 = vld [vmem:[#allocation8 + $0x208] sm:$0xff] }
 0x510   :  { %7128 = vmatpush3.bf16.msra.mxu0 %v7127_v42  ;;  %v2851_v42 = vld [vmem:[#allocation8 + $0x170] sm:$0xff] }
 0x511   :  { %5674 = vmatmul.mubr.msk.f32.gmra.mrb[68].mxu1 %vm2469_vm0, %v2458_v16  ;;  %v3721_v16 = vld [vmem:[#allocation8 + $0x620] sm:$0xff]  ;;  %7129 = vmatprep.subr.bf16.mxu0 %v7463_v23 }
 0x512   :  { %6843 = vmatpush3.bf16.msra.mxu1 %v6842_v53  ;;  %5676 = vmatprep.mubr.msk.f32.mxu1 %vm2469_vm0, %v2459_v43  ;;  %v3722_v53 = vld [vmem:[#allocation8 + $0x628] sm:$0xff] }
 0x513   :  { %6844 = vmatprep.subr.bf16.mxu1 %v7463_v23  ;;  %v7130_v43 = vpack.c.bf16 %v3722_v53, %v3721_v16  ;;  %v7178_v16 = vpack.c.bf16 %v3898_v51, %v3897_v49  ;;  %v3018_v49 = vld [vmem:[#allocation8 + $0x228] sm:$0xff] }
 0x515   :  { %5677 = vmatmul.mubr.msk.f32.gmra.mrb[70].mxu1 %vm2469_vm0, %v2460_v33  ;;  %v2838_v33 = vld [vmem:[#allocation8 + $0x108] sm:$0xff]  ;;  %7131 = vmatpush3.bf16.msra.mxu0 %v7130_v43  ;;  %v2925_v43 = vld [vmem:[#allocation8 + $0x180] sm:$0xff] }
 0x516   :  { %6846 = vmatpush3.bf16.msra.mxu1 %v6845_v40  ;;  %5679 = vmatprep.mubr.msk.f32.mxu1 %vm2469_vm0, %v2461_v59  ;;  %v3723_v40 = vld [vmem:[#allocation8 + $0x630] sm:$0xff]  ;;  %v3724_v59 = vld [vmem:[#allocation8 + $0x638] sm:$0xff]  ;;  %v6884_v55 = vpack.c.bf16 %v2838_v33, %v2837_v0 }
 0x517   :  { %6847 = vmatprep.subr.bf16.mxu1 %v7463_v23  ;;  %7132 = vmatprep.subr.bf16.mxu0 %v7463_v23  ;;  %v7133_v44 = vpack.c.bf16 %v3724_v59, %v3723_v40  ;;  %v3899_v0 = vld [vmem:[#allocation8 + $0x730] sm:$0xff]  ;;  %v3900_v33 = vld [vmem:[#allocation8 + $0x738] sm:$0xff] }
 0x518   :  { %v7181_v40 = vpack.c.bf16 %v3900_v33, %v3899_v0  ;;  %v3023_v33 = vld [vmem:[#allocation8 + $0x250] sm:$0xff] }
 0x519   :  { %5680 = vmatmul.mubr.msk.f32.gmra.mrb[72].mxu1 %vm2469_vm0, %v2462_v18  ;;  %v2839_v18 = vld [vmem:[#allocation8 + $0x110] sm:$0xff]  ;;  %7134 = vmatpush3.bf16.msra.mxu0 %v7133_v44 }
 0x51a   :  { %6849 = vmatpush3.bf16.msra.mxu1 %v6848_v56  ;;  %5682 = vmatprep.mubr.msk.f32.mxu1 %vm2469_vm0, %v2463_v3  ;;  %v2840_v56 = vld [vmem:[#allocation8 + $0x118] sm:$0xff]  ;;  %v3725_v3 = vld [vmem:[#allocation8 + $0x640] sm:$0xff]  ;;  %v2927_v44 = vld [vmem:[#allocation8 + $0x190] sm:$0xff] }
 0x51b   :  { %6850 = vmatprep.subr.bf16.mxu1 %v7463_v23  ;;  %7135 = vmatprep.subr.bf16.mxu0 %v7463_v23  ;;  %v7136_v50 = vpack.c.bf16 %v3726_v63, %v3725_v3 }
 0x51d   :  { %5683 = vmatmul.mubr.msk.f32.gmra.mrb[74].mxu1 %vm2469_vm0, %v2464_v2  ;;  %v6887_v2 = vpack.c.bf16 %v2840_v56, %v2839_v18  ;;  %7137 = vmatpush3.bf16.msra.mxu0 %v7136_v50  ;;  %v3901_v18 = vld [vmem:[#allocation8 + $0x740] sm:$0xff]  ;;  %v3902_v56 = vld [vmem:[#allocation8 + $0x748] sm:$0xff] }
 0x51e   :  { %6852 = vmatpush3.bf16.msra.mxu1 %v6851_v60  ;;  %5685 = vmatprep.mubr.msk.f32.mxu1 %vm2469_vm0, %v2465_v57  ;;  %v2841_v60 = vld [vmem:[#allocation8 + $0x120] sm:$0xff]  ;;  %v2842_v57 = vld [vmem:[#allocation8 + $0x128] sm:$0xff]  ;;  %v7184_v3 = vpack.c.bf16 %v3902_v56, %v3901_v18  ;;  %v3027_v56 = vld [vmem:[#allocation8 + $0x270] sm:$0xff] }
 0x51f   :  { %6853 = vmatprep.subr.bf16.mxu1 %v7463_v23  ;;  %7138 = vmatprep.subr.bf16.mxu0 %v7463_v23  ;;  %v2929_v50 = vld [vmem:[#allocation8 + $0x1a0] sm:$0xff] }
 0x521   :  { %5686 = vmatmul.mubr.msk.f32.gmra.mrb[76].mxu1 %vm2469_vm0, %v2466_v17  ;;  %v7139_v17 = vpack.c.bf16 %v3728_v62, %v3727_v61 }
 0x522   :  { %6855 = vmatpush3.bf16.msra.mxu1 %v6854_v48  ;;  %5688 = vmatprep.mubr.msk.f32.mxu1 %vm2469_vm0, %v2467_v8  ;;  %v6890_v48 = vpack.c.bf16 %v2842_v57, %v2841_v60  ;;  %v2843_v8 = vld [vmem:[#allocation8 + $0x130] sm:$0xff]  ;;  %v3904_v57 = vld [vmem:[#allocation8 + $0x758] sm:$0xff] }
 0x523   :  { %6856 = vmatprep.subr.bf16.mxu1 %v7463_v23  ;;  %7140 = vmatpush3.bf16.msra.mxu0 %v7139_v17  ;;  %v6893_v31 = vpack.c.bf16 %v2844_v58, %v2843_v8  ;;  %v3903_v60 = vld [vmem:[#allocation8 + $0x750] sm:$0xff]  ;;  %v2932_v17 = vld [vmem:[#allocation8 + $0x1b8] sm:$0xff]  ;;  %v3906_v8 = vld [vmem:[#allocation8 + $0x768] sm:$0xff] }
 0x524   :  { %7141 = vmatprep.subr.bf16.mxu0 %v7463_v23  ;;  %v7187_v61 = vpack.c.bf16 %v3904_v57, %v3903_v60  ;;  %v3103_v57 = vld [vmem:[#allocation8 + $0x290] sm:$0xff] }
 0x525   :  { %5689 = vmatmul.mubr.msk.f32.gmra.mrb[78].mxu1 %vm2469_vm0, %v2468_v10  ;;  %v3730_v10 = vld [vmem:[#allocation8 + $0x668] sm:$0xff] }
 0x526   :  { %6858 = vmatpush3.bf16.msra.mxu1 %v6857_v1  ;;  %5723 = vmatprep.mubr.msk.f32.mxu1 %vm7464_vm1, %v7465_v15  ;;  %v7142_v1 = vpack.c.bf16 %v3730_v10, %v3729_v7  ;;  %v2933_v10 = vld [vmem:[#allocation8 + $0x1c0] sm:$0xff] }
 0x527   :  { %6859 = vmatprep.subr.bf16.mxu1 %v7463_v23 }
 0x528   :  { %7143 = vmatpush3.bf16.msra.mxu0 %v7142_v1  ;;  %v2934_v1 = vld [vmem:[#allocation8 + $0x1c8] sm:$0xff] }
 0x529   :  { %7144 = vmatprep.subr.bf16.mxu0 %v7463_v23 }
 0x5dc   :  { %v5669_v20 = vpop.f32.mrb[64].mxu1 }
 0x5dd   :  { %5724 = vmatmul.mubr.f32.vlgmr.msra.gmra.mrb[80].mxu1 %v5669_v20  ;;  %v7917_v4 = vpop.f32.mrb[65].mxu1  ;;  %v3731_v20 = vld [vmem:[#allocation8 + $0x670] sm:$0xff] }
 0x5de   :  { %6861 = vmatpush3.bf16.msra.mxu1 %v6860_v6  ;;  %5758 = vmatprep.mubr.msk.f32.mxu1 %vm7464_vm1, %v7465_v15  ;;  %v2845_v6 = vld [vmem:[#allocation8 + $0x140] sm:$0xff] }
 0x5df   :  { %6862 = vmatprep.subr.bf16.mxu1 %v7463_v23 }
 0x5e0   :  { %v7922_v36 = vpop.f32.mrb[66].mxu1 }
 0x5e1   :  { %v7924_v12 = vpop.f32.mrb[67].mxu1 }
 0x5e2   :  { %6864 = vmatpush3.bf16.msra.mxu1 %v6863_v22  ;;  %v3732_v22 = vld [vmem:[#allocation8 + $0x678] sm:$0xff] }
 0x5e3   :  { %6865 = vmatprep.subr.bf16.mxu1 %v7463_v23  ;;  %v7145_v54 = vpack.c.bf16 %v3732_v22, %v3731_v20  ;;  %v6920_v20 = vpack.c.bf16 %v2934_v1, %v2933_v10  ;;  %v2935_v22 = vld [vmem:[#allocation8 + $0x1d0] sm:$0xff]  ;;  %v3110_v10 = vld [vmem:[#allocation8 + $0x2c8] sm:$0xff] }
 0x5e4   :  { %v7927_v34 = vpop.f32.mrb[68].mxu1 }
 0x5e5   :  { %v7929_v13 = vpop.f32.mrb[69].mxu1  ;;  %7146 = vmatpush3.bf16.msra.mxu0 %v7145_v54  ;;  %v2936_v54 = vld [vmem:[#allocation8 + $0x1d8] sm:$0xff] }
 0x5e6   :  { %6867 = vmatpush3.bf16.msra.mxu1 %v6866_v52  ;;  %v6896_v52 = vpack.c.bf16 %v2846_v26, %v2845_v6  ;;  %7171 = vmatprep.subr.bf16.mxu0 %v7463_v23  ;;  %v3908_v6 = vld [vmem:[#allocation8 + $0x778] sm:$0xff] }
 0x5e7   :  { %6868 = vmatprep.subr.bf16.mxu1 %v7463_v23 }
 0x5e8   :  { %v7948_v14 = vpop.f32.mrb[70].mxu1 }
 0x5e9   :  { %v7951_v21 = vpop.f32.mrb[71].mxu1 }
 0x5ea   :  { %6870 = vmatpush3.bf16.msra.mxu1 %v6869_v27  ;;  %v2848_v27 = vld [vmem:[#allocation8 + $0x158] sm:$0xff] }
 0x5eb   :  { %6871 = vmatprep.subr.bf16.mxu1 %v7463_v23  ;;  %v6899_v19 = vpack.c.bf16 %v2848_v27, %v2847_v9  ;;  %v6923_v27 = vpack.c.bf16 %v2936_v54, %v2935_v22  ;;  %v3114_v22 = vld [vmem:[#allocation8 + $0x2e8] sm:$0xff] }
 0x5ee   :  { %6873 = vmatpush3.bf16.msra.mxu1 %v6872_v41 }
 0x5ef   :  { %6874 = vmatprep.subr.bf16.mxu1 %v7463_v23 }
 0x5f2   :  { %6876 = vmatpush3.bf16.msra.mxu1 %v6875_v11  ;;  %v2850_v11 = vld [vmem:[#allocation8 + $0x168] sm:$0xff] }
 0x5f3   :  { %6877 = vmatprep.subr.bf16.mxu1 %v7463_v23  ;;  %v6902_v39 = vpack.c.bf16 %v2850_v11, %v2849_v37  ;;  %v3013_v11 = vld [vmem:[#allocation8 + $0x200] sm:$0xff] }
 0x5f4   :  { %v6932_v45 = vpack.c.bf16 %v3014_v28, %v3013_v11  ;;  %v3193_v28 = vld [vmem:[#allocation8 + $0x320] sm:$0xff] }
 0x5f6   :  { %6879 = vmatpush3.bf16.msra.mxu1 %v6878_v47  ;;  %v2852_v47 = vld [vmem:[#allocation8 + $0x178] sm:$0xff] }
 0x5f7   :  { %6880 = vmatprep.subr.bf16.mxu1 %v7463_v23  ;;  %v6905_v53 = vpack.c.bf16 %v2852_v47, %v2851_v42  ;;  %v3017_v47 = vld [vmem:[#allocation8 + $0x220] sm:$0xff] }
 0x5f8   :  { %v6938_v51 = vpack.c.bf16 %v3018_v49, %v3017_v47  ;;  %v3198_v49 = vld [vmem:[#allocation8 + $0x348] sm:$0xff] }
 0x5fa   :  { %6882 = vmatpush3.bf16.msra.mxu1 %v6881_v24  ;;  %v2926_v24 = vld [vmem:[#allocation8 + $0x188] sm:$0xff] }
 0x5fb   :  { %6883 = vmatprep.subr.bf16.mxu1 %v7463_v23  ;;  %v6908_v59 = vpack.c.bf16 %v2926_v24, %v2925_v43  ;;  %v3022_v24 = vld [vmem:[#allocation8 + $0x248] sm:$0xff] }
 0x5fd   :  { %5759 = vmatmul.mubr.f32.vlgmr.msra.gmra.mrb[82].mxu1 %v7917_v4  ;;  %v7953_v4 = vpop.f32.mrb[72].mxu1 }
 0x5fe   :  { %6885 = vmatpush3.bf16.msra.mxu1 %v6884_v55  ;;  %5793 = vmatprep.mubr.msk.f32.mxu1 %vm7464_vm1, %v7465_v15  ;;  %v7956_v25 = vpop.f32.mrb[73].mxu1  ;;  %v2928_v55 = vld [vmem:[#allocation8 + $0x198] sm:$0xff] }
 0x5ff   :  { %6886 = vmatprep.subr.bf16.mxu1 %v7463_v23  ;;  %v7958_v5 = vpop.f32.mrb[74].mxu1  ;;  %v6911_v63 = vpack.c.bf16 %v2928_v55, %v2927_v44  ;;  %v3025_v44 = vld [vmem:[#allocation8 + $0x260] sm:$0xff]  ;;  %v3026_v55 = vld [vmem:[#allocation8 + $0x268] sm:$0xff] }
 0x600   :  { %v7961_v30 = vpop.f32.mrb[75].mxu1  ;;  %v6950_v18 = vpack.c.bf16 %v3026_v55, %v3025_v44  ;;  %v3277_v44 = vld [vmem:[#allocation8 + $0x380] sm:$0xff]  ;;  %v3278_v55 = vld [vmem:[#allocation8 + $0x388] sm:$0xff] }
 0x601   :  { %v7963_v41 = vpop.f32.mrb[76].mxu1 }
 0x602   :  { %6888 = vmatpush3.bf16.msra.mxu1 %v6887_v2  ;;  %v2644_v29 = vpop.f32.mrb[77].mxu1  ;;  %v2930_v2 = vld [vmem:[#allocation8 + $0x1a8] sm:$0xff] }
 0x603   :  { %6889 = vmatprep.subr.bf16.mxu1 %v7463_v23  ;;  %6144 = vmatmul.mubr.f32.vlgmr.msra.gmra.mrb[20].mxu0 %v2644_v29  ;;  %v6914_v62 = vpack.c.bf16 %v2930_v2, %v2929_v50  ;;  %v6926_v29 = vpack.c.bf16 %v2938_v46, %v2937_v38  ;;  %v3101_v50 = vld [vmem:[#allocation8 + $0x280] sm:$0xff]  ;;  %v3102_v2 = vld [vmem:[#allocation8 + $0x288] sm:$0xff] }
 0x604   :  { %7173 = vmatpush3.bf16.msra.mxu0 %v7172_v32  ;;  %6213 = vmatprep.mubr.msk.f32.mxu0 %vm7464_vm1, %v7465_v15  ;;  %v2939_v32 = vld [vmem:[#allocation8 + $0x1f0] sm:$0xff]  ;;  %v6956_v60 = vpack.c.bf16 %v3102_v2, %v3101_v50  ;;  %v3189_v46 = vld [vmem:[#allocation8 + $0x300] sm:$0xff]  ;;  %v3282_v2 = vld [vmem:[#allocation8 + $0x3a8] sm:$0xff] }
 0x605   :  { %7174 = vmatprep.subr.bf16.mxu0 %v7463_v23  ;;  %v3281_v50 = vld [vmem:[#allocation8 + $0x3a0] sm:$0xff] }
 0x606   :  { %6891 = vmatpush3.bf16.msra.mxu1 %v6890_v48  ;;  %v3905_v48 = vld [vmem:[#allocation8 + $0x760] sm:$0xff] }
 0x607   :  { %6892 = vmatprep.subr.bf16.mxu1 %v7463_v23  ;;  %v7190_v58 = vpack.c.bf16 %v3906_v8, %v3905_v48  ;;  %v3107_v8 = vld [vmem:[#allocation8 + $0x2b0] sm:$0xff] }
 0x608   :  { %7176 = vmatpush3.bf16.msra.mxu0 %v7175_v35  ;;  %v3015_v35 = vld [vmem:[#allocation8 + $0x210] sm:$0xff] }
 0x609   :  { %7177 = vmatprep.subr.bf16.mxu0 %v7463_v23 }
 0x60a   :  { %6894 = vmatpush3.bf16.msra.mxu1 %v6893_v31  ;;  %v3907_v31 = vld [vmem:[#allocation8 + $0x770] sm:$0xff] }
 0x60b   :  { %6895 = vmatprep.subr.bf16.mxu1 %v7463_v23  ;;  %v7193_v26 = vpack.c.bf16 %v3908_v6, %v3907_v31  ;;  %v3111_v31 = vld [vmem:[#allocation8 + $0x2d0] sm:$0xff]  ;;  %v3112_v6 = vld [vmem:[#allocation8 + $0x2d8] sm:$0xff] }
 0x60c   :  { %7179 = vmatpush3.bf16.msra.mxu0 %v7178_v16  ;;  %v3019_v16 = vld [vmem:[#allocation8 + $0x230] sm:$0xff] }
 0x60d   :  { %7180 = vmatprep.subr.bf16.mxu0 %v7463_v23 }
 0x60e   :  { %6897 = vmatpush3.bf16.msra.mxu1 %v6896_v52  ;;  %v7986_v52 = vpop.f32.mrb[78].mxu1 }
 0x60f   :  { %6898 = vmatprep.subr.bf16.mxu1 %v7463_v23  ;;  %v2654_v9 = vpop.f32.mrb[79].mxu1 }
 0x610   :  { %7182 = vmatpush3.bf16.msra.mxu0 %v7181_v40  ;;  %v3024_v40 = vld [vmem:[#allocation8 + $0x258] sm:$0xff] }
 0x611   :  { %7183 = vmatprep.subr.bf16.mxu0 %v7463_v23 }
 0x612   :  { %6900 = vmatpush3.bf16.msra.mxu1 %v6899_v19  ;;  %v2940_v19 = vld [vmem:[#allocation8 + $0x1f8] sm:$0xff] }
 0x613   :  { %6901 = vmatprep.subr.bf16.mxu1 %v7463_v23  ;;  %v6929_v37 = vpack.c.bf16 %v2940_v19, %v2939_v32  ;;  %v3191_v19 = vld [vmem:[#allocation8 + $0x310] sm:$0xff] }
 0x614   :  { %7185 = vmatpush3.bf16.msra.mxu0 %v7184_v3  ;;  %v3028_v3 = vld [vmem:[#allocation8 + $0x278] sm:$0xff] }
 0x615   :  { %7186 = vmatprep.subr.bf16.mxu0 %v7463_v23 }
 0x616   :  { %6903 = vmatpush3.bf16.msra.mxu1 %v6902_v39  ;;  %v3016_v39 = vld [vmem:[#allocation8 + $0x218] sm:$0xff] }
 0x617   :  { %6904 = vmatprep.subr.bf16.mxu1 %v7463_v23  ;;  %v6935_v42 = vpack.c.bf16 %v3016_v39, %v3015_v35  ;;  %v3195_v39 = vld [vmem:[#allocation8 + $0x330] sm:$0xff] }
 0x618   :  { %7188 = vmatpush3.bf16.msra.mxu0 %v7187_v61  ;;  %v3104_v61 = vld [vmem:[#allocation8 + $0x298] sm:$0xff] }
 0x619   :  { %7189 = vmatprep.subr.bf16.mxu0 %v7463_v23 }
 0x61a   :  { %6906 = vmatpush3.bf16.msra.mxu1 %v6905_v53  ;;  %v3020_v53 = vld [vmem:[#allocation8 + $0x238] sm:$0xff] }
 0x61b   :  { %6907 = vmatprep.subr.bf16.mxu1 %v7463_v23  ;;  %v6941_v43 = vpack.c.bf16 %v3020_v53, %v3019_v16  ;;  %v3199_v16 = vld [vmem:[#allocation8 + $0x350] sm:$0xff]  ;;  %v3200_v53 = vld [vmem:[#allocation8 + $0x358] sm:$0xff] }
 0x61c   :  { %7191 = vmatpush3.bf16.msra.mxu0 %v7190_v58  ;;  %v3108_v58 = vld [vmem:[#allocation8 + $0x2b8] sm:$0xff] }
 0x61d   :  { %5794 = vmatmul.mubr.f32.vlgmr.msra.gmra.mrb[84].mxu1 %v7924_v12  ;;  %v2931_v12 = vld [vmem:[#allocation8 + $0x1b0] sm:$0xff]  ;;  %7192 = vmatprep.subr.bf16.mxu0 %v7463_v23 }
 0x61e   :  { %6909 = vmatpush3.bf16.msra.mxu1 %v6908_v59  ;;  %5828 = vmatprep.mubr.msk.f32.mxu1 %vm7464_vm1, %v7465_v15  ;;  %v6917_v7 = vpack.c.bf16 %v2932_v17, %v2931_v12  ;;  %v6947_v59 = vpack.c.bf16 %v3024_v40, %v3023_v33  ;;  %v3105_v12 = vld [vmem:[#allocation8 + $0x2a0] sm:$0xff]  ;;  %v3106_v17 = vld [vmem:[#allocation8 + $0x2a8] sm:$0xff]  ;;  %v3203_v33 = vld [vmem:[#allocation8 + $0x370] sm:$0xff] }
 0x61f   :  { %6910 = vmatprep.subr.bf16.mxu1 %v7463_v23  ;;  %v6962_v48 = vpack.c.bf16 %v3106_v17, %v3105_v12  ;;  %v3204_v40 = vld [vmem:[#allocation8 + $0x378] sm:$0xff]  ;;  %v3286_v12 = vld [vmem:[#allocation8 + $0x3c8] sm:$0xff] }
 0x620   :  { %7194 = vmatpush3.bf16.msra.mxu0 %v7193_v26  ;;  %v6971_v26 = vpack.c.bf16 %v3112_v6, %v3111_v31  ;;  %v3291_v6 = vld [vmem:[#allocation8 + $0x3f0] sm:$0xff] }
 0x622   :  { %6912 = vmatpush3.bf16.msra.mxu1 %v6911_v63  ;;  %v6953_v63 = vpack.c.bf16 %v3028_v3, %v3027_v56  ;;  %v3279_v56 = vld [vmem:[#allocation8 + $0x390] sm:$0xff]  ;;  %v3280_v3 = vld [vmem:[#allocation8 + $0x398] sm:$0xff] }
 0x623   :  { %6913 = vmatprep.subr.bf16.mxu1 %v7463_v23  ;;  %6214 = vmatmul.mubr.f32.vlgmr.msra.gmra.mrb[22].mxu0 %v2654_v9  ;;  %v3115_v9 = vld [vmem:[#allocation8 + $0x2f0] sm:$0xff] }
 0x626   :  { %6915 = vmatpush3.bf16.msra.mxu1 %v6914_v62  ;;  %v6959_v62 = vpack.c.bf16 %v3104_v61, %v3103_v57  ;;  %v3283_v57 = vld [vmem:[#allocation8 + $0x3b0] sm:$0xff]  ;;  %v3284_v61 = vld [vmem:[#allocation8 + $0x3b8] sm:$0xff] }
 0x627   :  { %6916 = vmatprep.subr.bf16.mxu1 %v7463_v23 }
 0x62a   :  { %6918 = vmatpush3.bf16.msra.mxu1 %v6917_v7  ;;  %v6965_v7 = vpack.c.bf16 %v3108_v58, %v3107_v8  ;;  %v3288_v8 = vld [vmem:[#allocation8 + $0x3d8] sm:$0xff] }
 0x62b   :  { %6919 = vmatprep.subr.bf16.mxu1 %v7463_v23 }
 0x62e   :  { %6921 = vmatpush3.bf16.msra.mxu1 %v6920_v20  ;;  %v3113_v20 = vld [vmem:[#allocation8 + $0x2e0] sm:$0xff] }
 0x62f   :  { %6922 = vmatprep.subr.bf16.mxu1 %v7463_v23  ;;  %v6974_v54 = vpack.c.bf16 %v3114_v22, %v3113_v20  ;;  %v3365_v22 = vld [vmem:[#allocation8 + $0x400] sm:$0xff] }
 0x632   :  { %6924 = vmatpush3.bf16.msra.mxu1 %v6923_v27  ;;  %v3116_v27 = vld [vmem:[#allocation8 + $0x2f8] sm:$0xff] }
 0x633   :  { %6925 = vmatprep.subr.bf16.mxu1 %v7463_v23  ;;  %v6977_v38 = vpack.c.bf16 %v3116_v27, %v3115_v9  ;;  %v3367_v27 = vld [vmem:[#allocation8 + $0x410] sm:$0xff] }
 0x636   :  { %6927 = vmatpush3.bf16.msra.mxu1 %v6926_v29  ;;  %v3190_v29 = vld [vmem:[#allocation8 + $0x308] sm:$0xff] }
 0x637   :  { %6928 = vmatprep.subr.bf16.mxu1 %v7463_v23  ;;  %v6980_v32 = vpack.c.bf16 %v3190_v29, %v3189_v46  ;;  %v3369_v29 = vld [vmem:[#allocation8 + $0x420] sm:$0xff] }
 0x63a   :  { %6930 = vmatpush3.bf16.msra.mxu1 %v6929_v37  ;;  %v3192_v37 = vld [vmem:[#allocation8 + $0x318] sm:$0xff] }
 0x63b   :  { %6931 = vmatprep.subr.bf16.mxu1 %v7463_v23  ;;  %v6983_v11 = vpack.c.bf16 %v3192_v37, %v3191_v19  ;;  %v3371_v37 = vld [vmem:[#allocation8 + $0x430] sm:$0xff] }
 0x63d   :  { %5829 = vmatmul.mubr.f32.vlgmr.msra.gmra.mrb[86].mxu1 %v7922_v36  ;;  %v3021_v36 = vld [vmem:[#allocation8 + $0x240] sm:$0xff] }
 0x63e   :  { %6933 = vmatpush3.bf16.msra.mxu1 %v6932_v45  ;;  %5863 = vmatprep.mubr.msk.f32.mxu1 %vm7464_vm1, %v7465_v15  ;;  %v6944_v0 = vpack.c.bf16 %v3022_v24, %v3021_v36  ;;  %v3194_v45 = vld [vmem:[#allocation8 + $0x328] sm:$0xff]  ;;  %v3201_v36 = vld [vmem:[#allocation8 + $0x360] sm:$0xff] }
 0x63f   :  { %6934 = vmatprep.subr.bf16.mxu1 %v7463_v23  ;;  %v6986_v35 = vpack.c.bf16 %v3194_v45, %v3193_v28  ;;  %v3202_v24 = vld [vmem:[#allocation8 + $0x368] sm:$0xff] }
 0x640   :  { %v3374_v45 = vld [vmem:[#allocation8 + $0x448] sm:$0xff] }
 0x642   :  { %6936 = vmatpush3.bf16.msra.mxu1 %v6935_v42  ;;  %v3196_v42 = vld [vmem:[#allocation8 + $0x338] sm:$0xff] }
 0x643   :  { %6937 = vmatprep.subr.bf16.mxu1 %v7463_v23  ;;  %v6989_v47 = vpack.c.bf16 %v3196_v42, %v3195_v39  ;;  %v3375_v39 = vld [vmem:[#allocation8 + $0x450] sm:$0xff]  ;;  %v3376_v42 = vld [vmem:[#allocation8 + $0x458] sm:$0xff] }
 0x646   :  { %6939 = vmatpush3.bf16.msra.mxu1 %v6938_v51 }
 0x647   :  { %6940 = vmatprep.subr.bf16.mxu1 %v7463_v23 }
 0x64a   :  { %6942 = vmatpush3.bf16.msra.mxu1 %v6941_v43  ;;  %v6995_v43 = vpack.c.bf16 %v3200_v53, %v3199_v16 }
 0x64b   :  { %6943 = vmatprep.subr.bf16.mxu1 %v7463_v23 }
 0x64e   :  { %6945 = vmatpush3.bf16.msra.mxu1 %v6944_v0  ;;  %v6998_v0 = vpack.c.bf16 %v3202_v24, %v3201_v36  ;;  %v3379_v36 = vld [vmem:[#allocation8 + $0x470] sm:$0xff]  ;;  %v3380_v24 = vld [vmem:[#allocation8 + $0x478] sm:$0xff] }
 0x64f   :  { %6946 = vmatprep.subr.bf16.mxu1 %v7463_v23 }
 0x652   :  { %6948 = vmatpush3.bf16.msra.mxu1 %v6947_v59  ;;  %v7001_v59 = vpack.c.bf16 %v3204_v40, %v3203_v33  ;;  %v3453_v33 = vld [vmem:[#allocation8 + $0x480] sm:$0xff]  ;;  %v3454_v40 = vld [vmem:[#allocation8 + $0x488] sm:$0xff] }
 0x653   :  { %6949 = vmatprep.subr.bf16.mxu1 %v7463_v23 }
 0x656   :  { %6951 = vmatpush3.bf16.msra.mxu1 %v6950_v18  ;;  %v7004_v18 = vpack.c.bf16 %v3278_v55, %v3277_v44  ;;  %v3455_v44 = vld [vmem:[#allocation8 + $0x490] sm:$0xff]  ;;  %v3456_v55 = vld [vmem:[#allocation8 + $0x498] sm:$0xff] }
 0x657   :  { %6952 = vmatprep.subr.bf16.mxu1 %v7463_v23 }
 0x65a   :  { %6954 = vmatpush3.bf16.msra.mxu1 %v6953_v63  ;;  %v7007_v63 = vpack.c.bf16 %v3280_v3, %v3279_v56  ;;  %v3457_v56 = vld [vmem:[#allocation8 + $0x4a0] sm:$0xff]  ;;  %v3458_v3 = vld [vmem:[#allocation8 + $0x4a8] sm:$0xff] }
 0x65b   :  { %6955 = vmatprep.subr.bf16.mxu1 %v7463_v23 }
 0x65d   :  { %5864 = vmatmul.mubr.f32.vlgmr.msra.gmra.mrb[88].mxu1 %v7929_v13  ;;  %v3109_v13 = vld [vmem:[#allocation8 + $0x2c0] sm:$0xff] }
 0x65e   :  { %6957 = vmatpush3.bf16.msra.mxu1 %v6956_v60  ;;  %5898 = vmatprep.mubr.msk.f32.mxu1 %vm7464_vm1, %v7465_v15  ;;  %v6968_v1 = vpack.c.bf16 %v3110_v10, %v3109_v13  ;;  %v7010_v60 = vpack.c.bf16 %v3282_v2, %v3281_v50  ;;  %v3290_v13 = vld [vmem:[#allocation8 + $0x3e8] sm:$0xff]  ;;  %v3459_v50 = vld [vmem:[#allocation8 + $0x4b0] sm:$0xff]  ;;  %v3460_v2 = vld [vmem:[#allocation8 + $0x4b8] sm:$0xff] }
 0x65f   :  { %6958 = vmatprep.subr.bf16.mxu1 %v7463_v23 }
 0x662   :  { %6960 = vmatpush3.bf16.msra.mxu1 %v6959_v62  ;;  %v7013_v62 = vpack.c.bf16 %v3284_v61, %v3283_v57  ;;  %v3462_v57 = vld [vmem:[#allocation8 + $0x4c8] sm:$0xff] }
 0x663   :  { %6961 = vmatprep.subr.bf16.mxu1 %v7463_v23 }
 0x666   :  { %6963 = vmatpush3.bf16.msra.mxu1 %v6962_v48  ;;  %v3287_v48 = vld [vmem:[#allocation8 + $0x3d0] sm:$0xff] }
 0x667   :  { %6964 = vmatprep.subr.bf16.mxu1 %v7463_v23  ;;  %v7019_v58 = vpack.c.bf16 %v3288_v8, %v3287_v48  ;;  %v3466_v48 = vld [vmem:[#allocation8 + $0x4e8] sm:$0xff] }
 0x66a   :  { %6966 = vmatpush3.bf16.msra.mxu1 %v6965_v7  ;;  %v3289_v7 = vld [vmem:[#allocation8 + $0x3e0] sm:$0xff] }
 0x66b   :  { %6967 = vmatprep.subr.bf16.mxu1 %v7463_v23  ;;  %v7022_v31 = vpack.c.bf16 %v3290_v13, %v3289_v7 }
 0x66e   :  { %6969 = vmatpush3.bf16.msra.mxu1 %v6968_v1 }
 0x66f   :  { %6970 = vmatprep.subr.bf16.mxu1 %v7463_v23 }
 0x672   :  { %6972 = vmatpush3.bf16.msra.mxu1 %v6971_v26  ;;  %v3292_v26 = vld [vmem:[#allocation8 + $0x3f8] sm:$0xff] }
 0x673   :  { %6973 = vmatprep.subr.bf16.mxu1 %v7463_v23  ;;  %v7025_v20 = vpack.c.bf16 %v3292_v26, %v3291_v6  ;;  %v3541_v6 = vld [vmem:[#allocation8 + $0x500] sm:$0xff]  ;;  %v3542_v26 = vld [vmem:[#allocation8 + $0x508] sm:$0xff] }
 0x676   :  { %6975 = vmatpush3.bf16.msra.mxu1 %v6974_v54  ;;  %v3366_v54 = vld [vmem:[#allocation8 + $0x408] sm:$0xff] }
 0x677   :  { %6976 = vmatprep.subr.bf16.mxu1 %v7463_v23  ;;  %v7028_v9 = vpack.c.bf16 %v3366_v54, %v3365_v22  ;;  %v3543_v22 = vld [vmem:[#allocation8 + $0x510] sm:$0xff]  ;;  %v3544_v54 = vld [vmem:[#allocation8 + $0x518] sm:$0xff] }
 0x67a   :  { %6978 = vmatpush3.bf16.msra.mxu1 %v6977_v38  ;;  %v3368_v38 = vld [vmem:[#allocation8 + $0x418] sm:$0xff] }
 0x67b   :  { %6979 = vmatprep.subr.bf16.mxu1 %v7463_v23  ;;  %v7031_v46 = vpack.c.bf16 %v3368_v38, %v3367_v27  ;;  %v7079_v38 = vpack.c.bf16 %v3544_v54, %v3543_v22  ;;  %v3808_v22 = vld [vmem:[#allocation8 + $0x698] sm:$0xff] }
 0x67d   :  { %5899 = vmatmul.mubr.f32.vlgmr.msra.gmra.mrb[90].mxu1 %v7927_v34  ;;  %v3197_v34 = vld [vmem:[#allocation8 + $0x340] sm:$0xff] }
 0x67e   :  { %6981 = vmatpush3.bf16.msra.mxu1 %v6980_v32  ;;  %5933 = vmatprep.mubr.msk.f32.mxu1 %vm7464_vm1, %v7465_v15  ;;  %v6992_v51 = vpack.c.bf16 %v3198_v49, %v3197_v34  ;;  %v3370_v32 = vld [vmem:[#allocation8 + $0x428] sm:$0xff]  ;;  %v3377_v34 = vld [vmem:[#allocation8 + $0x460] sm:$0xff] }
 0x67f   :  { %6982 = vmatprep.subr.bf16.mxu1 %v7463_v23  ;;  %v7034_v19 = vpack.c.bf16 %v3370_v32, %v3369_v29  ;;  %v3378_v49 = vld [vmem:[#allocation8 + $0x468] sm:$0xff] }
 0x680   :  { %v3546_v29 = vld [vmem:[#allocation8 + $0x528] sm:$0xff] }
 0x682   :  { %6984 = vmatpush3.bf16.msra.mxu1 %v6983_v11  ;;  %v3372_v11 = vld [vmem:[#allocation8 + $0x438] sm:$0xff] }
 0x683   :  { %6985 = vmatprep.subr.bf16.mxu1 %v7463_v23  ;;  %v7037_v28 = vpack.c.bf16 %v3372_v11, %v3371_v37  ;;  %v3547_v11 = vld [vmem:[#allocation8 + $0x530] sm:$0xff] }
 0x686   :  { %6987 = vmatpush3.bf16.msra.mxu1 %v6986_v35 }
 0x687   :  { %6988 = vmatprep.subr.bf16.mxu1 %v7463_v23 }
 0x68a   :  { %6990 = vmatpush3.bf16.msra.mxu1 %v6989_v47  ;;  %v7043_v47 = vpack.c.bf16 %v3376_v42, %v3375_v39  ;;  %v3551_v39 = vld [vmem:[#allocation8 + $0x550] sm:$0xff]  ;;  %v3552_v42 = vld [vmem:[#allocation8 + $0x558] sm:$0xff] }
 0x68b   :  { %6991 = vmatprep.subr.bf16.mxu1 %v7463_v23 }
 0x68e   :  { %6993 = vmatpush3.bf16.msra.mxu1 %v6992_v51 }
 0x68f   :  { %6994 = vmatprep.subr.bf16.mxu1 %v7463_v23 }
 0x692   :  { %6996 = vmatpush3.bf16.msra.mxu1 %v6995_v43  ;;  %v7046_v43 = vpack.c.bf16 %v3378_v49, %v3377_v34  ;;  %v3553_v34 = vld [vmem:[#allocation8 + $0x560] sm:$0xff]  ;;  %v3554_v49 = vld [vmem:[#allocation8 + $0x568] sm:$0xff] }
 0x693   :  { %6997 = vmatprep.subr.bf16.mxu1 %v7463_v23 }
 0x696   :  { %6999 = vmatpush3.bf16.msra.mxu1 %v6998_v0  ;;  %v7049_v0 = vpack.c.bf16 %v3380_v24, %v3379_v36  ;;  %v3555_v36 = vld [vmem:[#allocation8 + $0x570] sm:$0xff]  ;;  %v3556_v24 = vld [vmem:[#allocation8 + $0x578] sm:$0xff] }
 0x697   :  { %7000 = vmatprep.subr.bf16.mxu1 %v7463_v23 }
 0x69a   :  { %7002 = vmatpush3.bf16.msra.mxu1 %v7001_v59  ;;  %v7052_v59 = vpack.c.bf16 %v3454_v40, %v3453_v33  ;;  %v3629_v33 = vld [vmem:[#allocation8 + $0x580] sm:$0xff]  ;;  %v3630_v40 = vld [vmem:[#allocation8 + $0x588] sm:$0xff] }
 0x69b   :  { %7003 = vmatprep.subr.bf16.mxu1 %v7463_v23 }
 0x69d   :  { %5934 = vmatmul.mubr.f32.vlgmr.msra.gmra.mrb[92].mxu1 %v7951_v21  ;;  %v3285_v21 = vld [vmem:[#allocation8 + $0x3c0] sm:$0xff] }
 0x69e   :  { %7005 = vmatpush3.bf16.msra.mxu1 %v7004_v18  ;;  %5968 = vmatprep.mubr.msk.f32.mxu1 %vm7464_vm1, %v7465_v15  ;;  %v7016_v17 = vpack.c.bf16 %v3286_v12, %v3285_v21  ;;  %v7055_v18 = vpack.c.bf16 %v3456_v55, %v3455_v44  ;;  %v3464_v21 = vld [vmem:[#allocation8 + $0x4d8] sm:$0xff]  ;;  %v3631_v44 = vld [vmem:[#allocation8 + $0x590] sm:$0xff] }
 0x69f   :  { %7006 = vmatprep.subr.bf16.mxu1 %v7463_v23  ;;  %v3632_v55 = vld [vmem:[#allocation8 + $0x598] sm:$0xff] }
 0x6a2   :  { %7008 = vmatpush3.bf16.msra.mxu1 %v7007_v63  ;;  %v7058_v63 = vpack.c.bf16 %v3458_v3, %v3457_v56  ;;  %v3633_v56 = vld [vmem:[#allocation8 + $0x5a0] sm:$0xff]  ;;  %v3634_v3 = vld [vmem:[#allocation8 + $0x5a8] sm:$0xff] }
 0x6a3   :  { %7009 = vmatprep.subr.bf16.mxu1 %v7463_v23 }
 0x6a6   :  { %7011 = vmatpush3.bf16.msra.mxu1 %v7010_v60  ;;  %v7061_v60 = vpack.c.bf16 %v3460_v2, %v3459_v50  ;;  %v3635_v50 = vld [vmem:[#allocation8 + $0x5b0] sm:$0xff]  ;;  %v3636_v2 = vld [vmem:[#allocation8 + $0x5b8] sm:$0xff] }
 0x6a7   :  { %7012 = vmatprep.subr.bf16.mxu1 %v7463_v23 }
 0x6aa   :  { %7014 = vmatpush3.bf16.msra.mxu1 %v7013_v62  ;;  %v3463_v62 = vld [vmem:[#allocation8 + $0x4d0] sm:$0xff] }
 0x6ab   :  { %7015 = vmatprep.subr.bf16.mxu1 %v7463_v23  ;;  %v7067_v12 = vpack.c.bf16 %v3464_v21, %v3463_v62  ;;  %v3640_v62 = vld [vmem:[#allocation8 + $0x5d8] sm:$0xff] }
 0x6ae   :  { %7017 = vmatpush3.bf16.msra.mxu1 %v7016_v17  ;;  %v3465_v17 = vld [vmem:[#allocation8 + $0x4e0] sm:$0xff] }
 0x6af   :  { %7018 = vmatprep.subr.bf16.mxu1 %v7463_v23  ;;  %v7070_v13 = vpack.c.bf16 %v3466_v48, %v3465_v17  ;;  %v3642_v17 = vld [vmem:[#allocation8 + $0x5e8] sm:$0xff] }
 0x6b0   :  { %v2762_v10 = vpop.f32.mrb[80].mxu1 }
 0x6b1   :  { %v5725_v1 = vpop.f32.mrb[81].mxu1 }
 0x6b2   :  { %7020 = vmatpush3.bf16.msra.mxu1 %v7019_v58  ;;  %v3468_v1 = vld [vmem:[#allocation8 + $0x4f8] sm:$0xff] }
 0x6b3   :  { %7021 = vmatprep.subr.bf16.mxu1 %v7463_v23 }
 0x6b6   :  { %7023 = vmatpush3.bf16.msra.mxu1 %v7022_v31 }
 0x6b7   :  { %7024 = vmatprep.subr.bf16.mxu1 %v7463_v23 }
 0x6ba   :  { %7026 = vmatpush3.bf16.msra.mxu1 %v7025_v20  ;;  %v7076_v20 = vpack.c.bf16 %v3542_v26, %v3541_v6  ;;  %v3806_v6 = vld [vmem:[#allocation8 + $0x688] sm:$0xff] }
 0x6bb   :  { %7027 = vmatprep.subr.bf16.mxu1 %v7463_v23 }
 0x6bd   :  { %5969 = vmatmul.mubr.f32.vlgmr.msra.gmra.mrb[94].mxu1 %v7948_v14  ;;  %v3373_v14 = vld [vmem:[#allocation8 + $0x440] sm:$0xff] }
 0x6be   :  { %7029 = vmatpush3.bf16.msra.mxu1 %v7028_v9  ;;  %6003 = vmatprep.mubr.msk.f32.mxu1 %vm7464_vm1, %v7465_v15  ;;  %v7040_v35 = vpack.c.bf16 %v3374_v45, %v3373_v14  ;;  %v3549_v14 = vld [vmem:[#allocation8 + $0x540] sm:$0xff]  ;;  %v3550_v45 = vld [vmem:[#allocation8 + $0x548] sm:$0xff] }
 0x6bf   :  { %7030 = vmatprep.subr.bf16.mxu1 %v7463_v23 }
 0x6c2   :  { %7032 = vmatpush3.bf16.msra.mxu1 %v7031_v46  ;;  %v3545_v46 = vld [vmem:[#allocation8 + $0x520] sm:$0xff] }
 0x6c3   :  { %7033 = vmatprep.subr.bf16.mxu1 %v7463_v23 }
 0x6c6   :  { %7035 = vmatpush3.bf16.msra.mxu1 %v7034_v19  ;;  %v7082_v19 = vpack.c.bf16 %v3546_v29, %v3545_v46  ;;  %v3811_v29 = vld [vmem:[#allocation8 + $0x6b0] sm:$0xff] }
 0x6c7   :  { %7036 = vmatprep.subr.bf16.mxu1 %v7463_v23 }
 0x6ca   :  { %7038 = vmatpush3.bf16.msra.mxu1 %v7037_v28  ;;  %v3548_v28 = vld [vmem:[#allocation8 + $0x538] sm:$0xff] }
 0x6cb   :  { %7039 = vmatprep.subr.bf16.mxu1 %v7463_v23 }
 0x6ce   :  { %7041 = vmatpush3.bf16.msra.mxu1 %v7040_v35  ;;  %v7088_v35 = vpack.c.bf16 %v3550_v45, %v3549_v14  ;;  %v3816_v14 = vld [vmem:[#allocation8 + $0x6d8] sm:$0xff] }
 0x6cf   :  { %7042 = vmatprep.subr.bf16.mxu1 %v7463_v23 }
 0x6d0   :  { %v2832_v51 = vpop.f32.mrb[82].mxu1 }
 0x6d1   :  { %v2833_v16 = vadd.f32 %v2832_v51, %v2762_v10  ;;  %v5760_v53 = vpop.f32.mrb[83].mxu1  ;;  %v3467_v10 = vld [vmem:[#allocation8 + $0x4f0] sm:$0xff] }
 0x6d2   :  { %7044 = vmatpush3.bf16.msra.mxu1 %v7043_v47  ;;  %v7073_v31 = vpack.c.bf16 %v3468_v1, %v3467_v10  ;;  %v7091_v47 = vpack.c.bf16 %v3552_v42, %v3551_v39  ;;  %v3644_v10 = vld [vmem:[#allocation8 + $0x5f8] sm:$0xff]  ;;  %v3818_v39 = vld [vmem:[#allocation8 + $0x6e8] sm:$0xff] }
 0x6d3   :  { %7045 = vmatprep.subr.bf16.mxu1 %v7463_v23 }
 0x6d6   :  { %7047 = vmatpush3.bf16.msra.mxu1 %v7046_v43  ;;  %v8058_v9 = vpop.f32.mrb[20].mxu0  ;;  %v7094_v43 = vpack.c.bf16 %v3554_v49, %v3553_v34 }
 0x6d7   :  { %7048 = vmatprep.subr.bf16.mxu1 %v7463_v23  ;;  %v6145_v27 = vpop.f32.mrb[21].mxu0 }
 0x6d8   :  { %v3809_v27 = vld [vmem:[#allocation8 + $0x6a0] sm:$0xff] }
 0x6da   :  { %7050 = vmatpush3.bf16.msra.mxu1 %v7049_v0  ;;  %v7097_v0 = vpack.c.bf16 %v3556_v24, %v3555_v36  ;;  %v3982_v36 = vld [vmem:[#allocation8 + $0x788] sm:$0xff] }
 0x6db   :  { %7051 = vmatprep.subr.bf16.mxu1 %v7463_v23 }
 0x6dd   :  { %6004 = vmatmul.mubr.f32.vlgmr.msra.gmra.mrb[96].mxu1 %v7956_v25  ;;  %v3461_v25 = vld [vmem:[#allocation8 + $0x4c0] sm:$0xff] }
 0x6de   :  { %7053 = vmatpush3.bf16.msra.mxu1 %v7052_v59  ;;  %6038 = vmatprep.mubr.msk.f32.mxu1 %vm7464_vm1, %v7465_v15  ;;  %v7064_v61 = vpack.c.bf16 %v3462_v57, %v3461_v25  ;;  %v7100_v59 = vpack.c.bf16 %v3630_v40, %v3629_v33  ;;  %v3638_v25 = vld [vmem:[#allocation8 + $0x5c8] sm:$0xff]  ;;  %v3984_v33 = vld [vmem:[#allocation8 + $0x798] sm:$0xff] }
 0x6df   :  { %7054 = vmatprep.subr.bf16.mxu1 %v7463_v23 }
 0x6e2   :  { %7056 = vmatpush3.bf16.msra.mxu1 %v7055_v18  ;;  %v7103_v18 = vpack.c.bf16 %v3632_v55, %v3631_v44  ;;  %v3986_v44 = vld [vmem:[#allocation8 + $0x7a8] sm:$0xff] }
 0x6e3   :  { %7057 = vmatprep.subr.bf16.mxu1 %v7463_v23 }
 0x6e6   :  { %7059 = vmatpush3.bf16.msra.mxu1 %v7058_v63  ;;  %v7106_v63 = vpack.c.bf16 %v3634_v3, %v3633_v56  ;;  %v3988_v56 = vld [vmem:[#allocation8 + $0x7b8] sm:$0xff] }
 0x6e7   :  { %7060 = vmatprep.subr.bf16.mxu1 %v7463_v23 }
 0x6ea   :  { %7062 = vmatpush3.bf16.msra.mxu1 %v7061_v60  ;;  %v7109_v60 = vpack.c.bf16 %v3636_v2, %v3635_v50  ;;  %v3992_v2 = vld [vmem:[#allocation8 + $0x7d8] sm:$0xff] }
 0x6eb   :  { %7063 = vmatprep.subr.bf16.mxu1 %v7463_v23 }
 0x6ee   :  { %7065 = vmatpush3.bf16.msra.mxu1 %v7064_v61  ;;  %v3639_v61 = vld [vmem:[#allocation8 + $0x5d0] sm:$0xff] }
 0x6ef   :  { %7066 = vmatprep.subr.bf16.mxu1 %v7463_v23  ;;  %v7115_v21 = vpack.c.bf16 %v3640_v62, %v3639_v61 }
 0x6f0   :  { %v2919_v8 = vpop.f32.mrb[84].mxu1 }
 0x6f1   :  { %v2923_v58 = vadd.f32 %v2919_v8, %v2833_v16  ;;  %v5795_v7 = vpop.f32.mrb[85].mxu1 }
 0x6f2   :  { %7068 = vmatpush3.bf16.msra.mxu1 %v7067_v12  ;;  %v3641_v12 = vld [vmem:[#allocation8 + $0x5e0] sm:$0xff] }
 0x6f3   :  { %7069 = vmatprep.subr.bf16.mxu1 %v7463_v23  ;;  %v7118_v7 = vpack.c.bf16 %v3642_v17, %v3641_v12  ;;  %v3995_v12 = vld [vmem:[#allocation8 + $0x7f0] sm:$0xff]  ;;  %v3996_v17 = vld [vmem:[#allocation8 + $0x7f8] sm:$0xff] }
 0x6f6   :  { %7071 = vmatpush3.bf16.msra.mxu1 %v7070_v13  ;;  %v8064_v32 = vpop.f32.mrb[22].mxu0  ;;  %v3643_v13 = vld [vmem:[#allocation8 + $0x5f0] sm:$0xff] }
 0x6f7   :  { %7072 = vmatprep.subr.bf16.mxu1 %v7463_v23  ;;  %v6215_v37 = vpop.f32.mrb[23].mxu0  ;;  %v7121_v1 = vpack.c.bf16 %v3644_v10, %v3643_v13 }
 0x6fa   :  { %7074 = vmatpush3.bf16.msra.mxu1 %v7073_v31  ;;  %v3805_v31 = vld [vmem:[#allocation8 + $0x680] sm:$0xff] }
 0x6fb   :  { %7075 = vmatprep.subr.bf16.mxu1 %v7463_v23  ;;  %v7148_v26 = vpack.c.bf16 %v3806_v6, %v3805_v31 }
 0x6fd   :  { %6039 = vmatmul.mubr.f32.vlgmr.msra.gmra.mrb[98].mxu1 %v7953_v4  ;;  %v7085_v4 = vpack.c.bf16 %v3548_v28, %v3547_v11  ;;  %v3814_v11 = vld [vmem:[#allocation8 + $0x6c8] sm:$0xff] }
 0x6fe   :  { %7077 = vmatpush3.bf16.msra.mxu1 %v7076_v20  ;;  %6073 = vmatprep.mubr.msk.f32.mxu1 %vm7464_vm1, %v7465_v15  ;;  %v3807_v20 = vld [vmem:[#allocation8 + $0x690] sm:$0xff] }
 0x6ff   :  { %7078 = vmatprep.subr.bf16.mxu1 %v7463_v23  ;;  %v7151_v54 = vpack.c.bf16 %v3808_v22, %v3807_v20 }
 0x702   :  { %7080 = vmatpush3.bf16.msra.mxu1 %v7079_v38  ;;  %v3810_v38 = vld [vmem:[#allocation8 + $0x6a8] sm:$0xff] }
 0x703   :  { %7081 = vmatprep.subr.bf16.mxu1 %v7463_v23  ;;  %v7154_v46 = vpack.c.bf16 %v3810_v38, %v3809_v27 }
 0x706   :  { %7083 = vmatpush3.bf16.msra.mxu1 %v7082_v19  ;;  %v3812_v19 = vld [vmem:[#allocation8 + $0x6b8] sm:$0xff] }
 0x707   :  { %7084 = vmatprep.subr.bf16.mxu1 %v7463_v23  ;;  %v7157_v37 = vpack.c.bf16 %v3812_v19, %v3811_v29 }
 0x70a   :  { %7086 = vmatpush3.bf16.msra.mxu1 %v7085_v4  ;;  %v3815_v4 = vld [vmem:[#allocation8 + $0x6d0] sm:$0xff] }
 0x70b   :  { %7087 = vmatprep.subr.bf16.mxu1 %v7463_v23  ;;  %v7163_v45 = vpack.c.bf16 %v3816_v14, %v3815_v4 }
 0x70e   :  { %7089 = vmatpush3.bf16.msra.mxu1 %v7088_v35  ;;  %v3817_v35 = vld [vmem:[#allocation8 + $0x6e0] sm:$0xff] }
 0x70f   :  { %7090 = vmatprep.subr.bf16.mxu1 %v7463_v23  ;;  %v7166_v49 = vpack.c.bf16 %v3818_v39, %v3817_v35 }
 0x710   :  { %v3007_v51 = vpop.f32.mrb[86].mxu1 }
 0x711   :  { %v3011_v16 = vadd.f32 %v3007_v51, %v2923_v58  ;;  %v5830_v53 = vpop.f32.mrb[87].mxu1  ;;  %v3819_v51 = vld [vmem:[#allocation8 + $0x6f0] sm:$0xff] }
 0x712   :  { %7092 = vmatpush3.bf16.msra.mxu1 %v7091_v47 }
 0x713   :  { %7093 = vmatprep.subr.bf16.mxu1 %v7463_v23 }
 0x716   :  { %7095 = vmatpush3.bf16.msra.mxu1 %v7094_v43  ;;  %v3981_v43 = vld [vmem:[#allocation8 + $0x780] sm:$0xff] }
 0x717   :  { %7096 = vmatprep.subr.bf16.mxu1 %v7463_v23  ;;  %v7196_v24 = vpack.c.bf16 %v3982_v36, %v3981_v43 }
 0x71a   :  { %7098 = vmatpush3.bf16.msra.mxu1 %v7097_v0  ;;  %v3983_v0 = vld [vmem:[#allocation8 + $0x790] sm:$0xff] }
 0x71b   :  { %7099 = vmatprep.subr.bf16.mxu1 %v7463_v23  ;;  %v7199_v40 = vpack.c.bf16 %v3984_v33, %v3983_v0 }
 0x71d   :  { %6074 = vmatmul.mubr.f32.vlgmr.msra.gmra.mrb[100].mxu1 %v7961_v30  ;;  %v3637_v30 = vld [vmem:[#allocation8 + $0x5c0] sm:$0xff] }
 0x71e   :  { %7101 = vmatpush3.bf16.msra.mxu1 %v7100_v59  ;;  %6108 = vmatprep.mubr.msk.f32.mxu1 %vm7464_vm1, %v7465_v15  ;;  %v7112_v57 = vpack.c.bf16 %v3638_v25, %v3637_v30  ;;  %v3985_v59 = vld [vmem:[#allocation8 + $0x7a0] sm:$0xff]  ;;  %v3994_v25 = vld [vmem:[#allocation8 + $0x7e8] sm:$0xff] }
 0x71f   :  { %7102 = vmatprep.subr.bf16.mxu1 %v7463_v23  ;;  %v7202_v55 = vpack.c.bf16 %v3986_v44, %v3985_v59  ;;  %v3993_v30 = vld [vmem:[#allocation8 + $0x7e0] sm:$0xff] }
 0x722   :  { %7104 = vmatpush3.bf16.msra.mxu1 %v7103_v18  ;;  %v3987_v18 = vld [vmem:[#allocation8 + $0x7b0] sm:$0xff] }
 0x723   :  { %7105 = vmatprep.subr.bf16.mxu1 %v7463_v23  ;;  %v7205_v3 = vpack.c.bf16 %v3988_v56, %v3987_v18 }
 0x726   :  { %7107 = vmatpush3.bf16.msra.mxu1 %v7106_v63  ;;  %v3990_v63 = vld [vmem:[#allocation8 + $0x7c8] sm:$0xff] }
 0x727   :  { %7108 = vmatprep.subr.bf16.mxu1 %v7463_v23 }
 0x72a   :  { %7110 = vmatpush3.bf16.msra.mxu1 %v7109_v60 }
 0x72b   :  { %7111 = vmatprep.subr.bf16.mxu1 %v7463_v23 }
 0x72e   :  { %7113 = vmatpush3.bf16.msra.mxu1 %v7112_v57 }
 0x72f   :  { %7114 = vmatprep.subr.bf16.mxu1 %v7463_v23 }
 0x730   :  { %v3095_v48 = vpop.f32.mrb[88].mxu1 }
 0x731   :  { %v3099_v8 = vadd.f32 %v3095_v48, %v3011_v16  ;;  %v5865_v58 = vpop.f32.mrb[89].mxu1  ;;  %v3820_v16 = vld [vmem:[#allocation8 + $0x6f8] sm:$0xff]  ;;  %v7217_v48 = vpack.c.bf16 %v3996_v17, %v3995_v12 }
 0x732   :  { %7116 = vmatpush3.bf16.msra.mxu1 %v7115_v21  ;;  %v7169_v53 = vpack.c.bf16 %v3820_v16, %v3819_v51  ;;  %v7214_v21 = vpack.c.bf16 %v3994_v25, %v3993_v30 }
 0x733   :  { %7117 = vmatprep.subr.bf16.mxu1 %v7463_v23 }
 0x736   :  { %7119 = vmatpush3.bf16.msra.mxu1 %v7118_v7 }
 0x737   :  { %7120 = vmatprep.subr.bf16.mxu1 %v7463_v23 }
 0x73a   :  { %7122 = vmatpush3.bf16.msra.mxu1 %v7121_v1 }
 0x73b   :  { %7147 = vmatprep.subr.bf16.mxu1 %v7463_v23 }
 0x73d   :  { %6109 = vmatmul.mubr.f32.vlgmr.msra.gmra.mrb[102].mxu1 %v7958_v5  ;;  %v3813_v5 = vld [vmem:[#allocation8 + $0x6c0] sm:$0xff] }
 0x73e   :  { %7149 = vmatpush3.bf16.msra.mxu1 %v7148_v26  ;;  %6178 = vmatprep.mubr.msk.f32.mxu1 %vm7464_vm1, %v7465_v15  ;;  %v7160_v28 = vpack.c.bf16 %v3814_v11, %v3813_v5 }
 0x73f   :  { %7150 = vmatprep.subr.bf16.mxu1 %v7463_v23 }
 0x742   :  { %7152 = vmatpush3.bf16.msra.mxu1 %v7151_v54 }
 0x743   :  { %7153 = vmatprep.subr.bf16.mxu1 %v7463_v23 }
 0x746   :  { %7155 = vmatpush3.bf16.msra.mxu1 %v7154_v46 }
 0x747   :  { %7156 = vmatprep.subr.bf16.mxu1 %v7463_v23 }
 0x74a   :  { %7158 = vmatpush3.bf16.msra.mxu1 %v7157_v37 }
 0x74b   :  { %7159 = vmatprep.subr.bf16.mxu1 %v7463_v23 }
 0x74e   :  { %7161 = vmatpush3.bf16.msra.mxu1 %v7160_v28 }
 0x74f   :  { %7162 = vmatprep.subr.bf16.mxu1 %v7463_v23 }
 0x750   :  { %v3183_v42 = vpop.f32.mrb[90].mxu1 }
 0x751   :  { %v3187_v47 = vadd.f32 %v3183_v42, %v3099_v8  ;;  %v5900_v34 = vpop.f32.mrb[91].mxu1 }
 0x752   :  { %7164 = vmatpush3.bf16.msra.mxu1 %v7163_v45 }
 0x753   :  { %7165 = vmatprep.subr.bf16.mxu1 %v7463_v23 }
 0x756   :  { %7167 = vmatpush3.bf16.msra.mxu1 %v7166_v49 }
 0x757   :  { %7168 = vmatprep.subr.bf16.mxu1 %v7463_v23 }
 0x75a   :  { %7170 = vmatpush3.bf16.msra.mxu1 %v7169_v53 }
 0x75b   :  { %7195 = vmatprep.subr.bf16.mxu1 %v7463_v23 }
 0x75d   :  { %6179 = vmatmul.mubr.f32.vlgmr.msra.gmra.mrb[104].mxu1 %v7963_v41  ;;  %v3989_v41 = vld [vmem:[#allocation8 + $0x7c0] sm:$0xff] }
 0x75e   :  { %7197 = vmatpush3.bf16.msra.mxu1 %v7196_v24  ;;  %6248 = vmatprep.mubr.msk.f32.mxu1 %vm7464_vm1, %v7465_v15  ;;  %v7208_v50 = vpack.c.bf16 %v3990_v63, %v3989_v41  ;;  %v3991_v15 = vld [vmem:[#allocation8 + $0x7d0] sm:$0xff] }
 0x75f   :  { %7198 = vmatprep.subr.bf16.mxu1 %v7463_v23  ;;  %v7211_v60 = vpack.c.bf16 %v3992_v2, %v3991_v15 }
 0x762   :  { %7200 = vmatpush3.bf16.msra.mxu1 %v7199_v40 }
 0x763   :  { %7201 = vmatprep.subr.bf16.mxu1 %v7463_v23 }
 0x766   :  { %7203 = vmatpush3.bf16.msra.mxu1 %v7202_v55 }
 0x767   :  { %7204 = vmatprep.subr.bf16.mxu1 %v7463_v23 }
 0x76a   :  { %7206 = vmatpush3.bf16.msra.mxu1 %v7205_v3 }
 0x76b   :  { %7207 = vmatprep.subr.bf16.mxu1 %v7463_v23 }
 0x76e   :  { %7209 = vmatpush3.bf16.msra.mxu1 %v7208_v50 }
 0x76f   :  { %7210 = vmatprep.subr.bf16.mxu1 %v7463_v23 }
 0x770   :  { %v3271_v57 = vpop.f32.mrb[92].mxu1 }
 0x771   :  { %v3275_v61 = vadd.f32 %v3271_v57, %v3187_v47  ;;  %v5935_v62 = vpop.f32.mrb[93].mxu1 }
 0x772   :  { %7212 = vmatpush3.bf16.msra.mxu1 %v7211_v60 }
 0x773   :  { %7213 = vmatprep.subr.bf16.mxu1 %v7463_v23 }
 0x776   :  { %7215 = vmatpush3.bf16.msra.mxu1 %v7214_v21 }
 0x777   :  { %7216 = vmatprep.subr.bf16.mxu1 %v7463_v23 }
 0x77a   :  { %7218 = vmatpush3.bf16.msra.mxu1 %v7217_v48 }
 0x77d   :  { %6249 = vmatmul.mubr.f32.vlgmr.msra.gmra.mrb[106].mxu1 %v7986_v52 }
 0x790   :  { %v3359_v8 = vpop.f32.mrb[94].mxu1 }
 0x791   :  { %v3363_v58 = vadd.f32 %v3359_v8, %v3275_v61  ;;  %v5970_v7 = vpop.f32.mrb[95].mxu1 }
 0x7b0   :  { %v3447_v13 = vpop.f32.mrb[96].mxu1 }
 0x7b1   :  { %v3451_v10 = vadd.f32 %v3447_v13, %v3363_v58  ;;  %v6005_v1 = vpop.f32.mrb[97].mxu1 }
 0x7d0   :  { %v3535_v31 = vpop.f32.mrb[98].mxu1 }
 0x7d1   :  { %v3539_v6 = vadd.f32 %v3535_v31, %v3451_v10  ;;  %v6040_v26 = vpop.f32.mrb[99].mxu1 }
 0x7d2   :  { %7392 = shalt.err (!%p7389_p8)
}
 0x7d3   :  { %s7393_s18 = scalar_lea.hbm %s8161_s8, 512 }
 0x7d4   :  { %p7394_p9 = scmp.ne.s32.totalorder %s8161_s8, %s7393_s18  ;;  %p7397_p10 = scmp.lt.u32.totalorder %s7393_s18, %s8161_s8 }
 0x7d6   :  { %p7399_p11 = pnand %p7397_p10, %p7394_p9 }
 0x7d8   :  { %7402 = shalt.err (!%p7399_p11)
}
 0x7d9   :  { %4099 = dma.vmem_to_hbm [thread:$0]  %s4094_s14, 512, %s8161_s8, [#allocation12], %s7459_s21, %s7459_s21, %s7460_s22  }
 0x7da   :  { %s7403_s26 = scalar_lea.vmem %s4082_s15, 2048  ;;  %p7408_p13 = scmp.lt.s32.totalorder %s4082_s15, %s4082_s15 }
 0x7db   :  { %p7404_p12 = scmp.ne.s32.totalorder %s4082_s15, %s7403_s26  ;;  %p7409_p0 = scmp.lt.s32.totalorder %s7403_s26, %s7403_s26 }
 0x7dd   :  { %p7410_p1 = por %p7409_p0, %p7408_p13 }
 0x7df   :  { %p7411_p2 = pnand %p7410_p1, %p7404_p12 }
 0x7e1   :  { %7414 = shalt.err (!%p7411_p2)
}
 0x7e2   :  { %s7415_s27 = scalar_lea.hbm %s8160_s7, 2048 }
 0x7e3   :  { %p7416_p3 = scmp.ne.s32.totalorder %s8160_s7, %s7415_s27  ;;  %p7419_p4 = scmp.lt.u32.totalorder %s7415_s27, %s8160_s7 }
 0x7e5   :  { %p7421_p5 = pnand %p7419_p4, %p7416_p3 }
 0x7e7   :  { %7424 = shalt.err (!%p7421_p5)
}
 0x7e8   :  { %4087 = dma.vmem_to_hbm [thread:$0]  %s4082_s15, 2048, %s8160_s7, [#allocation4], %s7459_s21, %s7459_s21, %s7460_s22  }
 0x7e9   :  { %v4142_v11 = vld [vmem:[%s8159_s6 + $0x2] ss:$0 sm:$0xff]  ;;  %s7468_s7 = smov [#allocation13]  }
 0x7ea   :  { %s4106_s21 = sshll.u32 %s7468_s7, 4  ;;  %s4107_s21 = int_to_ptr.vmem [resolvable:$true] %s4106_s21 }
 0x7eb   :  { %s7425_s22 = scalar_lea.vmem %s4107_s21, 128  ;;  %p7430_p7 = scmp.lt.s32.totalorder %s4107_s21, %s4107_s21 }
 0x7ec   :  { %p7426_p6 = scmp.ne.s32.totalorder %s4107_s21, %s7425_s22  ;;  %p7431_p8 = scmp.lt.s32.totalorder %s7425_s22, %s7425_s22 }
 0x7ee   :  { %p7432_p9 = por %p7431_p8, %p7430_p7 }
 0x7f0   :  { %v3623_v23 = vpop.f32.mrb[100].mxu1  ;;  %p7433_p10 = pnand %p7432_p9, %p7426_p6 }
 0x7f1   :  { %v3627_v52 = vadd.f32 %v3623_v23, %v3539_v6  ;;  %v6075_v20 = vpop.f32.mrb[101].mxu1 }
 0x810   :  { %v3711_v22 = vpop.f32.mrb[102].mxu1 }
 0x811   :  { %v3715_v54 = vadd.f32 %v3711_v22, %v3627_v52  ;;  %v6110_v27 = vpop.f32.mrb[103].mxu1 }
 0x813   :  { %v3803_v38 = vadd.f32 %v8058_v9, %v3715_v54 }
 0x830   :  { %v3887_v46 = vpop.f32.mrb[104].mxu1 }
 0x831   :  { %v3891_v29 = vadd.f32 %v3887_v46, %v3803_v38  ;;  %v6180_v19 = vpop.f32.mrb[105].mxu1 }
 0x833   :  { %v3979_v37 = vadd.f32 %v8064_v32, %v3891_v29 }
 0x850   :  { %v4063_v5 = vpop.f32.mrb[106].mxu1 }
 0x851   :  { %v4067_v28 = vadd.f32 %v4063_v5, %v3979_v37  ;;  %v6250_v4 = vpop.f32.mrb[107].mxu1 }
 0x853   :  { %v4073_v14 = vadd.f32 %v4142_v11, %v4067_v28 }
 0x855   :  { %7291 = vtanh.f32 %v4073_v14 }
 0x85f   :  { %v7292_v45 = vpop.eup %7291 }
 0x860   :  { %4075 = vst [vmem:[#allocation13] sm:$0xff] %v7292_v45 }
 0x861   :  { %7436 = shalt.err (!%p7433_p10)
}
 0x862   :  { %s7437_s6 = scalar_lea.hbm %s8162_s9, 128 }
 0x863   :  { %p7438_p11 = scmp.ne.s32.totalorder %s8162_s9, %s7437_s6  ;;  %p7441_p12 = scmp.lt.u32.totalorder %s7437_s6, %s8162_s9 }
 0x865   :  { %p7443_p13 = pnand %p7441_p12, %p7438_p11 }
 0x867   :  { %7446 = shalt.err (!%p7443_p13)
}
 0x868   :  { %4109 = dma.vmem_to_hbm [thread:$0]  %s4107_s21, 128, %s8162_s9, [#allocation12]  }
 0x869   :  { %7453 = dma.done.wait [#allocation4], 2048  }
 0x86a   :  { %7454 = vsyncadd [#allocation4], 4294965248 }
 0x86b   :  { %7455 = dma.done.wait [#allocation12], 640  }
 0x86c   :  { %7456 = vsyncadd [#allocation12], 4294966656 }
 0x86d   :  { %4119 = vsyncpa [#allocation3], 1 }
 0x86e   :  { %4120 = vsyncpa [#allocation6], 1 }
 0x86f   :  { %4121 = vsyncpa [#allocation9], 1 }
 0x870   :  { %4122 = vsyncpa [#allocation4], 1 }
 0x871   :  { %4123 = vsyncpa [#allocation12], 1 }

</bundles_post_ra>
